<compile_context>
chip_gen: v6e
topology: v6e:2x2x1
jax: 0.10.0
libtpu: 0.0.40
codegen_flags: <defaults>
</compile_context>

<pallas_src>
import math
from functools import partial

import jax
import jax.numpy as jnp
from jax.experimental import pallas as pl
from jax.experimental.pallas import tpu as pltpu

TIME_LEN = 8
JOINT_NUM = 22
SEQ_LEN = TIME_LEN * JOINT_NUM  # 176  (sequence length implied by the module's masks)


# -------------------------------------------------------------------------
# Domain masks (same construction as get_domain_mask, built in plain JAX)
# -------------------------------------------------------------------------
def get_domain_masks():
    block_diag = jnp.kron(
        jnp.eye(TIME_LEN, dtype=jnp.float32),
        jnp.ones((JOINT_NUM, JOINT_NUM), dtype=jnp.float32),
    )
    t_mask_base = jnp.ones((SEQ_LEN, SEQ_LEN), jnp.float32) - block_diag
    s_mask = 1.0 - t_mask_base                      # = block-diagonal ones
    t_mask = t_mask_base + jnp.eye(SEQ_LEN, dtype=jnp.float32)
    return t_mask, s_mask


# -------------------------------------------------------------------------
# Fused Pallas kernel: one batch element per grid step.
#   qkv = x @ Wqkv + bqkv          (Wq already pre-scaled by 1/sqrt(h_dim))
#   q, k, v = split; v = relu(v)
#   per head: s = q_h k_h^T + bias ; softmax ; out_h = p v_h
#   out = concat(out_h) written once as a lane-merged (L, h_num*h_dim) block
# -------------------------------------------------------------------------
def _mha_fused_kernel(x_ref, w_ref, b_ref, bias_ref, o_ref, *, h_num, h_dim):
    x = x_ref[0]                                                     # (L, D)
    qkv = jnp.dot(x, w_ref[...], preferred_element_type=jnp.float32) # (L, 3M)
    qkv = qkv + b_ref[...]

    m_dim = h_num * h_dim
    q = qkv[:, 0 * m_dim:1 * m_dim]                  # pre-scaled by 1/sqrt(h_dim)
    k = qkv[:, 1 * m_dim:2 * m_dim]
    v = jnp.maximum(qkv[:, 2 * m_dim:3 * m_dim], 0.0)  # value_map ReLU

    bias = bias_ref[...]                              # (L, L) additive mask bias

    outs = []
    for h in range(h_num):                            # static unrolled head loop
        lo, hi = h * h_dim, (h + 1) * h_dim
        qh = q[:, lo:hi]                              # (L, hd)
        kh = k[:, lo:hi]
        vh = v[:, lo:hi]

        s = jnp.dot(qh, kh.T, preferred_element_type=jnp.float32) + bias  # (L, L)
        s = s - jnp.max(s, axis=-1, keepdims=True)
        p = jnp.exp(s)
        inv = pl.reciprocal(jnp.sum(p, axis=-1, keepdims=True), approx=True)  # (L, 1)
        oh = jnp.dot(p, vh, preferred_element_type=jnp.float32) * inv        # (L, hd)
        outs.append(oh)

    o_ref[0] = jnp.concatenate(outs, axis=-1).astype(o_ref.dtype)     # (L, M)


def mha_forward(x, params, mask, h_num, h_dim):
    B, L, D = x.shape
    m_dim = h_num * h_dim
    scale = 1.0 / math.sqrt(h_dim)

    # Fold the 1/sqrt(h_dim) scale into the query projection; fuse the three
    # projections into one weight / bias.
    w_qkv = jnp.concatenate(
        [params["wq"] * scale, params["wk"], params["wv"]], axis=1
    )                                                    # (D, 3M)
    b_qkv = jnp.concatenate(
        [params["bq"] * scale, params["bk"], params["bv"]]
    ).reshape(1, 3 * m_dim)                              # (1, 3M)

    # Purely additive mask bias (equivalent to s*m + (1-m)*(-9e15) under softmax).
    mask_bias = (1.0 - mask) * (-9.0e15)                 # (L, L)

    return pl.pallas_call(
        partial(_mha_fused_kernel, h_num=h_num, h_dim=h_dim),
        out_shape=jax.ShapeDtypeStruct((B, L, m_dim), x.dtype),
        grid=(B,),
        in_specs=[
            pl.BlockSpec((1, L, D), lambda b: (b, 0, 0)),
            pl.BlockSpec((D, 3 * m_dim), lambda b: (0, 0)),
            pl.BlockSpec((1, 3 * m_dim), lambda b: (0, 0)),
            pl.BlockSpec((L, L), lambda b: (0, 0)),
        ],
        out_specs=pl.BlockSpec((1, L, m_dim), lambda b: (b, 0, 0)),
        compiler_params=pltpu.CompilerParams(dimension_semantics=("parallel",)),
    )(x, w_qkv, b_qkv, mask_bias)


# -------------------------------------------------------------------------
# Pure-JAX reference for correctness check
# -------------------------------------------------------------------------
def mha_reference(x, params, mask, h_num, h_dim):
    B, L, D = x.shape
    q = x @ params["wq"] + params["bq"]
    k = x @ params["wk"] + params["bk"]
    v = jnp.maximum(x @ params["wv"] + params["bv"], 0.0)

    def sh(t):
        return t.reshape(B, L, h_num, h_dim).transpose(0, 2, 1, 3)

    qh, kh, vh = sh(q), sh(k), sh(v)
    s = jnp.einsum("bhld,bhmd->bhlm", qh, kh) / math.sqrt(h_dim)
    s = s * mask + (1.0 - mask) * (-9.0e15)
    p = jax.nn.softmax(s, axis=-1)
    o = jnp.einsum("bhlm,bhmd->bhld", p, vh)
    return o.transpose(0, 2, 1, 3).reshape(B, L, h_num * h_dim)


if __name__ == "__main__":
    # Small shapes consistent with the module: seq_len fixed at 8*22=176 by the masks.
    B = 2
    INPUT_DIM = 16
    H_NUM = 2
    H_DIM = 8
    MODEL_DIM = H_NUM * H_DIM
    DOMAIN = "temporal"

    key = jax.random.PRNGKey(0)
    kx, kq, kk, kv, kbq, kbk, kbv = jax.random.split(key, 7)

    x = jax.random.normal(kx, (B, SEQ_LEN, INPUT_DIM), dtype=jnp.float32)

    bound = 1.0 / math.sqrt(INPUT_DIM)   # nn.Linear default init range
    params = {
        "wq": jax.random.uniform(kq, (INPUT_DIM, MODEL_DIM), jnp.float32, -bound, bound),
        "wk": jax.random.uniform(kk, (INPUT_DIM, MODEL_DIM), jnp.float32, -bound, bound),
        "wv": jax.random.uniform(kv, (INPUT_DIM, MODEL_DIM), jnp.float32, -bound, bound),
        "bq": jax.random.uniform(kbq, (MODEL_DIM,), jnp.float32, -bound, bound),
        "bk": jax.random.uniform(kbk, (MODEL_DIM,), jnp.float32, -bound, bound),
        "bv": jax.random.uniform(kbv, (MODEL_DIM,), jnp.float32, -bound, bound),
    }

    t_mask, s_mask = get_domain_masks()
    mask = t_mask if DOMAIN == "temporal" else s_mask

    out = mha_forward(x, params, mask, H_NUM, H_DIM)
    out = jax.block_until_ready(out)

    ref = mha_reference(x, params, mask, H_NUM, H_DIM)
    assert out.shape == (B, SEQ_LEN, MODEL_DIM)
    # Tolerance slightly loosened vs 1e-4 because the softmax denominator uses the
    # hardware approximate reciprocal (EUP); still well within f32-meaningful error.
    assert jnp.allclose(out, ref, rtol=2e-3, atol=2e-3), "mismatch vs reference"

    print("KERNEL_OK")
</pallas_src>

<mosaic_0001>
module attributes {stable_mosaic.version = 11 : i64} {
  func.func @_mha_fused_kernel(%arg0: i32, %arg1: memref<1x176x16xf32, #tpu.memory_space<vmem>>, %arg2: memref<16x48xf32, #tpu.memory_space<vmem>>, %arg3: memref<1x48xf32, #tpu.memory_space<vmem>>, %arg4: memref<176x176xf32, #tpu.memory_space<vmem>>, %arg5: memref<1x176x16xf32, #tpu.memory_space<vmem>>) attributes {dimension_semantics = [#tpu.dimension_semantics<parallel>], iteration_bounds = array<i64: 2>, scalar_prefetch = 0 : i64, scratch_operands = 0 : i64, tpu.core_type = #tpu.core_type<tc>, window_params = [{transform_indices = @transform_0, window_bounds = array<i64: 1, 176, 16>}, {pipeline_mode = #tpu.pipeline_mode<synchronous>, transform_indices = @transform_1, window_bounds = array<i64: 16, 48>}, {pipeline_mode = #tpu.pipeline_mode<synchronous>, transform_indices = @transform_2, window_bounds = array<i64: 1, 48>}, {pipeline_mode = #tpu.pipeline_mode<synchronous>, transform_indices = @transform_3, window_bounds = array<i64: 176, 176>}, {transform_indices = @transform_4, window_bounds = array<i64: 1, 176, 16>}]} {
    %c0 = arith.constant 0 : index
    %c0_0 = arith.constant 0 : index
    %c0_1 = arith.constant 0 : index
    %0 = vector.load %arg1[%c0, %c0_0, %c0_1] : memref<1x176x16xf32, #tpu.memory_space<vmem>>, vector<1x176x16xf32>
    %1 = vector.shape_cast %0 : vector<1x176x16xf32> to vector<176x16xf32>
    %c0_2 = arith.constant 0 : index
    %c0_3 = arith.constant 0 : index
    %2 = vector.load %arg2[%c0_2, %c0_3] : memref<16x48xf32, #tpu.memory_space<vmem>>, vector<16x48xf32>
    %cst = arith.constant dense<0.000000e+00> : vector<176x48xf32>
    %3 = tpu.matmul %1, %2, %cst {dimension_numbers = #tpu.dot_dimension_numbers<[1], [0], [0], [1], [0, 0, 1, 1], [], []>} : vector<176x16xf32>, vector<16x48xf32>, vector<176x48xf32> -> vector<176x48xf32>
    %c0_4 = arith.constant 0 : index
    %c0_5 = arith.constant 0 : index
    %4 = vector.load %arg3[%c0_4, %c0_5] : memref<1x48xf32, #tpu.memory_space<vmem>>, vector<1x48xf32>
    %5 = vector.broadcast %4 : vector<1x48xf32> to vector<176x48xf32>
    %6 = arith.addf %3, %5 : vector<176x48xf32>
    %7 = vector.extract_strided_slice %6 {offsets = [0, 0], sizes = [176, 16], strides = [1, 1]} : vector<176x48xf32> to vector<176x16xf32>
    %8 = vector.extract_strided_slice %6 {offsets = [0, 16], sizes = [176, 16], strides = [1, 1]} : vector<176x48xf32> to vector<176x16xf32>
    %9 = vector.extract_strided_slice %6 {offsets = [0, 32], sizes = [176, 16], strides = [1, 1]} : vector<176x48xf32> to vector<176x16xf32>
    %cst_6 = arith.constant 0.000000e+00 : f32
    %10 = vector.broadcast %cst_6 : f32 to vector<176x16xf32>
    %11 = arith.maximumf %9, %10 : vector<176x16xf32>
    %c0_7 = arith.constant 0 : index
    %c0_8 = arith.constant 0 : index
    %12 = vector.load %arg4[%c0_7, %c0_8] : memref<176x176xf32, #tpu.memory_space<vmem>>, vector<176x176xf32>
    %13 = vector.extract_strided_slice %7 {offsets = [0, 0], sizes = [176, 8], strides = [1, 1]} : vector<176x16xf32> to vector<176x8xf32>
    %14 = vector.extract_strided_slice %8 {offsets = [0, 0], sizes = [176, 8], strides = [1, 1]} : vector<176x16xf32> to vector<176x8xf32>
    %15 = vector.extract_strided_slice %11 {offsets = [0, 0], sizes = [176, 8], strides = [1, 1]} : vector<176x16xf32> to vector<176x8xf32>
    %16 = tpu.transpose %14, [1, 0] : vector<176x8xf32> -> vector<8x176xf32>
    %cst_9 = arith.constant dense<0.000000e+00> : vector<176x176xf32>
    %17 = tpu.matmul %13, %16, %cst_9 {dimension_numbers = #tpu.dot_dimension_numbers<[1], [0], [0], [1], [0, 0, 1, 1], [], []>} : vector<176x8xf32>, vector<8x176xf32>, vector<176x176xf32> -> vector<176x176xf32>
    %18 = arith.addf %17, %12 : vector<176x176xf32>
    %cst_10 = arith.constant dense<0xFF800000> : vector<176xf32>
    %19 = vector.multi_reduction <maximumf>, %18, %cst_10 [1] : vector<176x176xf32> to vector<176xf32>
    %20 = vector.shape_cast %19 : vector<176xf32> to vector<176x1xf32>
    %21 = vector.broadcast %20 : vector<176x1xf32> to vector<176x176xf32>
    %22 = arith.subf %18, %21 : vector<176x176xf32>
    %23 = math.exp %22 : vector<176x176xf32>
    %cst_11 = arith.constant dense<0.000000e+00> : vector<176xf32>
    %24 = vector.multi_reduction <add>, %23, %cst_11 [1] : vector<176x176xf32> to vector<176xf32>
    %25 = vector.shape_cast %24 : vector<176xf32> to vector<176x1xf32>
    %26 = tpu.reciprocal %25 {approx = true} : vector<176x1xf32> -> vector<176x1xf32>
    %cst_12 = arith.constant dense<0.000000e+00> : vector<176x8xf32>
    %27 = tpu.matmul %23, %15, %cst_12 {dimension_numbers = #tpu.dot_dimension_numbers<[1], [0], [0], [1], [0, 0, 1, 1], [], []>} : vector<176x176xf32>, vector<176x8xf32>, vector<176x8xf32> -> vector<176x8xf32>
    %28 = vector.broadcast %26 : vector<176x1xf32> to vector<176x8xf32>
    %29 = arith.mulf %27, %28 : vector<176x8xf32>
    %30 = vector.extract_strided_slice %7 {offsets = [0, 8], sizes = [176, 8], strides = [1, 1]} : vector<176x16xf32> to vector<176x8xf32>
    %31 = vector.extract_strided_slice %8 {offsets = [0, 8], sizes = [176, 8], strides = [1, 1]} : vector<176x16xf32> to vector<176x8xf32>
    %32 = vector.extract_strided_slice %11 {offsets = [0, 8], sizes = [176, 8], strides = [1, 1]} : vector<176x16xf32> to vector<176x8xf32>
    %33 = tpu.transpose %31, [1, 0] : vector<176x8xf32> -> vector<8x176xf32>
    %cst_13 = arith.constant dense<0.000000e+00> : vector<176x176xf32>
    %34 = tpu.matmul %30, %33, %cst_13 {dimension_numbers = #tpu.dot_dimension_numbers<[1], [0], [0], [1], [0, 0, 1, 1], [], []>} : vector<176x8xf32>, vector<8x176xf32>, vector<176x176xf32> -> vector<176x176xf32>
    %35 = arith.addf %34, %12 : vector<176x176xf32>
    %cst_14 = arith.constant dense<0xFF800000> : vector<176xf32>
    %36 = vector.multi_reduction <maximumf>, %35, %cst_14 [1] : vector<176x176xf32> to vector<176xf32>
    %37 = vector.shape_cast %36 : vector<176xf32> to vector<176x1xf32>
    %38 = vector.broadcast %37 : vector<176x1xf32> to vector<176x176xf32>
    %39 = arith.subf %35, %38 : vector<176x176xf32>
    %40 = math.exp %39 : vector<176x176xf32>
    %cst_15 = arith.constant dense<0.000000e+00> : vector<176xf32>
    %41 = vector.multi_reduction <add>, %40, %cst_15 [1] : vector<176x176xf32> to vector<176xf32>
    %42 = vector.shape_cast %41 : vector<176xf32> to vector<176x1xf32>
    %43 = tpu.reciprocal %42 {approx = true} : vector<176x1xf32> -> vector<176x1xf32>
    %cst_16 = arith.constant dense<0.000000e+00> : vector<176x8xf32>
    %44 = tpu.matmul %40, %32, %cst_16 {dimension_numbers = #tpu.dot_dimension_numbers<[1], [0], [0], [1], [0, 0, 1, 1], [], []>} : vector<176x176xf32>, vector<176x8xf32>, vector<176x8xf32> -> vector<176x8xf32>
    %45 = vector.broadcast %43 : vector<176x1xf32> to vector<176x8xf32>
    %46 = arith.mulf %44, %45 : vector<176x8xf32>
    %47 = tpu.concatenate %29, %46 in 1 : vector<176x8xf32>, vector<176x8xf32> -> vector<176x16xf32>
    %c0_17 = arith.constant 0 : index
    %c0_18 = arith.constant 0 : index
    %c0_19 = arith.constant 0 : index
    %48 = vector.load %arg5[%c0_17, %c0_18, %c0_19] : memref<1x176x16xf32, #tpu.memory_space<vmem>>, vector<1x176x16xf32>
    %49 = vector.shape_cast %48 : vector<1x176x16xf32> to vector<176x16xf32>
    %50 = vector.shape_cast %47 : vector<176x16xf32> to vector<1x176x16xf32>
    tpu.vector_store %arg5[%c0_17, %c0_18, %c0_19], %50 {strides = array<i32>} : memref<1x176x16xf32, #tpu.memory_space<vmem>>, vector<1x176x16xf32>,
    return
  }
  func.func @transform_0(%arg0: i32) -> (i32, i32, i32) {
    %c0_i32 = arith.constant 0 : i32
    %c0_i32_0 = arith.constant 0 : i32
    %c0_i32_1 = arith.constant 0 : i32
    return %arg0, %c0_i32, %c0_i32_0 : i32, i32, i32
  }
  func.func @transform_1(%arg0: i32) -> (i32, i32) {
    %c0_i32 = arith.constant 0 : i32
    %c0_i32_0 = arith.constant 0 : i32
    %c0_i32_1 = arith.constant 0 : i32
    return %c0_i32, %c0_i32_0 : i32, i32
  }
  func.func @transform_2(%arg0: i32) -> (i32, i32) {
    %c0_i32 = arith.constant 0 : i32
    %c0_i32_0 = arith.constant 0 : i32
    %c0_i32_1 = arith.constant 0 : i32
    return %c0_i32, %c0_i32_0 : i32, i32
  }
  func.func @transform_3(%arg0: i32) -> (i32, i32) {
    %c0_i32 = arith.constant 0 : i32
    %c0_i32_0 = arith.constant 0 : i32
    %c0_i32_1 = arith.constant 0 : i32
    return %c0_i32, %c0_i32_0 : i32, i32
  }
  func.func @transform_4(%arg0: i32) -> (i32, i32, i32) {
    %c0_i32 = arith.constant 0 : i32
    %c0_i32_0 = arith.constant 0 : i32
    %c0_i32_1 = arith.constant 0 : i32
    return %arg0, %c0_i32, %c0_i32_0 : i32, i32, i32
  }
}

</mosaic_0001>

<bundles_post_ra>
// kernel: tpu_custom_call.1
= control target key start
LH: loop header
LB: loop body
LE: loop exit
PB: predicated region body
PF: predicated region fallthrough
CT: control target
= control target key end

     0   :  { %s3423_s15 = smov 0   ;;  %s5357_s0 = inlined_call_operand.vmem [shape: f32[2,176,16], index: 0, kind: input, shape index: {}]   ;;  %s5358_s1 = inlined_call_operand.vmem [shape: f32[16,48], index: 1, kind: input, shape index: {}]   ;;  %s5359_s2 = inlined_call_operand.vmem [shape: f32[1,48], index: 2, kind: input, shape index: {}]   ;;  %s5360_s3 = inlined_call_operand.vmem [shape: f32[176,176], index: 3, kind: input, shape index: {}]   ;;  %s5361_s4 = inlined_call_operand.vmem [shape: f32[2,176,16], index: 4, kind: output, shape index: {}]  }
   0x1 LB: > { %s2790_s16 = sadd.s32 4294967295, %s3389_s15   ;;  %p2794_p0 = scmp.ge.s32.totalorder %s3389_s15, 1  ;;  %s3389_s15 = sphi %s3423_s15, %s14_s15  }
   0x2   : > { %p162_p1 = scmp.lt.s32.totalorder %s3389_s15, 3 }
   0x4   : > { %p163_p2 = pnand %p2794_p0, %p162_p1 }
   0x6   : > { %166 = sbr.rel (%p163_p2) target bundleno = 1836 (0x72c), region = 36 }
   0xb   : > { %v221_v0 = vld [vmem:[%s5358_s1 + $0x8] sm:$0xff]  ;;  %v220_v1 = vld [vmem:[%s5358_s1] sm:$0xff]  ;;  %p188_p3 = scmp.lt.s32.totalorder %s2790_s16, 1  ;;  %vm229_vm0 = vcmask 130048   ;;  %v5384_v33 = vmov 0.0   ;;  %s3392_s27 = smov 112  }
   0xc   : > { %2978 = vmatprep.subr.mxu0 %v221_v0  ;;  %692 = vmatprep.subr.mxu1 %v5384_v33  ;;  %v2797_v37 = vld [vmem:[%s5359_s2] ss:$0 sm:$0xff]  ;;  %s3393_s28 = smov 96   ;;  %s3394_s29 = smov 104   ;;  %vm603_vm1 = vcmask 64512   ;;  %vm889_vm2 = vcmask 392192  }
   0xd   : > { %2979 = vmatpush3.msra.mxu0 %v221_v0  ;;  %s5573_s16 = smov (!%p188_p3, %s2790_s16), 1  ;;  %756 = vmatprep.mubr.f32.mxu1 %v5384_v33  ;;  %s3395_s25 = smov 120  }
   0xe   : > { %2980 = vmatprep.subr.mxu0 %v220_v1  ;;  %s3059_s21 = smul.u32 176, %s5573_s16  ;;  %s3396_s5 = smov 88  }
   0xf   : > { %2981 = vmatpush3.msra.mxu0 %v220_v1 }
  0x10   : > { %s3445_s24 = scalar_lea.vmem %s5357_s0, %s3059_s21  ;;  %1374 = vmatprep.subr.mxu0 %v5384_v33  ;;  %s5244_s6 = scalar_lea.vmem %s5361_s4, %s3059_s21 }
  0x11   : > { %v198_v2 = vld [vmem:[%s3445_s24] sm:$0xff]  ;;  %v199_v3 = vld [vmem:[%s3445_s24 + $0x8] sm:$0xff]  ;;  %v200_v4 = vld [vmem:[%s3445_s24 + $0x10] sm:$0xff] }
  0x12   : > { %2982 = vmatprep.mubr.msk.f32.mxu0 %vm229_vm0, %v198_v2  ;;  %v201_v5 = vld [vmem:[%s3445_s24 + $0x18] sm:$0xff]  ;;  %v202_v6 = vld [vmem:[%s3445_s24 + $0x20] sm:$0xff]  ;;  %v203_v7 = vld [vmem:[%s3445_s24 + $0x28] sm:$0xff] }
  0x13   : > { %2983 = vmatmul.mubr.msk.f32.vlgmr.msra.gmra.mxu0 %vm229_vm0, %v199_v3  ;;  %v204_v8 = vld [vmem:[%s3445_s24 + $0x30] sm:$0xff]  ;;  %v205_v9 = vld [vmem:[%s3445_s24 + $0x38] sm:$0xff]  ;;  %v206_v10 = vld [vmem:[%s3445_s24 + $0x40] sm:$0xff] }
  0x14   : > { %2985 = vmatprep.mubr.msk.f32.mxu0 %vm229_vm0, %v200_v4  ;;  %v207_v11 = vld [vmem:[%s3445_s24 + $0x48] sm:$0xff]  ;;  %v208_v12 = vld [vmem:[%s3445_s24 + $0x50] sm:$0xff]  ;;  %v209_v13 = vld [vmem:[%s3445_s24 + $0x58] sm:$0xff] }
  0x15   : > { %v210_v14 = vld [vmem:[%s3445_s24 + $0x60] sm:$0xff]  ;;  %v211_v15 = vld [vmem:[%s3445_s24 + $0x68] sm:$0xff]  ;;  %v212_v16 = vld [vmem:[%s3445_s24 + $0x70] sm:$0xff] }
  0x16   : > { %v213_v17 = vld [vmem:[%s3445_s24 + $0x78] sm:$0xff]  ;;  %v214_v18 = vld [vmem:[%s3445_s24 + $0x80] sm:$0xff]  ;;  %v215_v19 = vld [vmem:[%s3445_s24 + $0x88] sm:$0xff] }
  0x17   : > { %2986 = vmatmul.mubr.msk.f32.gmra.mxu0 %vm229_vm0, %v201_v5  ;;  %v216_v20 = vld [vmem:[%s3445_s24 + $0x90] sm:$0xff]  ;;  %v217_v21 = vld [vmem:[%s3445_s24 + $0x98] sm:$0xff]  ;;  %v218_v22 = vld [vmem:[%s3445_s24 + $0xa0] sm:$0xff] }
  0x18   : > { %2988 = vmatprep.mubr.msk.f32.mxu0 %vm229_vm0, %v202_v6  ;;  %v219_v23 = vld [vmem:[%s3445_s24 + $0xa8] sm:$0xff] }
  0x1b   : > { %2989 = vmatmul.mubr.msk.f32.gmra.mxu0 %vm229_vm0, %v203_v7 }
  0x1c   : > { %2991 = vmatprep.mubr.msk.f32.mxu0 %vm229_vm0, %v204_v8 }
  0x1f   : > { %2992 = vmatmul.mubr.msk.f32.gmra.mxu0 %vm229_vm0, %v205_v9 }
  0x20   : > { %2994 = vmatprep.mubr.msk.f32.mxu0 %vm229_vm0, %v206_v10 }
  0x23   : > { %2995 = vmatmul.mubr.msk.f32.gmra.mxu0 %vm229_vm0, %v207_v11 }
  0x24   : > { %2997 = vmatprep.mubr.msk.f32.mxu0 %vm229_vm0, %v208_v12 }
  0x27   : > { %2998 = vmatmul.mubr.msk.f32.gmra.mxu0 %vm229_vm0, %v209_v13 }
  0x28   : > { %3000 = vmatprep.mubr.msk.f32.mxu0 %vm229_vm0, %v210_v14 }
  0x2b   : > { %3001 = vmatmul.mubr.msk.f32.gmra.mxu0 %vm229_vm0, %v211_v15 }
  0x2c   : > { %3003 = vmatprep.mubr.msk.f32.mxu0 %vm229_vm0, %v212_v16 }
  0x2f   : > { %3004 = vmatmul.mubr.msk.f32.gmra.mxu0 %vm229_vm0, %v213_v17 }
  0x30   : > { %3006 = vmatprep.mubr.msk.f32.mxu0 %vm229_vm0, %v214_v18 }
  0x33   : > { %3007 = vmatmul.mubr.msk.f32.gmra.mxu0 %vm229_vm0, %v215_v19 }
  0x34   : > { %3009 = vmatprep.mubr.msk.f32.mxu0 %vm229_vm0, %v216_v20 }
  0x37   : > { %3010 = vmatmul.mubr.msk.f32.gmra.mxu0 %vm229_vm0, %v217_v21 }
  0x38   : > { %3012 = vmatprep.mubr.msk.f32.mxu0 %vm229_vm0, %v218_v22 }
  0x3b   : > { %3013 = vmatmul.mubr.msk.f32.gmra.mxu0 %vm229_vm0, %v219_v23 }
  0xd3   : > { %v2984_v24 = vpop.f32.mrf.mxu0 }
  0xd4   : > { %v3559_v0 = vadd.f32 %v2984_v24, %v2797_v37 }
  0xd5   : > { %v362_v25 = vpop.f32.mrf.mxu0 }
  0xd6   : > { %v3549_v61 = vadd.f32 %v2797_v37, %v362_v25  ;;  %v5374_v22 = vmax.f32 %v3559_v0, 0.0 }
  0xd7   : > { %v2987_v26 = vpop.f32.mrf.mxu0 }
  0xd8   : > { %5432 = vst [vmem:[#allocation9_spill] sm:$0xff] %v3549_v61  ;;  %v3551_v62 = vadd.f32 %v2987_v26, %v2797_v37  ;;  %v5373_v23 = vmax.f32 %v3549_v61, 0.0 }
  0xd9   : > { %v372_v27 = vpop.f32.mrf.mxu0 }
  0xda   : > { %v3541_v58 = vadd.f32 %v2797_v37, %v372_v27  ;;  %v5367_v15 = vmax.f32 %v3551_v62, 0.0 }
  0xdb   : > { %v2990_v28 = vpop.f32.mrf.mxu0 }
  0xdc   : > { %5431 = vst [vmem:[#allocation8_spill] sm:$0xff] %v3541_v58  ;;  %v3543_v59 = vadd.f32 %v2990_v28, %v2797_v37  ;;  %v5375_v21 = vmax.f32 %v3541_v58, 0.0 }
  0xdd   : > { %v382_v29 = vpop.f32.mrf.mxu0 }
  0xde   : > { %v3533_v55 = vadd.f32 %v2797_v37, %v382_v29  ;;  %v5377_v18 = vmax.f32 %v3543_v59, 0.0 }
  0xdf   : > { %v2993_v30 = vpop.f32.mrf.mxu0 }
  0xe0   : > { %5430 = vst [vmem:[#allocation7_spill] sm:$0xff] %v3533_v55  ;;  %v3535_v56 = vadd.f32 %v2993_v30, %v2797_v37  ;;  %v5376_v20 = vmax.f32 %v3533_v55, 0.0 }
  0xe1   : > { %v392_v31 = vpop.f32.mrf.mxu0 }
  0xe2   : > { %v3525_v52 = vadd.f32 %v2797_v37, %v392_v31  ;;  %v5368_v13 = vmax.f32 %v3535_v56, 0.0 }
  0xe3   : > { %v2996_v32 = vpop.f32.mrf.mxu0 }
  0xe4   : > { %5429 = vst [vmem:[#allocation6_spill] sm:$0xff] %v3525_v52  ;;  %v3527_v53 = vadd.f32 %v2996_v32, %v2797_v37  ;;  %v5378_v16 = vmax.f32 %v3525_v52, 0.0 }
  0xe5   : > { %v402_v34 = vpop.f32.mrf.mxu0 }
  0xe6   : > { %v3517_v49 = vadd.f32 %v2797_v37, %v402_v34  ;;  %v5380_v12 = vmax.f32 %v3527_v53, 0.0 }
  0xe7   : > { %v2999_v35 = vpop.f32.mrf.mxu0 }
  0xe8   : > { %5428 = vst [vmem:[#allocation5_spill] sm:$0xff] %v3517_v49  ;;  %v3519_v50 = vadd.f32 %v2999_v35, %v2797_v37  ;;  %v5379_v14 = vmax.f32 %v3517_v49, 0.0 }
  0xe9   : > { %v412_v36 = vpop.f32.mrf.mxu0 }
  0xea   : > { %v3509_v46 = vadd.f32 %v2797_v37, %v412_v36  ;;  %v5369_v11 = vmax.f32 %v3519_v50, 0.0 }
  0xeb   : > { %v3002_v38 = vpop.f32.mrf.mxu0 }
  0xec   : > { %v3497_v39 = vadd.f32 %v3002_v38, %v2797_v37  ;;  %5426 = vst [vmem:[#allocation3_spill] sm:$0xff] %v3509_v46  ;;  %v5381_v10 = vmax.f32 %v3509_v46, 0.0 }
  0xed   : > { %v422_v40 = vpop.f32.mrf.mxu0 }
  0xee   : > { %585 = vrot.lane.b32.xlu1 %v3497_v39, %s3392_s27  ;;  %v3501_v42 = vadd.f32 %v2797_v37, %v422_v40  ;;  %v5370_v9 = vmax.f32 %v3497_v39, 0.0 }
  0xef   : > { %v3005_v41 = vpop.f32.mrf.mxu0 }
  0xf0   : > { %5425 = vst [vmem:[#allocation2_spill] sm:$0xff] %v3501_v42  ;;  %v3503_v43 = vadd.f32 %v3005_v41, %v2797_v37  ;;  %v5382_v8 = vmax.f32 %v3501_v42, 0.0 }
  0xf1   : > { %v432_v44 = vpop.f32.mrf.mxu0 }
  0xf2   : > { %589 = vrot.lane.b32.xlu0 %v3503_v43, %s3392_s27  ;;  %583 = vrot.lane.b32.xlu1 %v3501_v42, %s3392_s27  ;;  %v3511_v47 = vadd.f32 %v2797_v37, %v432_v44  ;;  %v5371_v7 = vmax.f32 %v3503_v43, 0.0 }
  0xf3   : > { %v3008_v45 = vpop.f32.mrf.mxu0 }
  0xf4   : > { %5427 = vst [vmem:[#allocation4_spill] sm:$0xff] %v3511_v47  ;;  %v3577_v5 = vadd.f32 %v3008_v45, %v2797_v37  ;;  %v5383_v6 = vmax.f32 %v3511_v47, 0.0 }
  0xf5   : > { %v442_v48 = vpop.f32.mrf.mxu0 }
  0xf6   : > { %587 = vrot.lane.b32.xlu0 %v3511_v47, %s3392_s27  ;;  %579 = vrot.lane.b32.xlu1 %v3509_v46, %s3392_s27  ;;  %v3569_v3 = vadd.f32 %v2797_v37, %v442_v48  ;;  %v5363_v17 = vmax.f32 %v3577_v5, 0.0 }
  0xf7   : > { %v3011_v51 = vpop.f32.mrf.mxu0 }
  0xf8   : > { %v3571_v4 = vadd.f32 %v3011_v51, %v2797_v37  ;;  %v5362_v19 = vmax.f32 %v3569_v3, 0.0 }
  0xf9   : > { %v452_v54 = vpop.f32.mrf.mxu0 }
  0xfa   : > { %581 = vrot.lane.b32.xlu0 %v3519_v50, %s3392_s27  ;;  %575 = vrot.lane.b32.xlu1 %v3517_v49, %s3392_s27  ;;  %v3561_v1 = vadd.f32 %v2797_v37, %v452_v54  ;;  %v5372_v24 = vmax.f32 %v3571_v4, 0.0 }
  0xfb   : > { %v3014_v57 = vpop.f32.mrf.mxu0 }
  0xfc   : > { %5434 = vst [vmem:[#allocation11_spill] sm:$0xff] %v3561_v1  ;;  %v3563_v2 = vadd.f32 %v3014_v57, %v2797_v37  ;;  %v5364_v26 = vmax.f32 %v3561_v1, 0.0 }
  0xfd   : > { %v462_v60 = vpop.f32.mrf.mxu0 }
  0xfe   : > { %577 = vrot.lane.b32.xlu0 %v3527_v53, %s3392_s27  ;;  %571 = vrot.lane.b32.xlu1 %v3525_v52, %s3392_s27  ;;  %v3557_v63 = vadd.f32 %v2797_v37, %v462_v60  ;;  %v5366_v25 = vmax.f32 %v3563_v2, 0.0 }
 0x100   : > { %5433 = vst [vmem:[#allocation10_spill] sm:$0xff] %v3557_v63  ;;  %v5365_v27 = vmax.f32 %v3557_v63, 0.0 }
 0x102   : > { %573 = vrot.lane.b32.xlu0 %v3535_v56, %s3392_s27  ;;  %567 = vrot.lane.b32.xlu1 %v3533_v55, %s3392_s27 }
 0x106   : > { %569 = vrot.lane.b32.xlu0 %v3543_v59, %s3392_s27  ;;  %563 = vrot.lane.b32.xlu1 %v3541_v58, %s3392_s27 }
 0x10a   : > { %565 = vrot.lane.b32.xlu0 %v3551_v62, %s3392_s27  ;;  %559 = vrot.lane.b32.xlu1 %v3549_v61, %s3392_s27 }
 0x10e   : > { %561 = vrot.lane.b32.xlu0 %v3559_v0, %s3392_s27  ;;  %599 = vrot.lane.b32.xlu1 %v3557_v63, %s3392_s27 }
 0x112   : > { %601 = vrot.lane.b32.xlu0 %v3563_v2, %s3392_s27  ;;  %595 = vrot.lane.b32.xlu1 %v3561_v1, %s3392_s27 }
 0x116   : > { %597 = vrot.lane.b32.xlu0 %v3571_v4, %s3392_s27  ;;  %591 = vrot.lane.b32.xlu1 %v3569_v3, %s3392_s27 }
 0x11a   : > { %593 = vrot.lane.b32.xlu0 %v3577_v5, %s3392_s27  ;;  %1270 = vrot.lane.b32.xlu1 %v5383_v6, %s3393_s28 }
 0x11e   : > { %1272 = vrot.lane.b32.xlu0 %v5371_v7, %s3393_s28  ;;  %1266 = vrot.lane.b32.xlu1 %v5382_v8, %s3393_s28 }
 0x122   : > { %1268 = vrot.lane.b32.xlu0 %v5370_v9, %s3393_s28  ;;  %1262 = vrot.lane.b32.xlu1 %v5381_v10, %s3393_s28 }
 0x126   : > { %1264 = vrot.lane.b32.xlu0 %v5369_v11, %s3393_s28  ;;  %1260 = vrot.lane.b32.xlu1 %v5380_v12, %s3393_s28 }
 0x12a   : > { %1256 = vrot.lane.b32.xlu0 %v5368_v13, %s3393_s28  ;;  %1258 = vrot.lane.b32.xlu1 %v5379_v14, %s3393_s28 }
 0x12e   : > { %1248 = vrot.lane.b32.xlu0 %v5367_v15, %s3393_s28  ;;  %1254 = vrot.lane.b32.xlu1 %v5378_v16, %s3393_s28 }
 0x132   : > { %1276 = vrot.lane.b32.xlu0 %v5363_v17, %s3393_s28  ;;  %1252 = vrot.lane.b32.xlu1 %v5377_v18, %s3393_s28 }
 0x136   : > { %1274 = vrot.lane.b32.xlu0 %v5362_v19, %s3393_s28  ;;  %1250 = vrot.lane.b32.xlu1 %v5376_v20, %s3393_s28 }
 0x13a   : > { %1643 = vrot.lane.b32.xlu0 %v3511_v47, %s3394_s29  ;;  %1246 = vrot.lane.b32.xlu1 %v5375_v21, %s3393_s28 }
 0x13e   : > { %1639 = vrot.lane.b32.xlu0 %v3501_v42, %s3394_s29  ;;  %1244 = vrot.lane.b32.xlu1 %v5374_v22, %s3393_s28 }
 0x142   : > { %1635 = vrot.lane.b32.xlu0 %v3509_v46, %s3394_s29  ;;  %1242 = vrot.lane.b32.xlu1 %v5373_v23, %s3393_s28 }
 0x146   : > { %1631 = vrot.lane.b32.xlu0 %v3517_v49, %s3394_s29  ;;  %1280 = vrot.lane.b32.xlu1 %v5372_v24, %s3393_s28 }
 0x14a   : > { %1284 = vrot.lane.b32.xlu0 %v5366_v25, %s3393_s28  ;;  %1278 = vrot.lane.b32.xlu1 %v5364_v26, %s3393_s28 }
 0x14e   : > { %1282 = vrot.lane.b32.xlu0 %v5365_v27, %s3393_s28  ;;  %1645 = vrot.lane.b32.xlu1 %v3503_v43, %s3394_s29  ;;  %s3397_s28 = smov 8  }
 0x152   : > { %1627 = vrot.lane.b32.xlu0 %v3525_v52, %s3394_s29  ;;  %1641 = vrot.lane.b32.xlu1 %v3497_v39, %s3394_s29 }
 0x156   : > { %1623 = vrot.lane.b32.xlu0 %v3533_v55, %s3394_s29  ;;  %1637 = vrot.lane.b32.xlu1 %v3519_v50, %s3394_s29 }
 0x15a   : > { %1619 = vrot.lane.b32.xlu0 %v3541_v58, %s3394_s29  ;;  %1633 = vrot.lane.b32.xlu1 %v3527_v53, %s3394_s29 }
 0x15e   : > { %1617 = vrot.lane.b32.xlu0 %v3559_v0, %s3394_s29  ;;  %1629 = vrot.lane.b32.xlu1 %v3535_v56, %s3394_s29 }
 0x160   : > { %v586_v28 = vpop.permute.xlu1 %585 }
 0x162   : > { %1625 = vrot.lane.b32.xlu1 %v3543_v59, %s3394_s29 }
 0x164   : > { %v590_v29 = vpop.permute.xlu0 %589  ;;  %v584_v30 = vpop.permute.xlu1 %583 }
 0x165   : > { %2820 = vmatpush1.xpose.msk.msra.mxu1 %vm603_vm1, %v590_v29 }
 0x166   : > { %1621 = vrot.lane.b32.xlu1 %v3551_v62, %s3394_s29  ;;  %694 = vmatprep.subr.mxu1 %v5384_v33 }
 0x168   : > { %v588_v31 = vpop.permute.xlu0 %587  ;;  %v580_v32 = vpop.permute.xlu1 %579 }
 0x169   : > { %2821 = vmatpush1.xpose.msk.msra.mxu1 %vm603_vm1, %v588_v31 }
 0x16a   : > { %696 = vmatprep.subr.mxu1 %v5384_v33 }
 0x16c   : > { %v582_v34 = vpop.permute.xlu0 %581  ;;  %v576_v35 = vpop.permute.xlu1 %575 }
 0x16d   : > { %2822 = vmatpush1.xpose.msk.msra.mxu1 %vm603_vm1, %v586_v28 }
 0x16e   : > { %698 = vmatprep.subr.mxu1 %v5384_v33 }
 0x170   : > { %v578_v36 = vpop.permute.xlu0 %577  ;;  %v572_v37 = vpop.permute.xlu1 %571 }
 0x171   : > { %2823 = vmatpush1.xpose.msk.msra.mxu1 %vm603_vm1, %v584_v30 }
 0x172   : > { %700 = vmatprep.subr.mxu1 %v5384_v33 }
 0x174   : > { %v574_v38 = vpop.permute.xlu0 %573  ;;  %v568_v40 = vpop.permute.xlu1 %567 }
 0x175   : > { %2824 = vmatpush1.xpose.msk.msra.mxu1 %vm603_vm1, %v582_v34 }
 0x176   : > { %702 = vmatprep.subr.mxu1 %v5384_v33 }
 0x178   : > { %v570_v41 = vpop.permute.xlu0 %569  ;;  %v564_v44 = vpop.permute.xlu1 %563 }
 0x179   : > { %2825 = vmatpush1.xpose.msk.msra.mxu1 %vm603_vm1, %v580_v32 }
 0x17a   : > { %704 = vmatprep.subr.mxu1 %v5384_v33 }
 0x17c   : > { %v566_v45 = vpop.permute.xlu0 %565  ;;  %v560_v48 = vpop.permute.xlu1 %559 }
 0x17d   : > { %2826 = vmatpush1.xpose.msk.msra.mxu1 %vm603_vm1, %v578_v36 }
 0x17e   : > { %706 = vmatprep.subr.mxu1 %v5384_v33 }
 0x180   : > { %v562_v51 = vpop.permute.xlu0 %561  ;;  %v3717_v54 = vpop.permute.xlu1 %599 }
 0x181   : > { %2827 = vmatpush1.xpose.msk.msra.mxu1 %vm603_vm1, %v576_v35 }
 0x182   : > { %708 = vmatprep.subr.mxu1 %v5384_v33 }
 0x184   : > { %v602_v57 = vpop.permute.xlu0 %601  ;;  %v3721_v60 = vpop.permute.xlu1 %595 }
 0x185   : > { %2828 = vmatpush1.xpose.msk.msra.mxu1 %vm603_vm1, %v574_v38 }
 0x186   : > { %710 = vmatprep.subr.mxu1 %v5384_v33 }
 0x188   : > { %v3725_v28 = vpop.permute.xlu0 %597  ;;  %v3727_v29 = vpop.permute.xlu1 %591 }
 0x189   : > { %2829 = vmatpush1.xpose.msk.msra.mxu1 %vm603_vm1, %v572_v37 }
 0x18a   : > { %712 = vmatprep.subr.mxu1 %v5384_v33 }
 0x18c   : > { %v3731_v30 = vpop.permute.xlu0 %593  ;;  %v1271_v31 = vpop.permute.xlu1 %1270 }
 0x18d   : > { %2830 = vmatpush1.xpose.msk.msra.mxu1 %vm603_vm1, %v570_v41 }
 0x18e   : > { %714 = vmatprep.subr.mxu1 %v5384_v33 }
 0x190   : > { %v1273_v32 = vpop.permute.xlu0 %1272  ;;  %v1267_v34 = vpop.permute.xlu1 %1266 }
 0x191   : > { %2831 = vmatpush1.xpose.msk.msra.mxu1 %vm603_vm1, %v568_v40  ;;  %1375 = vmatpush1.msra.mxu0 %v1273_v32 }
 0x192   : > { %1376 = vmatprep.subr.mxu0 %v5384_v33  ;;  %716 = vmatprep.subr.mxu1 %v5384_v33 }
 0x193   : > { %1377 = vmatpush1.msra.mxu0 %v1271_v31 }
 0x194   : > { %v1269_v35 = vpop.permute.xlu0 %1268  ;;  %1378 = vmatprep.subr.mxu0 %v5384_v33  ;;  %v1263_v36 = vpop.permute.xlu1 %1262 }
 0x195   : > { %2832 = vmatpush1.xpose.msk.msra.mxu1 %vm603_vm1, %v566_v45  ;;  %1379 = vmatpush1.msra.mxu0 %v1269_v35 }
 0x196   : > { %1380 = vmatprep.subr.mxu0 %v5384_v33  ;;  %718 = vmatprep.subr.mxu1 %v5384_v33 }
 0x197   : > { %1381 = vmatpush1.msra.mxu0 %v1267_v34 }
 0x198   : > { %v1265_v37 = vpop.permute.xlu0 %1264  ;;  %1382 = vmatprep.subr.mxu0 %v5384_v33  ;;  %v1261_v38 = vpop.permute.xlu1 %1260 }
 0x199   : > { %2833 = vmatpush1.xpose.msk.msra.mxu1 %vm603_vm1, %v564_v44  ;;  %1383 = vmatpush1.msra.mxu0 %v1265_v37 }
 0x19a   : > { %1384 = vmatprep.subr.mxu0 %v5384_v33  ;;  %720 = vmatprep.subr.mxu1 %v5384_v33 }
 0x19b   : > { %1385 = vmatpush1.msra.mxu0 %v1263_v36 }
 0x19c   : > { %v1257_v40 = vpop.permute.xlu0 %1256  ;;  %1386 = vmatprep.subr.mxu0 %v5384_v33  ;;  %v1259_v41 = vpop.permute.xlu1 %1258 }
 0x19d   : > { %2834 = vmatpush1.xpose.msk.msra.mxu1 %vm603_vm1, %v562_v51  ;;  %1387 = vmatpush1.msra.mxu0 %v1261_v38 }
 0x19e   : > { %1388 = vmatprep.subr.mxu0 %v5384_v33  ;;  %722 = vmatprep.subr.mxu1 %v5384_v33 }
 0x19f   : > { %1389 = vmatpush1.msra.mxu0 %v1259_v41  ;;  %v494_v41 = vld [vmem:[%s5360_s3 + $0x8] sm:$0xff] }
 0x1a0   : > { %v1249_v45 = vpop.permute.xlu0 %1248  ;;  %1390 = vmatprep.subr.mxu0 %v5384_v33  ;;  %v1255_v44 = vpop.permute.xlu1 %1254 }
 0x1a1   : > { %2835 = vmatpush1.xpose.msk.msra.mxu1 %vm603_vm1, %v560_v48  ;;  %1391 = vmatpush1.msra.mxu0 %v1257_v40 }
 0x1a2   : > { %1392 = vmatprep.subr.mxu0 %v5384_v33  ;;  %744 = vmatprep.subr.mxu1 %v5384_v33 }
 0x1a3   : > { %1393 = vmatpush1.msra.mxu0 %v1255_v44 }
 0x1a4   : > { %v1277_v31 = vpop.permute.xlu0 %1276  ;;  %1394 = vmatprep.subr.mxu0 %v5384_v33  ;;  %v1253_v51 = vpop.permute.xlu1 %1252 }
 0x1a5   : > { %2836 = vmatpush2.xpose.msk.msra.mxu1 %vm603_vm1, %v602_v57  ;;  %1395 = vmatpush1.msra.mxu0 %v1253_v51 }
 0x1a6   : > { %746 = vmatprep.subr.mxu1 %v5384_v33  ;;  %1396 = vmatprep.subr.mxu0 %v5384_v33 }
 0x1a8   : > { %v1275_v32 = vpop.permute.xlu0 %1274  ;;  %v1251_v34 = vpop.permute.xlu1 %1250 }
 0x1a9   : > { %2837 = vmatpush2.xpose.msk.msra.mxu1 %vm603_vm1, %v3717_v54  ;;  %1397 = vmatpush1.msra.mxu0 %v1251_v34  ;;  %v496_v34 = vld [vmem:[%s5360_s3 + $0x18] sm:$0xff] }
 0x1aa   : > { %1398 = vmatprep.subr.mxu0 %v5384_v33  ;;  %748 = vmatprep.subr.mxu1 %v5384_v33 }
 0x1ab   : > { %1399 = vmatpush1.msra.mxu0 %v1249_v45  ;;  %v493_v45 = vld [vmem:[%s5360_s3] sm:$0xff] }
 0x1ac   : > { %v3762_v48 = vpop.permute.xlu0 %1643  ;;  %1400 = vmatprep.subr.mxu0 %v5384_v33  ;;  %v1247_v57 = vpop.permute.xlu1 %1246 }
 0x1ad   : > { %2838 = vmatpush2.xpose.msk.msra.mxu1 %vm603_vm1, %v3725_v28  ;;  %1401 = vmatpush1.msra.mxu0 %v1247_v57  ;;  %v495_v57 = vld [vmem:[%s5360_s3 + $0x10] sm:$0xff] }
 0x1ae   : > { %750 = vmatprep.subr.mxu1 %v5384_v33  ;;  %1402 = vmatprep.subr.mxu0 %v5384_v33 }
 0x1b0   : > { %v3769_v54 = vpop.permute.xlu0 %1639  ;;  %v1245_v35 = vpop.permute.xlu1 %1244 }
 0x1b1   : > { %2839 = vmatpush2.xpose.msk.msra.mxu1 %vm603_vm1, %v3721_v60  ;;  %1403 = vmatpush1.msra.mxu0 %v1245_v35 }
 0x1b2   : > { %752 = vmatprep.subr.mxu1 %v5384_v33  ;;  %1404 = vmatprep.subr.mxu0 %v5384_v33 }
 0x1b4   : > { %v3775_v36 = vpop.permute.xlu0 %1635  ;;  %v1243_v37 = vpop.permute.xlu1 %1242 }
 0x1b5   : > { %2840 = vmatpush2.xpose.msk.msra.mxu1 %vm603_vm1, %v3731_v30  ;;  %1405 = vmatpush1.msra.mxu0 %v1243_v37 }
 0x1b6   : > { %754 = vmatprep.subr.mxu1 %v5384_v33  ;;  %1426 = vmatprep.subr.mxu0 %v5384_v33 }
 0x1b8   : > { %v3781_v28 = vpop.permute.xlu0 %1631  ;;  %v1281_v30 = vpop.permute.xlu1 %1280 }
 0x1b9   : > { %2841 = vmatpush2.xpose.msk.msra.mxu1 %vm603_vm1, %v3727_v29 }
 0x1ba   : > { %3015 = vmatprep.subr.mxu1 %v5384_v33 }
 0x1bc   : > { %v1285_v60 = vpop.permute.xlu0 %1284  ;;  %2842 = vmatmul.mubr.msk.f32.vlgmr.msra.gmra.mxu1 %vm603_vm1, %v3549_v61  ;;  %v1279_v29 = vpop.permute.xlu1 %1278 }
 0x1bd   : > { %1427 = vmatpush2.msra.mxu0 %v1285_v60  ;;  %762 = vmatprep.mubr.f32.mxu1 %v5384_v33 }
 0x1be   : > { %1428 = vmatprep.subr.mxu0 %v5384_v33 }
 0x1c0   : > { %v1283_v38 = vpop.permute.xlu0 %1282  ;;  %2843 = vmatmul.mubr.msk.f32.gmra.mxu1 %vm603_vm1, %v3559_v0 }
 0x1c1   : > { %1429 = vmatpush2.msra.mxu0 %v1283_v38  ;;  %768 = vmatprep.mubr.f32.mxu1 %v5384_v33 }
 0x1c2   : > { %1430 = vmatprep.subr.mxu0 %v5384_v33 }
 0x1c3   : > { %1431 = vmatpush2.msra.mxu0 %v1281_v30 }
 0x1c4   : > { %2844 = vmatmul.mubr.msk.f32.gmra.mxu1 %vm603_vm1, %v3541_v58  ;;  %1432 = vmatprep.subr.mxu0 %v5384_v33 }
 0x1c5   : > { %1433 = vmatpush2.msra.mxu0 %v1279_v29  ;;  %774 = vmatprep.mubr.f32.mxu1 %v5384_v33 }
 0x1c6   : > { %1434 = vmatprep.subr.mxu0 %v5384_v33 }
 0x1c7   : > { %1435 = vmatpush2.msra.mxu0 %v1277_v31 }
 0x1c8   : > { %2845 = vmatmul.mubr.msk.f32.gmra.mxu1 %vm603_vm1, %v3551_v62  ;;  %1436 = vmatprep.subr.mxu0 %v5384_v33 }
 0x1c9   : > { %1437 = vmatpush2.msra.mxu0 %v1275_v32  ;;  %780 = vmatprep.mubr.f32.mxu1 %v5384_v33 }
 0x1ca   : > { %1747 = vmatprep.subr.mxu0 %v5384_v33 }
 0x1cc   : > { %2846 = vmatmul.mubr.msk.f32.gmra.mxu1 %vm603_vm1, %v3533_v55 }
 0x1cd   : > { %786 = vmatprep.mubr.f32.mxu1 %v5384_v33 }
 0x1d0   : > { %2847 = vmatmul.mubr.msk.f32.gmra.mxu1 %vm603_vm1, %v3543_v59 }
 0x1d1   : > { %792 = vmatprep.mubr.f32.mxu1 %v5384_v33 }
 0x1d4   : > { %2848 = vmatmul.mubr.msk.f32.gmra.mxu1 %vm603_vm1, %v3525_v52 }
 0x1d5   : > { %798 = vmatprep.mubr.f32.mxu1 %v5384_v33 }
 0x1d8   : > { %2849 = vmatmul.mubr.msk.f32.gmra.mxu1 %vm603_vm1, %v3535_v56 }
 0x1d9   : > { %804 = vmatprep.mubr.f32.mxu1 %v5384_v33 }
 0x1dc   : > { %2850 = vmatmul.mubr.msk.f32.gmra.mxu1 %vm603_vm1, %v3517_v49 }
 0x1dd   : > { %810 = vmatprep.mubr.f32.mxu1 %v5384_v33 }
 0x1e0   : > { %2851 = vmatmul.mubr.msk.f32.gmra.mxu1 %vm603_vm1, %v3527_v53 }
 0x1e1   : > { %816 = vmatprep.mubr.f32.mxu1 %v5384_v33 }
 0x1e4   : > { %2852 = vmatmul.mubr.msk.f32.gmra.mxu1 %vm603_vm1, %v3509_v46 }
 0x1e5   : > { %822 = vmatprep.mubr.f32.mxu1 %v5384_v33 }
 0x1e8   : > { %2853 = vmatmul.mubr.msk.f32.gmra.mxu1 %vm603_vm1, %v3519_v50 }
 0x1e9   : > { %828 = vmatprep.mubr.f32.mxu1 %v5384_v33 }
 0x1ec   : > { %2854 = vmatmul.mubr.msk.f32.gmra.mxu1 %vm603_vm1, %v3501_v42  ;;  %v529_v42 = vld [vmem:[%s5360_s3 + $0x120] sm:$0xff] }
 0x1ed   : > { %834 = vmatprep.mubr.f32.mxu1 %v5384_v33 }
 0x1f0   : > { %2855 = vmatmul.mubr.msk.f32.gmra.mxu1 %vm603_vm1, %v3497_v39 }
 0x1f1   : > { %840 = vmatprep.mubr.f32.mxu1 %v5384_v33 }
 0x1f4   : > { %2856 = vmatmul.mubr.msk.f32.gmra.mxu1 %vm603_vm1, %v3511_v47 }
 0x1f5   : > { %846 = vmatprep.mubr.f32.mxu1 %v5384_v33 }
 0x1f8   : > { %2857 = vmatmul.mubr.msk.f32.gmra.mxu1 %vm603_vm1, %v3503_v43 }
 0x1f9   : > { %852 = vmatprep.mubr.f32.mxu1 %v5384_v33 }
 0x1fc   : > { %2858 = vmatmul.mubr.msk.f32.gmra.mxu1 %vm603_vm1, %v3569_v3 }
 0x1fd   : > { %858 = vmatprep.mubr.f32.mxu1 %v5384_v33 }
 0x200   : > { %2859 = vmatmul.mubr.msk.f32.gmra.mxu1 %vm603_vm1, %v3577_v5 }
 0x201   : > { %864 = vmatprep.mubr.f32.mxu1 %v5384_v33 }
 0x204   : > { %2860 = vmatmul.mubr.msk.f32.gmra.mxu1 %vm603_vm1, %v3561_v1 }
 0x205   : > { %870 = vmatprep.mubr.f32.mxu1 %v5384_v33 }
 0x208   : > { %2861 = vmatmul.mubr.msk.f32.gmra.mxu1 %vm603_vm1, %v3571_v4 }
 0x209   : > { %876 = vmatprep.mubr.f32.mxu1 %v5384_v33 }
 0x20c   : > { %2862 = vmatmul.mubr.msk.f32.gmra.mxu1 %vm603_vm1, %v3557_v63 }
 0x20d   : > { %882 = vmatprep.mubr.f32.mxu1 %v5384_v33 }
 0x210   : > { %2863 = vmatmul.mubr.msk.f32.gmra.mxu1 %vm603_vm1, %v3563_v2 }
 0x27c   : > { %v758_v40 = vpop.f32.mrf.mxu1 }
 0x27d   : > { %v3865_v51 = vadd.f32 %v758_v40, %v493_v45  ;;  %v498_v40 = vld [vmem:[%s5360_s3 + $0x28] sm:$0xff] }
 0x27e   : > { %v760_v44 = vpop.f32.mrf.mxu1 }
 0x27f   : > { %v3863_v31 = vadd.f32 %v760_v44, %v494_v41  ;;  %v497_v41 = vld [vmem:[%s5360_s3 + $0x20] sm:$0xff] }
 0x280   : > { %v764_v32 = vpop.f32.mrf.mxu1 }
 0x281   : > { %v890_v35 = vsel %vm889_vm2, %v3863_v31, -inf  ;;  %v3878_v38 = vadd.f32 %v764_v32, %v495_v57 }
 0x282   : > { %v766_v37 = vpop.f32.mrf.mxu1  ;;  %v891_v60 = vmax.f32 %v3865_v51, %v890_v35 }
 0x283   : > { %v3876_v30 = vadd.f32 %v766_v37, %v496_v34  ;;  %v500_v37 = vld [vmem:[%s5360_s3 + $0x38] sm:$0xff] }
 0x284   : > { %v770_v29 = vpop.f32.mrf.mxu1  ;;  %892 = vmax.xlane.f32.xlu0 %v891_v60  ;;  %v499_v60 = vld [vmem:[%s5360_s3 + $0x30] sm:$0xff] }
 0x285   : > { %v894_v45 = vsel %vm889_vm2, %v3876_v30, -inf  ;;  %v3891_v32 = vadd.f32 %v770_v29, %v497_v41 }
 0x286   : > { %v772_v44 = vpop.f32.mrf.mxu1  ;;  %v895_v35 = vmax.f32 %v3878_v38, %v894_v45 }
 0x287   : > { %v3889_v34 = vadd.f32 %v772_v44, %v498_v40  ;;  %v502_v44 = vld [vmem:[%s5360_s3 + $0x48] sm:$0xff] }
 0x288   : > { %v776_v57 = vpop.f32.mrf.mxu1  ;;  %896 = vmax.xlane.f32.xlu1 %v895_v35  ;;  %v501_v35 = vld [vmem:[%s5360_s3 + $0x40] sm:$0xff] }
 0x289   : > { %v898_v19 = vsel %vm889_vm2, %v3889_v34, -inf  ;;  %v3904_v29 = vadd.f32 %v776_v57, %v499_v60  ;;  %v504_v60 = vld [vmem:[%s5360_s3 + $0x58] sm:$0xff] }
 0x28a   : > { %v778_v17 = vpop.f32.mrf.mxu1  ;;  %v899_v45 = vmax.f32 %v3891_v32, %v898_v19 }
 0x28b   : > { %v3902_v40 = vadd.f32 %v778_v17, %v500_v37 }
 0x28c   : > { %v782_v41 = vpop.f32.mrf.mxu1  ;;  %900 = vmax.xlane.f32.xlu0 %v899_v45  ;;  %v503_v45 = vld [vmem:[%s5360_s3 + $0x50] sm:$0xff] }
 0x28d   : > { %v902_v26 = vsel %vm889_vm2, %v3902_v40, -inf  ;;  %v3917_v57 = vadd.f32 %v782_v41, %v501_v35  ;;  %v506_v35 = vld [vmem:[%s5360_s3 + $0x68] sm:$0xff] }
 0x28e   : > { %v784_v27 = vpop.f32.mrf.mxu1  ;;  %v903_v19 = vmax.f32 %v3904_v29, %v902_v26 }
 0x28f   : > { %v3915_v17 = vadd.f32 %v784_v27, %v502_v44 }
 0x290   : > { %v788_v37 = vpop.f32.mrf.mxu1  ;;  %904 = vmax.xlane.f32.xlu1 %v903_v19  ;;  %v505_v19 = vld [vmem:[%s5360_s3 + $0x60] sm:$0xff] }
 0x291   : > { %v906_v25 = vsel %vm889_vm2, %v3915_v17, -inf  ;;  %v3930_v41 = vadd.f32 %v788_v37, %v503_v45  ;;  %v508_v45 = vld [vmem:[%s5360_s3 + $0x78] sm:$0xff] }
 0x292   : > { %v790_v15 = vpop.f32.mrf.mxu1  ;;  %v907_v26 = vmax.f32 %v3917_v57, %v906_v25 }
 0x293   : > { %v3928_v27 = vadd.f32 %v790_v15, %v504_v60 }
 0x294   : > { %v794_v44 = vpop.f32.mrf.mxu1  ;;  %908 = vmax.xlane.f32.xlu0 %v907_v26  ;;  %v507_v26 = vld [vmem:[%s5360_s3 + $0x70] sm:$0xff] }
 0x295   : > { %v910_v13 = vsel %vm889_vm2, %v3928_v27, -inf  ;;  %v3943_v37 = vadd.f32 %v794_v44, %v505_v19  ;;  %v510_v19 = vld [vmem:[%s5360_s3 + $0x88] sm:$0xff] }
 0x296   : > { %v796_v11 = vpop.f32.mrf.mxu1  ;;  %v911_v25 = vmax.f32 %v3930_v41, %v910_v13 }
 0x297   : > { %v3941_v15 = vadd.f32 %v796_v11, %v506_v35 }
 0x298   : > { %v800_v60 = vpop.f32.mrf.mxu1  ;;  %912 = vmax.xlane.f32.xlu1 %v911_v25  ;;  %v509_v25 = vld [vmem:[%s5360_s3 + $0x80] sm:$0xff] }
 0x299   : > { %v914_v9 = vsel %vm889_vm2, %v3941_v15, -inf  ;;  %v3956_v44 = vadd.f32 %v800_v60, %v507_v26  ;;  %v512_v26 = vld [vmem:[%s5360_s3 + $0x98] sm:$0xff] }
 0x29a   : > { %v802_v7 = vpop.f32.mrf.mxu1  ;;  %v915_v13 = vmax.f32 %v3943_v37, %v914_v9 }
 0x29b   : > { %v3954_v11 = vadd.f32 %v802_v7, %v508_v45 }
 0x29c   : > { %v806_v35 = vpop.f32.mrf.mxu1  ;;  %916 = vmax.xlane.f32.xlu0 %v915_v13  ;;  %v511_v13 = vld [vmem:[%s5360_s3 + $0x90] sm:$0xff] }
 0x29d   : > { %v918_v24 = vsel %vm889_vm2, %v3954_v11, -inf  ;;  %v3969_v60 = vadd.f32 %v806_v35, %v509_v25  ;;  %v514_v25 = vld [vmem:[%s5360_s3 + $0xa8] sm:$0xff] }
 0x29e   : > { %v808_v23 = vpop.f32.mrf.mxu1  ;;  %v919_v9 = vmax.f32 %v3956_v44, %v918_v24 }
 0x29f   : > { %v3967_v7 = vadd.f32 %v808_v23, %v510_v19 }
 0x2a0   : > { %v812_v45 = vpop.f32.mrf.mxu1  ;;  %920 = vmax.xlane.f32.xlu1 %v919_v9  ;;  %v513_v9 = vld [vmem:[%s5360_s3 + $0xa0] sm:$0xff] }
 0x2a1   : > { %v922_v22 = vsel %vm889_vm2, %v3967_v7, -inf  ;;  %v3982_v35 = vadd.f32 %v812_v45, %v511_v13  ;;  %v516_v13 = vld [vmem:[%s5360_s3 + $0xb8] sm:$0xff] }
 0x2a2   : > { %v814_v21 = vpop.f32.mrf.mxu1  ;;  %v923_v24 = vmax.f32 %v3969_v60, %v922_v22 }
 0x2a3   : > { %v3980_v23 = vadd.f32 %v814_v21, %v512_v26 }
 0x2a4   : > { %v818_v19 = vpop.f32.mrf.mxu1  ;;  %924 = vmax.xlane.f32.xlu0 %v923_v24  ;;  %v515_v24 = vld [vmem:[%s5360_s3 + $0xb0] sm:$0xff] }
 0x2a5   : > { %v926_v20 = vsel %vm889_vm2, %v3980_v23, -inf  ;;  %v3995_v45 = vadd.f32 %v818_v19, %v513_v9  ;;  %v518_v9 = vld [vmem:[%s5360_s3 + $0xc8] sm:$0xff] }
 0x2a6   : > { %v820_v18 = vpop.f32.mrf.mxu1  ;;  %v927_v22 = vmax.f32 %v3982_v35, %v926_v20 }
 0x2a7   : > { %v3993_v21 = vadd.f32 %v820_v18, %v514_v25 }
 0x2a8   : > { %v824_v26 = vpop.f32.mrf.mxu1  ;;  %928 = vmax.xlane.f32.xlu1 %v927_v22  ;;  %v517_v22 = vld [vmem:[%s5360_s3 + $0xc0] sm:$0xff] }
 0x2a9   : > { %v930_v16 = vsel %vm889_vm2, %v3993_v21, -inf  ;;  %v4008_v19 = vadd.f32 %v824_v26, %v515_v24  ;;  %v520_v24 = vld [vmem:[%s5360_s3 + $0xd8] sm:$0xff] }
 0x2aa   : > { %v826_v14 = vpop.f32.mrf.mxu1  ;;  %v931_v20 = vmax.f32 %v3995_v45, %v930_v16 }
 0x2ab   : > { %v4006_v18 = vadd.f32 %v826_v14, %v516_v13 }
 0x2ac   : > { %v830_v25 = vpop.f32.mrf.mxu1  ;;  %932 = vmax.xlane.f32.xlu0 %v931_v20  ;;  %v519_v20 = vld [vmem:[%s5360_s3 + $0xd0] sm:$0xff] }
 0x2ad   : > { %v934_v12 = vsel %vm889_vm2, %v4006_v18, -inf  ;;  %v4021_v26 = vadd.f32 %v830_v25, %v517_v22  ;;  %v522_v22 = vld [vmem:[%s5360_s3 + $0xe8] sm:$0xff] }
 0x2ae   : > { %v832_v10 = vpop.f32.mrf.mxu1  ;;  %v935_v16 = vmax.f32 %v4008_v19, %v934_v12 }
 0x2af   : > { %v4019_v14 = vadd.f32 %v832_v10, %v518_v9 }
 0x2b0   : > { %v836_v13 = vpop.f32.mrf.mxu1  ;;  %936 = vmax.xlane.f32.xlu1 %v935_v16  ;;  %v521_v16 = vld [vmem:[%s5360_s3 + $0xe0] sm:$0xff] }
 0x2b1   : > { %v938_v8 = vsel %vm889_vm2, %v4019_v14, -inf  ;;  %v4034_v25 = vadd.f32 %v836_v13, %v519_v20  ;;  %v524_v20 = vld [vmem:[%s5360_s3 + $0xf8] sm:$0xff] }
 0x2b2   : > { %v838_v6 = vpop.f32.mrf.mxu1  ;;  %v939_v12 = vmax.f32 %v4021_v26, %v938_v8 }
 0x2b3   : > { %v4032_v10 = vadd.f32 %v838_v6, %v520_v24  ;;  %5436 = vst [vmem:[#allocation13_spill] sm:$0xff] %v4034_v25 }
 0x2b4   : > { %v842_v9 = vpop.f32.mrf.mxu1  ;;  %940 = vmax.xlane.f32.xlu0 %v939_v12  ;;  %v523_v12 = vld [vmem:[%s5360_s3 + $0xf0] sm:$0xff] }
 0x2b5   : > { %5435 = vst [vmem:[#allocation12_spill] sm:$0xff] %v4032_v10  ;;  %v942_v33 = vsel %vm889_vm2, %v4032_v10, -inf  ;;  %v4047_v13 = vadd.f32 %v842_v9, %v521_v16  ;;  %v526_v16 = vld [vmem:[%s5360_s3 + $0x108] sm:$0xff]  ;;  %v535_v10 = vld [vmem:[%s5360_s3 + $0x150] sm:$0xff] }
 0x2b6   : > { %v844_v55 = vpop.f32.mrf.mxu1  ;;  %v943_v8 = vmax.f32 %v4034_v25, %v942_v33 }
 0x2b7   : > { %v4045_v6 = vadd.f32 %v844_v55, %v522_v22  ;;  %5438 = vst [vmem:[#allocation15_spill] sm:$0xff] %v4047_v13 }
 0x2b8   : > { %v848_v24 = vpop.f32.mrf.mxu1  ;;  %944 = vmax.xlane.f32.xlu1 %v943_v8  ;;  %v525_v8 = vld [vmem:[%s5360_s3 + $0x100] sm:$0xff] }
 0x2b9   : > { %5437 = vst [vmem:[#allocation14_spill] sm:$0xff] %v4045_v6  ;;  %v946_v52 = vsel %vm889_vm2, %v4045_v6, -inf  ;;  %v4060_v9 = vadd.f32 %v848_v24, %v523_v12  ;;  %v528_v12 = vld [vmem:[%s5360_s3 + $0x118] sm:$0xff]  ;;  %v531_v6 = vld [vmem:[%s5360_s3 + $0x130] sm:$0xff] }
 0x2ba   : > { %v850_v58 = vpop.f32.mrf.mxu1  ;;  %v947_v33 = vmax.f32 %v4047_v13, %v946_v52  ;;  %v4126_v13 = vpop.permute.xlu0 %1627 }
 0x2bb   : > { %v4058_v55 = vadd.f32 %v850_v58, %v524_v20  ;;  %5440 = vst [vmem:[#allocation17_spill] sm:$0xff] %v4060_v9  ;;  %5447 = vst [vmem:[#allocation24_spill] sm:$0xff] %v4126_v13 }
 0x2bc   : > { %v854_v22 = vpop.f32.mrf.mxu1  ;;  %948 = vmax.xlane.f32.xlu0 %v947_v33  ;;  %v527_v33 = vld [vmem:[%s5360_s3 + $0x110] sm:$0xff] }
 0x2bd   : > { %5439 = vst [vmem:[#allocation16_spill] sm:$0xff] %v4058_v55  ;;  %v950_v49 = vsel %vm889_vm2, %v4058_v55, -inf  ;;  %v4073_v24 = vadd.f32 %v854_v22, %v525_v8 }
 0x2be   : > { %v856_v46 = vpop.f32.mrf.mxu1  ;;  %v951_v52 = vmax.f32 %v4060_v9, %v950_v49 }
 0x2bf   : > { %v4071_v58 = vadd.f32 %v856_v46, %v526_v16  ;;  %5442 = vst [vmem:[#allocation19_spill] sm:$0xff] %v4073_v24 }
 0x2c0   : > { %v860_v20 = vpop.f32.mrf.mxu1  ;;  %952 = vmax.xlane.f32.xlu1 %v951_v52 }
 0x2c1   : > { %5441 = vst [vmem:[#allocation18_spill] sm:$0xff] %v4071_v58  ;;  %v954_v55 = vsel %vm889_vm2, %v4071_v58, -inf  ;;  %v4086_v22 = vadd.f32 %v860_v20, %v527_v33  ;;  %v4097_v20 = vpop.permute.xlu1 %1645 }
 0x2c2   : > { %v862_v1 = vpop.f32.mrf.mxu1  ;;  %v955_v49 = vmax.f32 %v4073_v24, %v954_v55  ;;  %v536_v24 = vld [vmem:[%s5360_s3 + $0x158] sm:$0xff] }
 0x2c3   : > { %v4084_v46 = vadd.f32 %v862_v1, %v528_v12  ;;  %5444 = vst [vmem:[#allocation21_spill] sm:$0xff] %v4086_v22 }
 0x2c4   : > { %956 = vmax.xlane.f32.xlu0 %v955_v49  ;;  %v866_v52 = vpop.f32.mrf.mxu1 }
 0x2c5   : > { %5443 = vst [vmem:[#allocation20_spill] sm:$0xff] %v4084_v46  ;;  %v958_v16 = vsel %vm889_vm2, %v4084_v46, -inf  ;;  %v4103_v49 = vpop.permute.xlu1 %1641 }
 0x2c6   : > { %v959_v8 = vmax.f32 %v4086_v22, %v958_v16  ;;  %v868_v58 = vpop.f32.mrf.mxu1  ;;  %v530_v16 = vld [vmem:[%s5360_s3 + $0x128] sm:$0xff] }
 0x2c8   : > { %960 = vmax.xlane.f32.xlu1 %v959_v8  ;;  %v872_v1 = vpop.f32.mrf.mxu1  ;;  %v532_v8 = vld [vmem:[%s5360_s3 + $0x138] sm:$0xff] }
 0x2c9   : > { %v4136_v47 = vadd.f32 %v872_v1, %v531_v6 }
 0x2ca   : > { %v874_v55 = vpop.f32.mrf.mxu1 }
 0x2cb   : > { %v4113_v22 = vadd.f32 %v874_v55, %v532_v8  ;;  %v4134_v8 = vadd.f32 %v866_v52, %v529_v42  ;;  %5450 = vst [vmem:[#allocation27_spill] sm:$0xff] %v4136_v47 }
 0x2cc   : > { %v4099_v12 = vpop.f32.mrf.mxu1 }
 0x2cd   : > { %5446 = vst [vmem:[#allocation23_spill] sm:$0xff] %v4113_v22  ;;  %5449 = vst [vmem:[#allocation26_spill] sm:$0xff] %v4134_v8 }
 0x2ce   : > { %v4101_v33 = vpop.f32.mrf.mxu1 }
 0x2d0   : > { %v884_v46 = vpop.f32.mrf.mxu1 }
 0x2d2   : > { %v886_v9 = vpop.f32.mrf.mxu1 }
 0x2d9   : > { %1615 = vrot.lane.b32.xlu1 %v3549_v61, %s3394_s29  ;;  %v4115_v61 = vpop.permute.xlu1 %1637 }
 0x2da   : > { %1657 = vrot.lane.b32.xlu0 %v3563_v2, %s3394_s29 }
 0x2dd   : > { %v4141_v25 = vpop.permute.xlu1 %1633 }
 0x2de   : > { %1655 = vrot.lane.b32.xlu0 %v3557_v63, %s3394_s29  ;;  %v4111_v63 = vadd.f32 %v868_v58, %v530_v16  ;;  %v4128_v58 = vadd.f32 %v886_v9, %v536_v24  ;;  %v966_v16 = vsel %vm889_vm2, %v4113_v22, -inf  ;;  %v4149_v22 = vadd.f32 %v884_v46, %v535_v10 }
 0x2df   : > { %v967_v9 = vmax.f32 %v4136_v47, %v966_v16 }
 0x2e0   : > { %5445 = vst [vmem:[#allocation22_spill] sm:$0xff] %v4111_v63  ;;  %5448 = vst [vmem:[#allocation25_spill] sm:$0xff] %v4128_v58  ;;  %v962_v55 = vsel %vm889_vm2, %v4111_v63, -inf  ;;  %v974_v24 = vsel %vm889_vm2, %v4128_v58, -inf  ;;  %v4147_v63 = vpop.permute.xlu0 %1623 }
 0x2e1   : > { %v963_v13 = vmax.f32 %v4134_v8, %v962_v55  ;;  %5451 = vst [vmem:[#allocation28_spill] sm:$0xff] %v4149_v22  ;;  %v975_v42 = vmax.f32 %v4149_v22, %v974_v24  ;;  %v4152_v6 = vpop.permute.xlu1 %1629 }
 0x2e4   : > { %v4154_v52 = vpop.permute.xlu0 %1619 }
 0x2e5   : > { %v4156_v1 = vpop.permute.xlu1 %1625 }
 0x2e8   : > { %v4158_v55 = vpop.permute.xlu0 %1617 }
 0x2e9   : > { %v4160_v16 = vpop.permute.xlu1 %1621 }
 0x2fd   : > { %964 = vmax.xlane.f32.xlu0 %v963_v13  ;;  %968 = vmax.xlane.f32.xlu1 %v967_v9 }
 0x301   : > { %976 = vmax.xlane.f32.xlu1 %v975_v42 }
 0x30d   : > { %v893_v58 = vpop.xlane.xlu0 %892 }
 0x30e   : > { %v978_v47 = vsub.f32 %v3865_v51, %v893_v58  ;;  %v979_v10 = vsub.f32 %v3863_v31, %v893_v58 }
 0x310   : > { %v1022_v13 = vmul.f32 1.442695, %v978_v47  ;;  %v1024_v46 = vmul.f32 1.442695, %v979_v10 }
 0x311   : > { %v897_v9 = vpop.xlane.xlu1 %896 }
 0x312   : > { %3075 = vpow2.f32 %v1022_v13  ;;  %v980_v24 = vsub.f32 %v3878_v38, %v897_v9  ;;  %v981_v42 = vsub.f32 %v3876_v30, %v897_v9  ;;  %1647 = vrot.lane.b32.xlu1 %v3569_v3, %s3394_s29 }
 0x313   : > { %3077 = vpow2.f32 %v1024_v46  ;;  %1653 = vrot.lane.b32.xlu0 %v3571_v4, %s3394_s29 }
 0x314   : > { %v1026_v22 = vmul.f32 1.442695, %v980_v24  ;;  %v1028_v8 = vmul.f32 1.442695, %v981_v42 }
 0x315   : > { %v901_v51 = vpop.xlane.xlu0 %900 }
 0x316   : > { %3079 = vpow2.f32 %v1026_v22  ;;  %v982_v47 = vsub.f32 %v3891_v32, %v901_v51  ;;  %v983_v31 = vsub.f32 %v3889_v34, %v901_v51  ;;  %1573 = vrot.lane.b32.xlu1 %v3559_v0, %s3395_s25 }
 0x317   : > { %3081 = vpow2.f32 %v1028_v8 }
 0x318   : > { %v1030_v30 = vmul.f32 1.442695, %v982_v47  ;;  %v1032_v38 = vmul.f32 1.442695, %v983_v31 }
 0x319   : > { %v905_v58 = vpop.xlane.xlu1 %904 }
 0x31a   : > { %3083 = vpow2.f32 %v1030_v30  ;;  %v984_v10 = vsub.f32 %v3904_v29, %v905_v58  ;;  %v985_v13 = vsub.f32 %v3902_v40, %v905_v58  ;;  %1577 = vrot.lane.b32.xlu1 %v3551_v62, %s3395_s25 }
 0x31b   : > { %3085 = vpow2.f32 %v1032_v38 }
 0x31c   : > { %v1034_v32 = vmul.f32 1.442695, %v984_v10  ;;  %v1036_v22 = vmul.f32 1.442695, %v985_v13  ;;  %v5452_v10 = vmov 0.0   ;;  %v534_v13 = vld [vmem:[%s5360_s3 + $0x148] sm:$0xff] }
 0x31d   : > { %v909_v34 = vpop.xlane.xlu0 %908 }
 0x31e   : > { %3087 = vpow2.f32 %v1034_v32  ;;  %v986_v46 = vsub.f32 %v3917_v57, %v909_v34  ;;  %v987_v8 = vsub.f32 %v3915_v17, %v909_v34  ;;  %1581 = vrot.lane.b32.xlu1 %v3543_v59, %s3395_s25 }
 0x31f   : > { %v3076_v9 = vpop.eup %3075  ;;  %3089 = vpow2.f32 %v1036_v22 }
 0x320   : > { %v3078_v29 = vpop.eup %3077  ;;  %v1038_v24 = vmul.f32 1.442695, %v986_v46  ;;  %v1040_v40 = vmul.f32 1.442695, %v987_v8 }
 0x321   : > { %2864 = vmatprep.mubr.msk.f32.mxu0 %vm889_vm2, %v3078_v29  ;;  %v913_v42 = vpop.xlane.xlu1 %912  ;;  %v1110_v51 = vsel %vm889_vm2, %v3078_v29, 0.0 }
 0x322   : > { %3091 = vpow2.f32 %v1038_v24  ;;  %1439 = vmatmul.mubr.f32.vlgmr.msra.gmra.mxu0 %v3076_v9  ;;  %v988_v47 = vsub.f32 %v3930_v41, %v913_v42  ;;  %v989_v57 = vsub.f32 %v3928_v27, %v913_v42  ;;  %1585 = vrot.lane.b32.xlu1 %v3535_v56, %s3395_s25  ;;  %v4188_v17 = vadd.f32 %v3076_v9, %v1110_v51  ;;  %v533_v24 = vld [vmem:[%s5360_s3 + $0x140] sm:$0xff] }
 0x323   : > { %v3080_v31 = vpop.eup %3079  ;;  %3093 = vpow2.f32 %v1040_v40  ;;  %2886 = vmatpush1.xpose.msk.msra.mxu0 %vm603_vm1, %v4097_v20 }
 0x324   : > { %v3082_v30 = vpop.eup %3081  ;;  %v1042_v38 = vmul.f32 1.442695, %v988_v47  ;;  %v1044_v58 = vmul.f32 1.442695, %v989_v57  ;;  %1749 = vmatprep.subr.mxu0 %v5452_v10 }
 0x325   : > { %2865 = vmatprep.mubr.msk.f32.mxu0 %vm889_vm2, %v3082_v30  ;;  %v917_v41 = vpop.xlane.xlu0 %916  ;;  %v1114_v27 = vsel %vm889_vm2, %v3082_v30, 0.0 }
 0x326   : > { %3095 = vpow2.f32 %v1042_v38  ;;  %v990_v32 = vsub.f32 %v3943_v37, %v917_v41  ;;  %v991_v22 = vsub.f32 %v3941_v15, %v917_v41  ;;  %1444 = vmatmul.mubr.f32.gmra.mxu0 %v3080_v31  ;;  %1589 = vrot.lane.b32.xlu1 %v3527_v53, %s3395_s25  ;;  %v4202_v20 = vadd.f32 %v3080_v31, %v1114_v27 }
 0x327   : > { %v3084_v34 = vpop.eup %3083  ;;  %3097 = vpow2.f32 %v1044_v58  ;;  %2887 = vmatpush1.xpose.msk.msra.mxu0 %vm603_vm1, %v3762_v48  ;;  %v4208_v37 = vadd.f32 %v4101_v33, %v534_v13  ;;  %v4225_v31 = vadd.f32 %v4099_v12, %v533_v24 }
 0x328   : > { %v3086_v46 = vpop.eup %3085  ;;  %v1046_v8 = vmul.f32 1.442695, %v990_v32  ;;  %v1048_v9 = vmul.f32 1.442695, %v991_v22  ;;  %1751 = vmatprep.subr.mxu0 %v5452_v10 }
 0x329   : > { %2866 = vmatprep.mubr.msk.f32.mxu0 %vm889_vm2, %v3086_v46  ;;  %v921_v15 = vpop.xlane.xlu1 %920  ;;  %v1118_v29 = vsel %vm889_vm2, %v3086_v46, 0.0 }
 0x32a   : > { %3099 = vpow2.f32 %v1046_v8  ;;  %1449 = vmatmul.mubr.f32.gmra.mxu0 %v3084_v34  ;;  %v992_v48 = vsub.f32 %v3956_v44, %v921_v15  ;;  %v993_v40 = vsub.f32 %v3954_v11, %v921_v15  ;;  %1593 = vrot.lane.b32.xlu1 %v3519_v50, %s3395_s25  ;;  %v4219_v33 = vadd.f32 %v3084_v34, %v1118_v29 }
 0x32b   : > { %v3088_v42 = vpop.eup %3087  ;;  %3101 = vpow2.f32 %v1048_v9  ;;  %2888 = vmatpush1.xpose.msk.msra.mxu0 %vm603_vm1, %v4103_v49  ;;  %v970_v44 = vsel %vm889_vm2, %v4208_v37, -inf }
 0x32c   : > { %v3090_v51 = vpop.eup %3089  ;;  %v1050_v47 = vmul.f32 1.442695, %v992_v48  ;;  %v1052_v57 = vmul.f32 1.442695, %v993_v40  ;;  %1753 = vmatprep.subr.mxu0 %v5452_v10 }
 0x32d   : > { %2867 = vmatprep.mubr.msk.f32.mxu0 %vm889_vm2, %v3090_v51  ;;  %v925_v11 = vpop.xlane.xlu0 %924  ;;  %v1122_v30 = vsel %vm889_vm2, %v3090_v51, 0.0 }
 0x32e   : > { %3103 = vpow2.f32 %v1050_v47  ;;  %v994_v38 = vsub.f32 %v3969_v60, %v925_v11  ;;  %v995_v49 = vsub.f32 %v3967_v7, %v925_v11  ;;  %1454 = vmatmul.mubr.f32.gmra.mxu0 %v3088_v42  ;;  %1597 = vrot.lane.b32.xlu1 %v3497_v39, %s3395_s25  ;;  %v4235_v58 = vadd.f32 %v3088_v42, %v1122_v30 }
 0x32f   : > { %v3092_v12 = vpop.eup %3091  ;;  %3105 = vpow2.f32 %v1052_v57  ;;  %2889 = vmatpush1.xpose.msk.msra.mxu0 %vm603_vm1, %v3769_v54  ;;  %v971_v60 = vmax.f32 %v4225_v31, %v970_v44 }
 0x330   : > { %v3094_v41 = vpop.eup %3093  ;;  %v1054_v27 = vmul.f32 1.442695, %v994_v38  ;;  %v1056_v13 = vmul.f32 1.442695, %v995_v49  ;;  %1755 = vmatprep.subr.mxu0 %v5452_v10 }
 0x331   : > { %2868 = vmatprep.mubr.msk.f32.mxu0 %vm889_vm2, %v3094_v41  ;;  %v929_v7 = vpop.xlane.xlu1 %928  ;;  %v1126_v32 = vsel %vm889_vm2, %v3094_v41, 0.0 }
 0x332   : > { %3107 = vpow2.f32 %v1054_v27  ;;  %1459 = vmatmul.mubr.f32.gmra.mxu0 %v3092_v12  ;;  %v996_v22 = vsub.f32 %v3982_v35, %v929_v7  ;;  %v997_v34 = vsub.f32 %v3980_v23, %v929_v7  ;;  %972 = vmax.xlane.f32.xlu0 %v971_v60  ;;  %v4245_v54 = vadd.f32 %v3092_v12, %v1126_v32  ;;  %v5453_v7 = vld [vmem:[#allocation13_spill] sm:$0xff] }
 0x333   : > { %v3096_v46 = vpop.eup %3095  ;;  %3109 = vpow2.f32 %v1056_v13  ;;  %2890 = vmatpush1.xpose.msk.msra.mxu0 %vm603_vm1, %v4115_v61  ;;  %1601 = vrot.lane.b32.xlu1 %v3503_v43, %s3395_s25 }
 0x334   : > { %v3098_v8 = vpop.eup %3097  ;;  %v1058_v9 = vmul.f32 1.442695, %v996_v22  ;;  %v1060_v15 = vmul.f32 1.442695, %v997_v34  ;;  %1757 = vmatprep.subr.mxu0 %v5452_v10  ;;  %v5454_v22 = vld [vmem:[#allocation12_spill] sm:$0xff] }
 0x335   : > { %2869 = vmatprep.mubr.msk.f32.mxu0 %vm889_vm2, %v3098_v8  ;;  %v933_v35 = vpop.xlane.xlu0 %932  ;;  %v1130_v23 = vsel %vm889_vm2, %v3098_v8, 0.0  ;;  %v5455_v8 = vld [vmem:[#allocation4_spill] sm:$0xff] }
 0x336   : > { %3111 = vpow2.f32 %v1058_v9  ;;  %v998_v29 = vsub.f32 %v3995_v45, %v933_v35  ;;  %v999_v24 = vsub.f32 %v3993_v21, %v933_v35  ;;  %1464 = vmatmul.mubr.f32.gmra.mxu0 %v3096_v46  ;;  %v4256_v61 = vadd.f32 %v3096_v46, %v1130_v23 }
 0x337   : > { %v3100_v48 = vpop.eup %3099  ;;  %3113 = vpow2.f32 %v1060_v15  ;;  %2891 = vmatpush1.xpose.msk.msra.mxu0 %vm603_vm1, %v3775_v36  ;;  %1605 = vrot.lane.b32.xlu1 %v3577_v5, %s3395_s25  ;;  %v5456_v9 = vmax.f32 %v5455_v8, 0.0 }
 0x338   : > { %v3102_v40 = vpop.eup %3101  ;;  %v1062_v42 = vmul.f32 1.442695, %v998_v29  ;;  %v1064_v51 = vmul.f32 1.442695, %v999_v24  ;;  %1759 = vmatprep.subr.mxu0 %v5452_v10 }
 0x339   : > { %2870 = vmatprep.mubr.msk.f32.mxu0 %vm889_vm2, %v3102_v40  ;;  %v937_v45 = vpop.xlane.xlu1 %936  ;;  %v1134_v21 = vsel %vm889_vm2, %v3102_v40, 0.0 }
 0x33a   : > { %3115 = vpow2.f32 %v1062_v42  ;;  %1469 = vmatmul.mubr.f32.gmra.mxu0 %v3100_v48  ;;  %v1000_v47 = vsub.f32 %v4008_v19, %v937_v45  ;;  %v1001_v57 = vsub.f32 %v4006_v18, %v937_v45  ;;  %v4267_v36 = vadd.f32 %v3100_v48, %v1134_v21  ;;  %v5457_v48 = vld [vmem:[#allocation15_spill] sm:$0xff]  ;;  %v5458_v42 = vld [vmem:[#allocation14_spill] sm:$0xff]  ;;  %v5459_v21 = vld [vmem:[#allocation24_spill] sm:$0xff] }
 0x33b   : > { %v3104_v11 = vpop.eup %3103  ;;  %3117 = vpow2.f32 %v1064_v51  ;;  %2892 = vmatpush1.xpose.msk.msra.mxu0 %vm603_vm1, %v4141_v25  ;;  %1609 = vrot.lane.b32.xlu1 %v3571_v4, %s3395_s25 }
 0x33c   : > { %v3106_v44 = vpop.eup %3105  ;;  %v1066_v30 = vmul.f32 1.442695, %v1000_v47  ;;  %v1068_v38 = vmul.f32 1.442695, %v1001_v57  ;;  %1761 = vmatprep.subr.mxu0 %v5452_v10  ;;  %v5460_v47 = vld [vmem:[#allocation2_spill] sm:$0xff] }
 0x33d   : > { %2871 = vmatprep.mubr.msk.f32.mxu0 %vm889_vm2, %v3106_v44  ;;  %v941_v19 = vpop.xlane.xlu0 %940  ;;  %v1138_v18 = vsel %vm889_vm2, %v3106_v44, 0.0  ;;  %v5461_v57 = vmax.f32 %v5460_v47, 0.0 }
 0x33e   : > { %3119 = vpow2.f32 %v1066_v30  ;;  %v1002_v49 = vsub.f32 %v4021_v26, %v941_v19  ;;  %v1003_v12 = vsub.f32 %v4019_v14, %v941_v19  ;;  %1474 = vmatmul.mubr.f32.gmra.mxu0 %v3104_v11  ;;  %v4278_v25 = vadd.f32 %v3104_v11, %v1138_v18 }
 0x33f   : > { %v3108_v41 = vpop.eup %3107  ;;  %3121 = vpow2.f32 %v1068_v38  ;;  %2893 = vmatpush1.xpose.msk.msra.mxu0 %vm603_vm1, %v3781_v28  ;;  %1613 = vrot.lane.b32.xlu1 %v3563_v2, %s3395_s25  ;;  %v5462_v38 = vld [vmem:[#allocation11_spill] sm:$0xff] }
 0x340   : > { %v3110_v27 = vpop.eup %3109  ;;  %v1070_v13 = vmul.f32 1.442695, %v1002_v49  ;;  %v1072_v60 = vmul.f32 1.442695, %v1003_v12  ;;  %1763 = vmatprep.subr.mxu0 %v5452_v10  ;;  %v5463_v49 = vld [vmem:[#allocation17_spill] sm:$0xff] }
 0x341   : > { %2872 = vmatprep.mubr.msk.f32.mxu0 %vm889_vm2, %v3110_v27  ;;  %v945_v26 = vpop.xlane.xlu1 %944  ;;  %v1142_v14 = vsel %vm889_vm2, %v3110_v27, 0.0 }
 0x342   : > { %3123 = vpow2.f32 %v1070_v13  ;;  %1479 = vmatmul.mubr.f32.gmra.mxu0 %v3108_v41  ;;  %v1004_v32 = vsub.f32 %v5453_v7, %v945_v26  ;;  %v1005_v34 = vsub.f32 %v5454_v22, %v945_v26  ;;  %v4289_v28 = vadd.f32 %v3108_v41, %v1142_v14  ;;  %v5464_v41 = vld [vmem:[#allocation16_spill] sm:$0xff]  ;;  %v5465_v26 = vld [vmem:[#allocation3_spill] sm:$0xff] }
 0x343   : > { %v3112_v46 = vpop.eup %3111  ;;  %3125 = vpow2.f32 %v1072_v60  ;;  %2894 = vmatpush1.xpose.msk.msra.mxu0 %vm603_vm1, %v4152_v6  ;;  %2302 = vrot.lane.b32.xlu1 %v5456_v9, %s3396_s5  ;;  %v5466_v14 = vmax.f32 %v5465_v26, 0.0  ;;  %v5467_v9 = vld [vmem:[#allocation19_spill] sm:$0xff] }
 0x344   : > { %v3114_v15 = vpop.eup %3113  ;;  %v1074_v35 = vmul.f32 1.442695, %v1004_v32  ;;  %v1076_v23 = vmul.f32 1.442695, %v1005_v34  ;;  %1765 = vmatprep.subr.mxu0 %v5452_v10 }
 0x345   : > { %2873 = vmatprep.mubr.msk.f32.mxu0 %vm889_vm2, %v3114_v15  ;;  %v949_v29 = vpop.xlane.xlu0 %948  ;;  %v1146_v24 = vsel %vm889_vm2, %v3114_v15, 0.0  ;;  %v5468_v15 = vld [vmem:[#allocation18_spill] sm:$0xff] }
 0x346   : > { %3127 = vpow2.f32 %v1074_v35  ;;  %v1006_v40 = vsub.f32 %v5457_v48, %v949_v29  ;;  %v1007_v6 = vsub.f32 %v5458_v42, %v949_v29  ;;  %1484 = vmatmul.mubr.f32.gmra.mxu0 %v3112_v46  ;;  %v4301_v51 = vadd.f32 %v3112_v46, %v1146_v24 }
 0x347   : > { %v3116_v45 = vpop.eup %3115  ;;  %3129 = vpow2.f32 %v1076_v23  ;;  %2895 = vmatpush1.xpose.msk.msra.mxu0 %vm603_vm1, %v5459_v21  ;;  %2298 = vrot.lane.b32.xlu1 %v5461_v57, %s3396_s5  ;;  %v5469_v24 = vmax.f32 %v3527_v53, 0.0 }
 0x348   : > { %v3118_v11 = vpop.eup %3117  ;;  %v1078_v44 = vmul.f32 1.442695, %v1006_v40  ;;  %v1080_v30 = vmul.f32 1.442695, %v1007_v6  ;;  %1651 = vrot.lane.b32.xlu0 %v5462_v38, %s3394_s29  ;;  %1767 = vmatprep.subr.mxu0 %v5452_v10  ;;  %v5470_v6 = vld [vmem:[#allocation9_spill] sm:$0xff] }
 0x349   : > { %2874 = vmatprep.mubr.msk.f32.mxu0 %vm889_vm2, %v3118_v11  ;;  %v953_v19 = vpop.xlane.xlu1 %952  ;;  %v1150_v18 = vsel %vm889_vm2, %v3118_v11, 0.0  ;;  %v5472_v11 = vld [vmem:[#allocation20_spill] sm:$0xff] }
 0x34a   : > { %3131 = vpow2.f32 %v1078_v44  ;;  %1489 = vmatmul.mubr.f32.gmra.mxu0 %v3116_v45  ;;  %v1008_v12 = vsub.f32 %v5463_v49, %v953_v19  ;;  %v1009_v27 = vsub.f32 %v5464_v41, %v953_v19  ;;  %v4315_v13 = vadd.f32 %v3116_v45, %v1150_v18  ;;  %v5474_v19 = vld [vmem:[#allocation5_spill] sm:$0xff] }
 0x34b   : > { %v3120_v60 = vpop.eup %3119  ;;  %3133 = vpow2.f32 %v1080_v30  ;;  %2896 = vmatpush1.xpose.msk.msra.mxu0 %vm603_vm1, %v4156_v1  ;;  %2294 = vrot.lane.b32.xlu1 %v5466_v14, %s3396_s5  ;;  %v5475_v18 = vmax.f32 %v5474_v19, 0.0 }
 0x34c   : > { %v3122_v7 = vpop.eup %3121  ;;  %v1082_v32 = vmul.f32 1.442695, %v1008_v12  ;;  %v1084_v22 = vmul.f32 1.442695, %v1009_v27  ;;  %1649 = vrot.lane.b32.xlu0 %v3577_v5, %s3394_s29  ;;  %1769 = vmatprep.subr.mxu0 %v5452_v10  ;;  %v5476_v27 = vld [vmem:[#allocation8_spill] sm:$0xff] }
 0x34d   : > { %2875 = vmatprep.mubr.msk.f32.mxu0 %vm889_vm2, %v3122_v7  ;;  %v957_v34 = vpop.xlane.xlu0 %956  ;;  %v1154_v46 = vsel %vm889_vm2, %v3122_v7, 0.0  ;;  %v5478_v7 = vld [vmem:[#allocation6_spill] sm:$0xff] }
 0x34e   : > { %3135 = vpow2.f32 %v1082_v32  ;;  %v1010_v1 = vsub.f32 %v5467_v9, %v957_v34  ;;  %v1011_v35 = vsub.f32 %v5468_v15, %v957_v34  ;;  %1494 = vmatmul.mubr.f32.gmra.mxu0 %v3120_v60  ;;  %v4329_v23 = vadd.f32 %v3120_v60, %v1154_v46  ;;  %v5480_v34 = vld [vmem:[#allocation7_spill] sm:$0xff] }
 0x34f   : > { %v3124_v29 = vpop.eup %3123  ;;  %3137 = vpow2.f32 %v1084_v22  ;;  %2897 = vmatpush1.xpose.msk.msra.mxu0 %vm603_vm1, %v4147_v63  ;;  %2292 = vrot.lane.b32.xlu1 %v5469_v24, %s3396_s5  ;;  %v5471_v63 = vld [vmem:[#allocation21_spill] sm:$0xff]  ;;  %v5479_v32 = vmax.f32 %v5478_v7, 0.0 }
 0x350   : > { %v3126_v48 = vpop.eup %3125  ;;  %v1086_v40 = vmul.f32 1.442695, %v1010_v1  ;;  %v1088_v42 = vmul.f32 1.442695, %v1011_v35  ;;  %1571 = vrot.lane.b32.xlu0 %v5470_v6, %s3395_s25  ;;  %1771 = vmatprep.subr.mxu0 %v5452_v10 }
 0x351   : > { %2876 = vmatprep.mubr.msk.f32.mxu0 %vm889_vm2, %v3126_v48  ;;  %v961_v45 = vpop.xlane.xlu1 %960  ;;  %v1158_v21 = vsel %vm889_vm2, %v3126_v48, 0.0 }
 0x352   : > { %3139 = vpow2.f32 %v1086_v40  ;;  %1499 = vmatmul.mubr.f32.gmra.mxu0 %v3124_v29  ;;  %v1012_v57 = vsub.f32 %v5471_v63, %v961_v45  ;;  %v1013_v53 = vsub.f32 %v5472_v11, %v961_v45  ;;  %v4343_v44 = vadd.f32 %v3124_v29, %v1158_v21  ;;  %v1658_v40 = vpop.permute.xlu0 %1657 }
 0x353   : > { %v3128_v30 = vpop.eup %3127  ;;  %3141 = vpow2.f32 %v1088_v42  ;;  %2898 = vmatpush1.xpose.msk.msra.mxu0 %vm603_vm1, %v4160_v16  ;;  %2290 = vrot.lane.b32.xlu1 %v5475_v18, %s3396_s5  ;;  %v5486_v63 = vmax.f32 %v5476_v27, 0.0  ;;  %v5490_v18 = vmax.f32 %v3571_v4, 0.0  ;;  %v5494_v4 = vmax.f32 %v3519_v50, 0.0 }
 0x354   : > { %5473 = vst [vmem:[#allocation13_spill] sm:$0xff] %v4343_v44  ;;  %v3130_v49 = vpop.eup %3129  ;;  %v1090_v12 = vmul.f32 1.442695, %v1012_v57  ;;  %v1092_v41 = vmul.f32 1.442695, %v1013_v53  ;;  %1575 = vrot.lane.b32.xlu0 %v5476_v27, %s3395_s25  ;;  %1773 = vmatprep.subr.mxu0 %v5452_v10  ;;  %v5496_v27 = vld [vmem:[#allocation22_spill] sm:$0xff] }
 0x355   : > { %2877 = vmatprep.mubr.msk.f32.mxu0 %vm889_vm2, %v3130_v49  ;;  %v1162_v60 = vsel %vm889_vm2, %v3130_v49, 0.0  ;;  %v1616_v29 = vpop.permute.xlu1 %1615 }
 0x356   : > { %3143 = vpow2.f32 %v1090_v12  ;;  %1504 = vmatmul.mubr.f32.gmra.mxu0 %v3128_v30  ;;  %v4355_v14 = vadd.f32 %v3128_v30, %v1162_v60  ;;  %v1656_v53 = vpop.permute.xlu0 %1655  ;;  %v5495_v12 = vld [vmem:[#allocation26_spill] sm:$0xff] }
 0x357   : > { %v3132_v16 = vpop.eup %3131  ;;  %3145 = vpow2.f32 %v1092_v41  ;;  %2899 = vmatpush1.xpose.msk.msra.mxu0 %vm603_vm1, %v4154_v52  ;;  %2286 = vrot.lane.b32.xlu1 %v5479_v32, %s3396_s5  ;;  %v5482_v52 = vmax.f32 %v3543_v59, 0.0  ;;  %v5484_v59 = vmax.f32 %v5480_v34, 0.0  ;;  %v5498_v32 = vld [vmem:[#allocation23_spill] sm:$0xff] }
 0x358   : > { %5477 = vst [vmem:[#allocation12_spill] sm:$0xff] %v4355_v14  ;;  %v3134_v22 = vpop.eup %3133  ;;  %1579 = vrot.lane.b32.xlu0 %v5480_v34, %s3395_s25  ;;  %1775 = vmatprep.subr.mxu0 %v5452_v10 }
 0x359   : > { %2878 = vmatprep.mubr.msk.f32.mxu0 %vm889_vm2, %v3134_v22  ;;  %v1166_v46 = vsel %vm889_vm2, %v3134_v22, 0.0 }
 0x35a   : > { %1509 = vmatmul.mubr.f32.gmra.mxu0 %v3132_v16  ;;  %v4367_v9 = vadd.f32 %v3132_v16, %v1166_v46  ;;  %v5497_v16 = vld [vmem:[#allocation27_spill] sm:$0xff] }
 0x35b   : > { %v3136_v1 = vpop.eup %3135  ;;  %2900 = vmatpush1.xpose.msk.msra.mxu0 %vm603_vm1, %v4158_v55  ;;  %2284 = vrot.lane.b32.xlu1 %v5482_v52, %s3396_s5 }
 0x35c   : > { %5481 = vst [vmem:[#allocation4_spill] sm:$0xff] %v4367_v9  ;;  %v3138_v15 = vpop.eup %3137  ;;  %1583 = vrot.lane.b32.xlu0 %v5478_v7, %s3395_s25  ;;  %1777 = vmatprep.subr.mxu0 %v5452_v10 }
 0x35d   : > { %2879 = vmatprep.mubr.msk.f32.mxu0 %vm889_vm2, %v3138_v15  ;;  %v1170_v35 = vsel %vm889_vm2, %v3138_v15, 0.0  ;;  %v5500_v15 = vld [vmem:[#allocation28_spill] sm:$0xff] }
 0x35e   : > { %1514 = vmatmul.mubr.f32.gmra.mxu0 %v3136_v1  ;;  %v4379_v24 = vadd.f32 %v3136_v1, %v1170_v35 }
 0x35f   : > { %v3140_v48 = vpop.eup %3139  ;;  %2901 = vmatpush1.xpose.msk.msra.mxu0 %vm603_vm1, %v1616_v29  ;;  %2282 = vrot.lane.b32.xlu1 %v5484_v59, %s3396_s5  ;;  %v5501_v29 = vld [vmem:[#allocation25_spill] sm:$0xff]  ;;  %v5502_v59 = vmax.f32 %v3551_v62, 0.0 }
 0x360   : > { %5483 = vst [vmem:[#allocation15_spill] sm:$0xff] %v4379_v24  ;;  %v3142_v55 = vpop.eup %3141  ;;  %1587 = vrot.lane.b32.xlu0 %v5474_v19, %s3395_s25  ;;  %1799 = vmatprep.subr.mxu0 %v5452_v10  ;;  %v5488_v19 = vmax.f32 %v3559_v0, 0.0  ;;  %v5491_v0 = vld [vmem:[#allocation10_spill] sm:$0xff] }
 0x361   : > { %2880 = vmatprep.mubr.msk.f32.mxu0 %vm889_vm2, %v3142_v55  ;;  %v1174_v42 = vsel %vm889_vm2, %v3142_v55, 0.0 }
 0x362   : > { %1519 = vmatmul.mubr.f32.gmra.mxu0 %v3140_v48  ;;  %v4390_v45 = vadd.f32 %v3140_v48, %v1174_v42  ;;  %v5504_v42 = vmax.f32 %v5491_v0, 0.0 }
 0x363   : > { %v3144_v21 = vpop.eup %3143  ;;  %2902 = vmatpush2.xpose.msk.msra.mxu0 %vm603_vm1, %v1658_v40  ;;  %2278 = vrot.lane.b32.xlu1 %v5486_v63, %s3396_s5  ;;  %v5503_v40 = vmax.f32 %v3563_v2, 0.0 }
 0x364   : > { %5485 = vst [vmem:[#allocation14_spill] sm:$0xff] %v4390_v45  ;;  %v3146_v57 = vpop.eup %3145  ;;  %1591 = vrot.lane.b32.xlu0 %v5465_v26, %s3395_s25  ;;  %1801 = vmatprep.subr.mxu0 %v5452_v10  ;;  %v5489_v26 = vmax.f32 %v5470_v6, 0.0 }
 0x365   : > { %2881 = vmatprep.mubr.msk.f32.mxu0 %vm889_vm2, %v3146_v57  ;;  %v1178_v11 = vsel %vm889_vm2, %v3146_v57, 0.0 }
 0x366   : > { %1524 = vmatmul.mubr.f32.gmra.mxu0 %v3144_v21  ;;  %v4401_v30 = vadd.f32 %v3144_v21, %v1178_v11 }
 0x367   : > { %2903 = vmatpush2.xpose.msk.msra.mxu0 %vm603_vm1, %v1656_v53  ;;  %2276 = vrot.lane.b32.xlu1 %v5488_v19, %s3396_s5 }
 0x368   : > { %5487 = vst [vmem:[#allocation24_spill] sm:$0xff] %v4401_v30  ;;  %1595 = vrot.lane.b32.xlu0 %v5460_v47, %s3395_s25  ;;  %1803 = vmatprep.subr.mxu0 %v5452_v10  ;;  %v5492_v47 = vmax.f32 %v3503_v43, 0.0  ;;  %v5499_v43 = vmax.f32 %v3535_v56, 0.0  ;;  %v3360_v30 = vld [vmem:[%s5360_s3 + $0xf8] sm:$0xff] }
 0x36b   : > { %2274 = vrot.lane.b32.xlu1 %v5489_v26, %s3396_s5 }
 0x36c   : > { %1599 = vrot.lane.b32.xlu0 %v5455_v8, %s3395_s25  ;;  %v5493_v8 = vmax.f32 %v3497_v39, 0.0 }
 0x36f   : > { %2312 = vrot.lane.b32.xlu1 %v5490_v18, %s3396_s5 }
 0x370   : > { %1603 = vrot.lane.b32.xlu0 %v3569_v3, %s3395_s25 }
 0x374   : > { %1607 = vrot.lane.b32.xlu0 %v5462_v38, %s3395_s25 }
 0x378   : > { %1611 = vrot.lane.b32.xlu0 %v5491_v0, %s3395_s25 }
 0x37c   : > { %2304 = vrot.lane.b32.xlu0 %v5492_v47, %s3396_s5 }
 0x380   : > { %2300 = vrot.lane.b32.xlu0 %v5493_v8, %s3396_s5 }
 0x384   : > { %2296 = vrot.lane.b32.xlu0 %v5494_v4, %s3396_s5 }
 0x386   : > { %v965_v6 = vpop.xlane.xlu0 %964  ;;  %v969_v49 = vpop.xlane.xlu1 %968 }
 0x387   : > { %v1014_v41 = vsub.f32 %v5495_v12, %v965_v6  ;;  %v1015_v60 = vsub.f32 %v5496_v27, %v965_v6  ;;  %v1016_v7 = vsub.f32 %v5497_v16, %v969_v49  ;;  %v1017_v22 = vsub.f32 %v5498_v32, %v969_v49 }
 0x388   : > { %2288 = vrot.lane.b32.xlu0 %v5499_v43, %s3396_s5 }
 0x389   : > { %v1094_v39 = vmul.f32 1.442695, %v1014_v41  ;;  %v1096_v34 = vmul.f32 1.442695, %v1015_v60  ;;  %v1098_v46 = vmul.f32 1.442695, %v1016_v7 }
 0x38a   : > { %v1100_v1 = vmul.f32 1.442695, %v1017_v22  ;;  %v1654_v50 = vpop.permute.xlu0 %1653  ;;  %v977_v52 = vpop.xlane.xlu1 %976 }
 0x38b   : > { %3147 = vpow2.f32 %v1094_v39  ;;  %v1020_v35 = vsub.f32 %v5500_v15, %v977_v52  ;;  %v1021_v48 = vsub.f32 %v5501_v29, %v977_v52  ;;  %2904 = vmatpush2.xpose.msk.msra.mxu0 %vm603_vm1, %v1654_v50 }
 0x38c   : > { %3149 = vpow2.f32 %v1096_v34  ;;  %2280 = vrot.lane.b32.xlu0 %v5502_v59, %s3396_s5  ;;  %1805 = vmatprep.subr.mxu0 %v5452_v10 }
 0x38d   : > { %3151 = vpow2.f32 %v1098_v46  ;;  %v1106_v56 = vmul.f32 1.442695, %v1020_v35  ;;  %v1108_v55 = vmul.f32 1.442695, %v1021_v48 }
 0x38e   : > { %3153 = vpow2.f32 %v1100_v1  ;;  %v1648_v21 = vpop.permute.xlu1 %1647 }
 0x38f   : > { %3155 = vpow2.f32 %v1106_v56 }
 0x390   : > { %3157 = vpow2.f32 %v1108_v55  ;;  %2316 = vrot.lane.b32.xlu0 %v5503_v40, %s3396_s5 }
 0x392   : > { %v1574_v19 = vpop.permute.xlu1 %1573 }
 0x394   : > { %2314 = vrot.lane.b32.xlu0 %v5504_v42, %s3396_s5 }
 0x396   : > { %v1578_v6 = vpop.permute.xlu1 %1577 }
 0x398   : > { %v3148_v63 = vpop.eup %3147 }
 0x399   : > { %v3150_v62 = vpop.eup %3149 }
 0x39a   : > { %v3152_v57 = vpop.eup %3151  ;;  %2882 = vmatprep.mubr.msk.f32.mxu0 %vm889_vm2, %v3150_v62  ;;  %v1182_v11 = vsel %vm889_vm2, %v3150_v62, 0.0  ;;  %v1582_v49 = vpop.permute.xlu1 %1581 }
 0x39b   : > { %v3154_v53 = vpop.eup %3153  ;;  %1529 = vmatmul.mubr.f32.gmra.mxu0 %v3148_v63  ;;  %v4455_v26 = vadd.f32 %v3148_v63, %v1182_v11 }
 0x39c   : > { %v3156_v18 = vpop.eup %3155  ;;  %2883 = vmatprep.mubr.msk.f32.mxu0 %vm889_vm2, %v3154_v53  ;;  %v1186_v2 = vsel %vm889_vm2, %v3154_v53, 0.0 }
 0x39d   : > { %5505 = vst [vmem:[#allocation2_spill] sm:$0xff] %v4455_v26  ;;  %v3158_v0 = vpop.eup %3157  ;;  %v4459_v47 = vadd.f32 %v3152_v57, %v1186_v2 }
 0x39e   : > { %v1194_v8 = vsel %vm889_vm2, %v3158_v0, 0.0  ;;  %v4464_v12 = vpop.permute.xlu1 %1585 }
 0x39f   : > { %5506 = vst [vmem:[#allocation11_spill] sm:$0xff] %v4459_v47  ;;  %1534 = vmatmul.mubr.f32.gmra.mxu0 %v3152_v57  ;;  %v4462_v4 = vadd.f32 %v3156_v18, %v1194_v8 }
 0x3a1   : > { %5507 = vst [vmem:[#allocation17_spill] sm:$0xff] %v4462_v4 }
 0x3a2   : > { %v4466_v41 = vpop.permute.xlu1 %1589 }
 0x3a6   : > { %v4468_v27 = vpop.permute.xlu1 %1593 }
 0x3aa   : > { %v4472_v43 = vpop.permute.xlu1 %1597 }
 0x3ae   : > { %v4477_v46 = vpop.permute.xlu1 %1601 }
 0x3bb   : > { %v973_v60 = vpop.xlane.xlu0 %972 }
 0x3bc   : > { %v1018_v16 = vsub.f32 %v4225_v31, %v973_v60  ;;  %v1019_v7 = vsub.f32 %v4208_v37, %v973_v60  ;;  %v4482_v37 = vpop.permute.xlu1 %1605 }
 0x3be   : > { %v1102_v32 = vmul.f32 1.442695, %v1018_v16  ;;  %v1104_v22 = vmul.f32 1.442695, %v1019_v7 }
 0x3bf   : > { %v1652_v39 = vpop.permute.xlu0 %1651 }
 0x3c0   : > { %3159 = vpow2.f32 %v1102_v32  ;;  %2905 = vmatpush2.xpose.msk.msra.mxu0 %vm603_vm1, %v1652_v39  ;;  %v4488_v48 = vpop.permute.xlu1 %1609 }
 0x3c1   : > { %3161 = vpow2.f32 %v1104_v22  ;;  %1807 = vmatprep.subr.mxu0 %v5452_v10 }
 0x3c3   : > { %v1650_v34 = vpop.permute.xlu0 %1649 }
 0x3c4   : > { %2906 = vmatpush2.xpose.msk.msra.mxu0 %vm603_vm1, %v1650_v34  ;;  %v4492_v56 = vpop.permute.xlu1 %1613 }
 0x3c5   : > { %1809 = vmatprep.subr.mxu0 %v5452_v10 }
 0x3c7   : > { %v1572_v31 = vpop.permute.xlu0 %1571 }
 0x3c8   : > { %2907 = vmatpush2.xpose.msk.msra.mxu0 %vm603_vm1, %v1648_v21  ;;  %v2303_v42 = vpop.permute.xlu1 %2302 }
 0x3c9   : > { %2406 = vmatprep.subr.mxu0 %v5452_v10 }
 0x3cb   : > { %v1576_v1 = vpop.permute.xlu0 %1575 }
 0x3cc   : > { %v2299_v62 = vpop.permute.xlu1 %2298 }
 0x3cd   : > { %v3160_v50 = vpop.eup %3159 }
 0x3ce   : > { %v3162_v52 = vpop.eup %3161 }
 0x3cf   : > { %2884 = vmatprep.mubr.msk.f32.mxu0 %vm889_vm2, %v3162_v52  ;;  %v1580_v15 = vpop.permute.xlu0 %1579  ;;  %v1190_v35 = vsel %vm889_vm2, %v3162_v52, 0.0 }
 0x3d0   : > { %1539 = vmatmul.mubr.f32.gmra.mxu0 %v3160_v50  ;;  %v4486_v29 = vadd.f32 %v3160_v50, %v1190_v35  ;;  %v2295_v2 = vpop.permute.xlu1 %2294 }
 0x3d1   : > { %2885 = vmatprep.mubr.msk.f32.mxu0 %vm889_vm2, %v3158_v0 }
 0x3d2   : > { %5508 = vst [vmem:[#allocation16_spill] sm:$0xff] %v4486_v29 }
 0x3d3   : > { %v1584_v59 = vpop.permute.xlu0 %1583 }
 0x3d4   : > { %1544 = vmatmul.mubr.f32.gmra.mxu0 %v3156_v18  ;;  %v2293_v16 = vpop.permute.xlu1 %2292 }
 0x3d5   : > { %1811 = vmatprep.mubr.f32.mxu0 %v5452_v10 }
 0x3d7   : > { %v1588_v55 = vpop.permute.xlu0 %1587 }
 0x3d8   : > { %2908 = vmatmul.mubr.msk.f32.vlgmr.msra.gmra.mxu0 %vm603_vm1, %v1572_v31 }
 0x3d9   : > { %1817 = vmatprep.mubr.f32.mxu0 %v5452_v10 }
 0x3db   : > { %v4496_v40 = vpop.permute.xlu0 %1591 }
 0x3dc   : > { %2909 = vmatmul.mubr.msk.f32.gmra.mxu0 %vm603_vm1, %v1574_v19 }
 0x3dd   : > { %1823 = vmatprep.mubr.f32.mxu0 %v5452_v10 }
 0x3df   : > { %v4500_v21 = vpop.permute.xlu0 %1595 }
 0x3e0   : > { %2910 = vmatmul.mubr.msk.f32.gmra.mxu0 %vm603_vm1, %v1576_v1 }
 0x3e1   : > { %1829 = vmatprep.mubr.f32.mxu0 %v5452_v10 }
 0x3e2   : > { %v4504_v63 = vpop.f32.mrf.mxu0 }
 0x3e3   : > { %5509 = vst [vmem:[#allocation3_spill] sm:$0xff] %v4504_v63  ;;  %v4506_v57 = vpop.permute.xlu0 %1599 }
 0x3e4   : > { %v1442_v11 = vpop.f32.mrf.mxu0  ;;  %2911 = vmatmul.mubr.msk.f32.gmra.mxu0 %vm603_vm1, %v1578_v6 }
 0x3e5   : > { %1835 = vmatprep.mubr.f32.mxu0 %v5452_v10 }
 0x3e6   : > { %v4510_v53 = vpop.f32.mrf.mxu0 }
 0x3e7   : > { %5510 = vst [vmem:[#allocation19_spill] sm:$0xff] %v4510_v53  ;;  %v4512_v19 = vpop.permute.xlu0 %1603 }
 0x3e8   : > { %v1447_v18 = vpop.f32.mrf.mxu0  ;;  %2912 = vmatmul.mubr.msk.f32.gmra.mxu0 %vm603_vm1, %v1580_v15 }
 0x3e9   : > { %1841 = vmatprep.mubr.f32.mxu0 %v5452_v10 }
 0x3ea   : > { %v4516_v0 = vpop.f32.mrf.mxu0 }
 0x3eb   : > { %5511 = vst [vmem:[#allocation18_spill] sm:$0xff] %v4516_v0  ;;  %v4518_v8 = vpop.permute.xlu0 %1607 }
 0x3ec   : > { %v1452_v60 = vpop.f32.mrf.mxu0  ;;  %2913 = vmatmul.mubr.msk.f32.gmra.mxu0 %vm603_vm1, %v1582_v49  ;;  %v2291_v49 = vpop.permute.xlu1 %2290 }
 0x3ed   : > { %1847 = vmatprep.mubr.f32.mxu0 %v5452_v10 }
 0x3ee   : > { %v4522_v6 = vpop.f32.mrf.mxu0 }
 0x3ef   : > { %5512 = vst [vmem:[#allocation9_spill] sm:$0xff] %v4522_v6  ;;  %v4524_v7 = vpop.permute.xlu0 %1611  ;;  %v3347_v6 = vld [vmem:[%s5360_s3 + $0x98] sm:$0xff] }
 0x3f0   : > { %v1457_v32 = vpop.f32.mrf.mxu0  ;;  %2914 = vmatmul.mubr.msk.f32.gmra.mxu0 %vm603_vm1, %v1584_v59  ;;  %v2287_v52 = vpop.permute.xlu1 %2286 }
 0x3f1   : > { %1853 = vmatprep.mubr.f32.mxu0 %v5452_v10 }
 0x3f2   : > { %v4528_v22 = vpop.f32.mrf.mxu0 }
 0x3f3   : > { %5513 = vst [vmem:[#allocation21_spill] sm:$0xff] %v4528_v22  ;;  %v2305_v39 = vpop.permute.xlu0 %2304 }
 0x3f4   : > { %v1462_v34 = vpop.f32.mrf.mxu0  ;;  %2915 = vmatmul.mubr.msk.f32.gmra.mxu0 %vm603_vm1, %v4464_v12  ;;  %3037 = vmatpush1.msra.mxu1 %v2305_v39 }
 0x3f5   : > { %2407 = vmatpush1.msra.mxu0 %v2305_v39  ;;  %3016 = vmatprep.subr.mxu1 %v5452_v10 }
 0x3f6   : > { %v4533_v31 = vpop.f32.mrf.mxu0  ;;  %2408 = vmatprep.subr.mxu0 %v5452_v10  ;;  %1859 = vmatprep.mubr.f32.mxu0 %v5452_v10 }
 0x3f7   : > { %5514 = vst [vmem:[#allocation20_spill] sm:$0xff] %v4533_v31  ;;  %2409 = vmatpush1.msra.mxu0 %v2303_v42  ;;  %3038 = vmatpush1.msra.mxu1 %v2303_v42  ;;  %v2301_v1 = vpop.permute.xlu0 %2300  ;;  %v2285_v42 = vpop.permute.xlu1 %2284 }
 0x3f8   : > { %v1467_v50 = vpop.f32.mrf.mxu0  ;;  %2916 = vmatmul.mubr.msk.f32.gmra.mxu0 %vm603_vm1, %v1588_v55  ;;  %2410 = vmatprep.subr.mxu0 %v5452_v10 }
 0x3f9   : > { %3017 = vmatprep.subr.mxu1 %v5452_v10  ;;  %2411 = vmatpush1.msra.mxu0 %v2301_v1 }
 0x3fa   : > { %3039 = vmatpush1.msra.mxu1 %v2301_v1  ;;  %v4540_v12 = vpop.f32.mrf.mxu0  ;;  %2412 = vmatprep.subr.mxu0 %v5452_v10 }
 0x3fb   : > { %5515 = vst [vmem:[#allocation5_spill] sm:$0xff] %v4540_v12  ;;  %3018 = vmatprep.subr.mxu1 %v5452_v10  ;;  %1865 = vmatprep.mubr.f32.mxu0 %v5452_v10  ;;  %v2297_v15 = vpop.permute.xlu0 %2296 }
 0x3fc   : > { %2413 = vmatpush1.msra.mxu0 %v2299_v62  ;;  %3040 = vmatpush1.msra.mxu1 %v2299_v62  ;;  %v1472_v35 = vpop.f32.mrf.mxu0 }
 0x3fd   : > { %2917 = vmatmul.mubr.msk.f32.gmra.mxu0 %vm603_vm1, %v4466_v41  ;;  %2414 = vmatprep.subr.mxu0 %v5452_v10 }
 0x3fe   : > { %3019 = vmatprep.subr.mxu1 %v5452_v10  ;;  %2415 = vmatpush1.msra.mxu0 %v2297_v15  ;;  %v4549_v59 = vpop.f32.mrf.mxu0 }
 0x3ff   : > { %5516 = vst [vmem:[#allocation8_spill] sm:$0xff] %v4549_v59  ;;  %3041 = vmatpush1.msra.mxu1 %v2297_v15  ;;  %2416 = vmatprep.subr.mxu0 %v5452_v10  ;;  %v2289_v18 = vpop.permute.xlu0 %2288 }
 0x400   : > { %3020 = vmatprep.subr.mxu1 %v5452_v10  ;;  %1871 = vmatprep.mubr.f32.mxu0 %v5452_v10  ;;  %v1477_v55 = vpop.f32.mrf.mxu0 }
 0x401   : > { %2417 = vmatpush1.msra.mxu0 %v2295_v2  ;;  %3042 = vmatpush1.msra.mxu1 %v2295_v2 }
 0x402   : > { %2918 = vmatmul.mubr.msk.f32.gmra.mxu0 %vm603_vm1, %v4496_v40  ;;  %2418 = vmatprep.subr.mxu0 %v5452_v10  ;;  %v4557_v41 = vpop.f32.mrf.mxu0  ;;  %v2283_v40 = vpop.permute.xlu1 %2282 }
 0x403   : > { %5517 = vst [vmem:[#allocation6_spill] sm:$0xff] %v4557_v41  ;;  %3021 = vmatprep.subr.mxu1 %v5452_v10  ;;  %2419 = vmatpush1.msra.mxu0 %v2293_v16 }
 0x404   : > { %3043 = vmatpush1.msra.mxu1 %v2293_v16  ;;  %2420 = vmatprep.subr.mxu0 %v5452_v10  ;;  %v1482_v62 = vpop.f32.mrf.mxu0 }
 0x405   : > { %3022 = vmatprep.subr.mxu1 %v5452_v10  ;;  %1877 = vmatprep.mubr.f32.mxu0 %v5452_v10 }
 0x406   : > { %2421 = vmatpush1.msra.mxu0 %v2291_v49  ;;  %3044 = vmatpush1.msra.mxu1 %v2291_v49  ;;  %v4563_v11 = vpop.f32.mrf.mxu0  ;;  %v2279_v16 = vpop.permute.xlu1 %2278 }
 0x407   : > { %5518 = vst [vmem:[#allocation7_spill] sm:$0xff] %v4563_v11  ;;  %2919 = vmatmul.mubr.msk.f32.gmra.mxu0 %vm603_vm1, %v4468_v27  ;;  %2422 = vmatprep.subr.mxu0 %v5452_v10 }
 0x408   : > { %3023 = vmatprep.subr.mxu1 %v5452_v10  ;;  %2423 = vmatpush1.msra.mxu0 %v2289_v18  ;;  %v1487_v2 = vpop.f32.mrf.mxu0 }
 0x409   : > { %3045 = vmatpush1.msra.mxu1 %v2289_v18  ;;  %2424 = vmatprep.subr.mxu0 %v5452_v10 }
 0x40a   : > { %3024 = vmatprep.subr.mxu1 %v5452_v10  ;;  %1883 = vmatprep.mubr.f32.mxu0 %v5452_v10  ;;  %v4572_v60 = vpop.f32.mrf.mxu0  ;;  %v2277_v49 = vpop.permute.xlu1 %2276 }
 0x40b   : > { %5519 = vst [vmem:[#allocation10_spill] sm:$0xff] %v4572_v60  ;;  %2425 = vmatpush1.msra.mxu0 %v2287_v52  ;;  %3046 = vmatpush1.msra.mxu1 %v2287_v52 }
 0x40c   : > { %2920 = vmatmul.mubr.msk.f32.gmra.mxu0 %vm603_vm1, %v4500_v21  ;;  %2426 = vmatprep.subr.mxu0 %v5452_v10  ;;  %v1492_v27 = vpop.f32.mrf.mxu0  ;;  %v2281_v21 = vpop.permute.xlu0 %2280 }
 0x40d   : > { %3025 = vmatprep.subr.mxu1 %v5452_v10  ;;  %2427 = vmatpush1.msra.mxu0 %v2285_v42 }
 0x40e   : > { %3047 = vmatpush1.msra.mxu1 %v2285_v42  ;;  %2428 = vmatprep.subr.mxu0 %v5452_v10  ;;  %v4579_v32 = vpop.f32.mrf.mxu0  ;;  %v2275_v15 = vpop.permute.xlu1 %2274 }
 0x40f   : > { %5520 = vst [vmem:[#allocation26_spill] sm:$0xff] %v4579_v32  ;;  %3026 = vmatprep.subr.mxu1 %v5452_v10  ;;  %1889 = vmatprep.mubr.f32.mxu0 %v5452_v10 }
 0x410   : > { %2429 = vmatpush1.msra.mxu0 %v2283_v40  ;;  %3048 = vmatpush1.msra.mxu1 %v2283_v40  ;;  %v1497_v39 = vpop.f32.mrf.mxu0  ;;  %v2317_v50 = vpop.permute.xlu0 %2316 }
 0x411   : > { %2921 = vmatmul.mubr.msk.f32.gmra.mxu0 %vm603_vm1, %v4472_v43  ;;  %2430 = vmatprep.subr.mxu0 %v5452_v10 }
 0x412   : > { %3027 = vmatprep.subr.mxu1 %v5452_v10  ;;  %2431 = vmatpush1.msra.mxu0 %v2281_v21  ;;  %v4587_v34 = vpop.f32.mrf.mxu0  ;;  %v2313_v62 = vpop.permute.xlu1 %2312 }
 0x413   : > { %5521 = vst [vmem:[#allocation22_spill] sm:$0xff] %v4587_v34  ;;  %3049 = vmatpush1.msra.mxu1 %v2281_v21  ;;  %2432 = vmatprep.subr.mxu0 %v5452_v10  ;;  %v3345_v34 = vld [vmem:[%s5360_s3 + $0x88] sm:$0xff] }
 0x414   : > { %3028 = vmatprep.subr.mxu1 %v5452_v10  ;;  %1895 = vmatprep.mubr.f32.mxu0 %v5452_v10  ;;  %v1502_v1 = vpop.f32.mrf.mxu0  ;;  %v2315_v55 = vpop.permute.xlu0 %2314 }
 0x415   : > { %2433 = vmatpush1.msra.mxu0 %v2279_v16  ;;  %3050 = vmatpush1.msra.mxu1 %v2279_v16 }
 0x416   : > { %2922 = vmatmul.mubr.msk.f32.gmra.mxu0 %vm603_vm1, %v4506_v57  ;;  %2434 = vmatprep.subr.mxu0 %v5452_v10  ;;  %v4595_v43 = vpop.f32.mrf.mxu0 }
 0x417   : > { %5522 = vst [vmem:[#allocation27_spill] sm:$0xff] %v4595_v43  ;;  %3029 = vmatprep.subr.mxu1 %v5452_v10  ;;  %2435 = vmatpush1.msra.mxu0 %v2277_v49 }
 0x418   : > { %3051 = vmatpush1.msra.mxu1 %v2277_v49  ;;  %2436 = vmatprep.subr.mxu0 %v5452_v10  ;;  %v1507_v52 = vpop.f32.mrf.mxu0 }
 0x419   : > { %3030 = vmatprep.subr.mxu1 %v5452_v10  ;;  %1901 = vmatprep.mubr.f32.mxu0 %v5452_v10 }
 0x41a   : > { %2437 = vmatpush1.msra.mxu0 %v2275_v15  ;;  %3052 = vmatpush1.msra.mxu1 %v2275_v15  ;;  %v4601_v57 = vpop.f32.mrf.mxu0 }
 0x41b   : > { %5523 = vst [vmem:[#allocation23_spill] sm:$0xff] %v4601_v57  ;;  %2923 = vmatmul.mubr.msk.f32.gmra.mxu0 %vm603_vm1, %v4477_v46  ;;  %2458 = vmatprep.subr.mxu0 %v5452_v10  ;;  %v3343_v57 = vld [vmem:[%s5360_s3 + $0x78] sm:$0xff] }
 0x41c   : > { %3031 = vmatprep.subr.mxu1 %v5452_v10  ;;  %2459 = vmatpush2.msra.mxu0 %v2317_v50  ;;  %v1512_v35 = vpop.f32.mrf.mxu0 }
 0x41d   : > { %3053 = vmatpush2.msra.mxu1 %v2317_v50  ;;  %2460 = vmatprep.subr.mxu0 %v5452_v10 }
 0x41e   : > { %3032 = vmatprep.subr.mxu1 %v5452_v10  ;;  %1907 = vmatprep.mubr.f32.mxu0 %v5452_v10  ;;  %v4610_v42 = vpop.f32.mrf.mxu0 }
 0x41f   : > { %5524 = vst [vmem:[#allocation28_spill] sm:$0xff] %v4610_v42  ;;  %2461 = vmatpush2.msra.mxu0 %v2315_v55  ;;  %3054 = vmatpush2.msra.mxu1 %v2315_v55 }
 0x420   : > { %2924 = vmatmul.mubr.msk.f32.gmra.mxu0 %vm603_vm1, %v4512_v19  ;;  %2462 = vmatprep.subr.mxu0 %v5452_v10  ;;  %v1517_v46 = vpop.f32.mrf.mxu0 }
 0x421   : > { %3033 = vmatprep.subr.mxu1 %v5452_v10  ;;  %2463 = vmatpush2.msra.mxu0 %v2313_v62 }
 0x422   : > { %3055 = vmatpush2.msra.mxu1 %v2313_v62  ;;  %1913 = vmatprep.mubr.f32.mxu0 %v5452_v10  ;;  %v4617_v40 = vpop.f32.mrf.mxu0 }
 0x423   : > { %5525 = vst [vmem:[#allocation25_spill] sm:$0xff] %v4617_v40  ;;  %2464 = vmatprep.subr.mxu0 %v5452_v10  ;;  %3034 = vmatprep.subr.mxu1 %v5452_v10 }
 0x424   : > { %2925 = vmatmul.mubr.msk.f32.gmra.mxu0 %vm603_vm1, %v4482_v37  ;;  %v1522_v18 = vpop.f32.mrf.mxu0 }
 0x425   : > { %1919 = vmatprep.mubr.f32.mxu0 %v5452_v10 }
 0x426   : > { %v4624_v19 = vpop.f32.mrf.mxu0 }
 0x427   : > { %5526 = vst [vmem:[#allocation29_spill] sm:$0xff] %v4624_v19  ;;  %v3341_v19 = vld [vmem:[%s5360_s3 + $0x68] sm:$0xff] }
 0x428   : > { %2926 = vmatmul.mubr.msk.f32.gmra.mxu0 %vm603_vm1, %v4518_v8  ;;  %v1527_v2 = vpop.f32.mrf.mxu0 }
 0x429   : > { %1925 = vmatprep.mubr.f32.mxu0 %v5452_v10 }
 0x42c   : > { %2927 = vmatmul.mubr.msk.f32.gmra.mxu0 %vm603_vm1, %v4488_v48 }
 0x42d   : > { %1931 = vmatprep.mubr.f32.mxu0 %v5452_v10 }
 0x430   : > { %2928 = vmatmul.mubr.msk.f32.gmra.mxu0 %vm603_vm1, %v4524_v7 }
 0x431   : > { %1937 = vmatprep.mubr.f32.mxu0 %v5452_v10 }
 0x434   : > { %2929 = vmatmul.mubr.msk.f32.gmra.mxu0 %vm603_vm1, %v4492_v56 }
 0x45b   : > { %v4637_v37 = vpop.f32.mrf.mxu0 }
 0x45c   : > { %5527 = vst [vmem:[#allocation30_spill] sm:$0xff] %v4637_v37 }
 0x45d   : > { %v1532_v27 = vpop.f32.mrf.mxu0 }
 0x45e   : > { %v3339_v27 = vld [vmem:[%s5360_s3 + $0x58] sm:$0xff] }
 0x45f   : > { %v4639_v8 = vpop.f32.mrf.mxu0 }
 0x460   : > { %5528 = vst [vmem:[#allocation31_spill] sm:$0xff] %v4639_v8 }
 0x461   : > { %v1537_v16 = vpop.f32.mrf.mxu0 }
 0x490   : > { %v4641_v39 = vpop.f32.mrf.mxu0 }
 0x491   : > { %5529 = vst [vmem:[#allocation32_spill] sm:$0xff] %v4641_v39 }
 0x492   : > { %v1542_v21 = vpop.f32.mrf.mxu0 }
 0x493   : > { %v3340_v21 = vld [vmem:[%s5360_s3 + $0x50] sm:$0xff] }
 0x494   : > { %v4643_v48 = vpop.f32.mrf.mxu0 }
 0x495   : > { %5530 = vst [vmem:[#allocation33_spill] sm:$0xff] %v4643_v48 }
 0x496   : > { %v1547_v49 = vpop.f32.mrf.mxu0 }
 0x498   : > { %v4645_v1 = vpop.f32.mrf.mxu0 }
 0x49a   : > { %v4647_v7 = vpop.f32.mrf.mxu0 }
 0x49c   : > { %v4649_v50 = vpop.f32.mrf.mxu0 }
 0x49e   : > { %v4651_v52 = vpop.f32.mrf.mxu0 }
 0x4a0   : > { %v4653_v56 = vpop.f32.mrf.mxu0 }
 0x4a2   : > { %v4655_v15 = vpop.f32.mrf.mxu0 }
 0x4a4   : > { %v4657_v35 = vpop.f32.mrf.mxu0 }
 0x4a6   : > { %v4659_v55 = vpop.f32.mrf.mxu0 }
 0x4a8   : > { %v4661_v62 = vpop.f32.mrf.mxu0 }
 0x4aa   : > { %v4663_v46 = vpop.f32.mrf.mxu0 }
 0x4ac   : > { %v1843_v18 = vpop.f32.mrf.mxu0 }
 0x4ad   : > { %v4673_v49 = vadd.f32 %v3340_v21, %v1843_v18 }
 0x4ae   : > { %v1845_v2 = vpop.f32.mrf.mxu0 }
 0x4af   : > { %v4668_v16 = vadd.f32 %v3339_v27, %v1845_v2  ;;  %v3342_v2 = vld [vmem:[%s5360_s3 + $0x60] sm:$0xff] }
 0x4b0   : > { %v1849_v48 = vpop.f32.mrf.mxu0 }
 0x4b1   : > { %v1964_v39 = vsel %vm889_vm2, %v4668_v16, -inf  ;;  %v4686_v27 = vadd.f32 %v3342_v2, %v1849_v48 }
 0x4b2   : > { %v1965_v8 = vmax.f32 %v4673_v49, %v1964_v39  ;;  %v1851_v37 = vpop.f32.mrf.mxu0 }
 0x4b3   : > { %v4681_v40 = vadd.f32 %v3341_v19, %v1851_v37  ;;  %v3344_v37 = vld [vmem:[%s5360_s3 + $0x70] sm:$0xff] }
 0x4b4   : > { %1966 = vmax.xlane.f32.xlu0 %v1965_v8  ;;  %v1855_v18 = vpop.f32.mrf.mxu0 }
 0x4b5   : > { %v1968_v21 = vsel %vm889_vm2, %v4681_v40, -inf  ;;  %v4699_v48 = vadd.f32 %v3344_v37, %v1855_v18 }
 0x4b6   : > { %v1969_v39 = vmax.f32 %v4686_v27, %v1968_v21  ;;  %v1857_v42 = vpop.f32.mrf.mxu0 }
 0x4b7   : > { %v4694_v19 = vadd.f32 %v3343_v57, %v1857_v42  ;;  %v3346_v42 = vld [vmem:[%s5360_s3 + $0x80] sm:$0xff] }
 0x4b8   : > { %1970 = vmax.xlane.f32.xlu1 %v1969_v39  ;;  %v1861_v8 = vpop.f32.mrf.mxu0 }
 0x4b9   : > { %v1972_v2 = vsel %vm889_vm2, %v4694_v19, -inf  ;;  %v4712_v18 = vadd.f32 %v3346_v42, %v1861_v8  ;;  %v5531_v8 = vmax.f32 %v5462_v38, 0.0 }
 0x4ba   : > { %v1973_v21 = vmax.f32 %v4699_v48, %v1972_v2  ;;  %v1863_v43 = vpop.f32.mrf.mxu0 }
 0x4bb   : > { %v4707_v57 = vadd.f32 %v3345_v34, %v1863_v43 }
 0x4bc   : > { %1974 = vmax.xlane.f32.xlu0 %v1973_v21  ;;  %v5532_v21 = vmax.f32 %v3577_v5, 0.0  ;;  %v3348_v5 = vld [vmem:[%s5360_s3 + $0xa8] sm:$0xff] }
 0x4bd   : > { %v1976_v39 = vsel %vm889_vm2, %v4707_v57, -inf  ;;  %v1867_v37 = vpop.f32.mrf.mxu0 }
 0x4be   : > { %v1977_v2 = vmax.f32 %v4712_v18, %v1976_v39 }
 0x4bf   : > { %v1869_v32 = vpop.f32.mrf.mxu0 }
 0x4c0   : > { %1978 = vmax.xlane.f32.xlu1 %v1977_v2  ;;  %v4732_v0 = vadd.f32 %v3347_v6, %v1869_v32  ;;  %v3350_v6 = vld [vmem:[%s5360_s3 + $0x90] sm:$0xff] }
 0x4c1   : > { %v4751_v32 = vadd.f32 %v3350_v6, %v1867_v37  ;;  %v3352_v37 = vld [vmem:[%s5360_s3 + $0xa0] sm:$0xff] }
 0x4c2   : > { %v1873_v60 = vpop.f32.mrf.mxu0  ;;  %v1980_v38 = vsel %vm889_vm2, %v4732_v0, -inf }
 0x4c3   : > { %v1981_v29 = vmax.f32 %v4751_v32, %v1980_v38  ;;  %v3353_v38 = vld [vmem:[%s5360_s3 + $0xb0] sm:$0xff] }
 0x4c4   : > { %v1875_v11 = vpop.f32.mrf.mxu0 }
 0x4c7   : > { %v1879_v41 = vpop.f32.mrf.mxu0 }
 0x4c8   : > { %v4771_v6 = vadd.f32 %v3353_v38, %v1879_v41  ;;  %v3355_v41 = vld [vmem:[%s5360_s3 + $0xc0] sm:$0xff] }
 0x4c9   : > { %v1881_v34 = vpop.f32.mrf.mxu0 }
 0x4cc   : > { %v1885_v43 = vpop.f32.mrf.mxu0 }
 0x4ce   : > { %v1887_v59 = vpop.f32.mrf.mxu0 }
 0x4d1   : > { %v4717_v12 = vpop.f32.mrf.mxu0  ;;  %2310 = vrot.lane.b32.xlu1 %v5531_v8, %s3396_s5  ;;  %v4741_v8 = vadd.f32 %v3348_v5, %v1875_v11 }
 0x4d2   : > { %2308 = vrot.lane.b32.xlu0 %v5532_v21, %s3396_s5  ;;  %v3349_v21 = vld [vmem:[%s5360_s3 + $0xb8] sm:$0xff] }
 0x4d3   : > { %v4725_v42 = vpop.f32.mrf.mxu0  ;;  %v4746_v63 = vadd.f32 %v3349_v21, %v1881_v34  ;;  %v1984_v47 = vsel %vm889_vm2, %v4741_v8, -inf  ;;  %v3351_v34 = vld [vmem:[%s5360_s3 + $0xc8] sm:$0xff]  ;;  %v4766_v21 = vadd.f32 %v3352_v37, %v1873_v60  ;;  %v4786_v37 = vadd.f32 %v3355_v41, %v1885_v43  ;;  %v3357_v43 = vld [vmem:[%s5360_s3] sm:$0xff] }
 0x4d4   : > { %v4761_v5 = vadd.f32 %v3351_v34, %v1887_v59  ;;  %v3354_v59 = vld [vmem:[%s5360_s3 + $0x8] sm:$0xff] }
 0x4d5   : > { %v1988_v11 = vsel %vm889_vm2, %v4746_v63, -inf  ;;  %v1985_v45 = vmax.f32 %v4766_v21, %v1984_v47  ;;  %v4779_v34 = vadd.f32 %v3354_v59, %v4647_v7  ;;  %v3356_v7 = vld [vmem:[%s5360_s3 + $0x18] sm:$0xff]  ;;  %v4801_v59 = vadd.f32 %v3357_v43, %v4645_v1  ;;  %v3358_v41 = vld [vmem:[%s5360_s3 + $0xe8] sm:$0xff] }
 0x4d6   : > { %v1897_v39 = vpop.f32.mrf.mxu0  ;;  %v1989_v9 = vmax.f32 %v4771_v6, %v1988_v11  ;;  %v1992_v60 = vsel %vm889_vm2, %v4761_v5, -inf  ;;  %v4795_v38 = vadd.f32 %v3356_v7, %v4651_v52  ;;  %v3359_v7 = vld [vmem:[%s5360_s3 + $0x10] sm:$0xff] }
 0x4d7   : > { %v1993_v47 = vmax.f32 %v4786_v37, %v1992_v60  ;;  %v1944_v11 = vsel %vm889_vm2, %v4779_v34, -inf  ;;  %v4815_v1 = vadd.f32 %v3359_v7, %v4649_v50  ;;  %v3362_v7 = vld [vmem:[%s5360_s3 + $0x108] sm:$0xff] }
 0x4d8   : > { %v1899_v2 = vpop.f32.mrf.mxu0  ;;  %v1948_v60 = vsel %vm889_vm2, %v4795_v38, -inf }
 0x4d9   : > { %v4809_v52 = vadd.f32 %v3358_v41, %v1899_v2  ;;  %v3361_v41 = vld [vmem:[%s5360_s3 + $0xe0] sm:$0xff] }
 0x4da   : > { %v4828_v44 = vadd.f32 %v3361_v41, %v1897_v39  ;;  %v3364_v41 = vld [vmem:[%s5360_s3 + $0x118] sm:$0xff] }
 0x4db   : > { %v4727_v31 = vpop.f32.mrf.mxu0 }
 0x4dd   : > { %v1905_v22 = vpop.f32.mrf.mxu0 }
 0x4de   : > { %v4823_v2 = vadd.f32 %v3360_v30, %v1905_v22  ;;  %v3363_v30 = vld [vmem:[%s5360_s3 + $0xf0] sm:$0xff] }
 0x4df   : > { %v4842_v22 = vadd.f32 %v3363_v30, %v4727_v31 }
 0x4e0   : > { %v4734_v53 = vpop.f32.mrf.mxu0 }
 0x4e2   : > { %v1911_v4 = vpop.f32.mrf.mxu0 }
 0x4e3   : > { %v4836_v24 = vadd.f32 %v3362_v7, %v1911_v4  ;;  %v3365_v7 = vld [vmem:[%s5360_s3 + $0x100] sm:$0xff] }
 0x4e4   : > { %v1915_v26 = vpop.f32.mrf.mxu0  ;;  %v4856_v31 = vadd.f32 %v3365_v7, %v4734_v53  ;;  %v3367_v53 = vld [vmem:[%s5360_s3 + $0x110] sm:$0xff] }
 0x4f1   : > { %1982 = vmax.xlane.f32.xlu0 %v1981_v29  ;;  %v1917_v29 = vpop.f32.mrf.mxu0 }
 0x4f2   : > { %v4850_v4 = vadd.f32 %v3364_v41, %v1917_v29  ;;  %v3366_v29 = vld [vmem:[%s5360_s3 + $0x128] sm:$0xff] }
 0x4f4   : > { %5533 = vst [vmem:[#allocation34_spill] sm:$0xff] %v4850_v4  ;;  %v2012_v14 = vsel %vm889_vm2, %v4850_v4, -inf }
 0x4f5   : > { %1986 = vmax.xlane.f32.xlu1 %v1985_v45  ;;  %1990 = vmax.xlane.f32.xlu0 %v1989_v9  ;;  %v1921_v9 = vpop.f32.mrf.mxu0  ;;  %v1945_v45 = vmax.f32 %v4801_v59, %v1944_v11  ;;  %v2000_v11 = vsel %vm889_vm2, %v4809_v52, -inf }
 0x4f7   : > { %v1923_v43 = vpop.f32.mrf.mxu0 }
 0x4f8   : > { %v4867_v41 = vadd.f32 %v3366_v29, %v1923_v43  ;;  %v3369_v43 = vld [vmem:[%s5360_s3 + $0x120] sm:$0xff] }
 0x4f9   : > { %1994 = vmax.xlane.f32.xlu1 %v1993_v47  ;;  %v1949_v47 = vmax.f32 %v4815_v1, %v1948_v60  ;;  %v1927_v50 = vpop.f32.mrf.mxu0  ;;  %v2004_v60 = vsel %vm889_vm2, %v4823_v2, -inf  ;;  %v4885_v29 = vadd.f32 %v3369_v43, %v1921_v9  ;;  %v3372_v43 = vld [vmem:[%s5360_s3 + $0x158] sm:$0xff] }
 0x4fa   : > { %5535 = vst [vmem:[#allocation35_spill] sm:$0xff] %v4867_v41  ;;  %v2016_v7 = vsel %vm889_vm2, %v4867_v41, -inf }
 0x4fb   : > { %v1929_v39 = vpop.f32.mrf.mxu0 }
 0x4fd   : > { %1946 = vmax.xlane.f32.xlu1 %v1945_v45  ;;  %v2001_v45 = vmax.f32 %v4828_v44, %v2000_v11  ;;  %v2008_v11 = vsel %vm889_vm2, %v4836_v24, -inf  ;;  %v1933_v30 = vpop.f32.mrf.mxu0 }
 0x501   : > { %1950 = vmax.xlane.f32.xlu1 %v1949_v47  ;;  %v2005_v47 = vmax.f32 %v4842_v22, %v2004_v60  ;;  %v5534_v60 = vmax.f32 %v3569_v3, 0.0 }
 0x505   : > { %2002 = vmax.xlane.f32.xlu1 %v2001_v45  ;;  %v2009_v45 = vmax.f32 %v4856_v31, %v2008_v11  ;;  %v1935_v11 = vpop.f32.mrf.mxu0 }
 0x509   : > { %2006 = vmax.xlane.f32.xlu1 %v2005_v47  ;;  %v4872_v47 = vadd.f32 %v3367_v53, %v1915_v26  ;;  %v1939_v26 = vpop.f32.mrf.mxu0  ;;  %v3370_v53 = vld [vmem:[%s5360_s3 + $0x148] sm:$0xff] }
 0x50a   : > { %v4893_v41 = vadd.f32 %v3370_v53, %v1935_v11  ;;  %v3373_v11 = vld [vmem:[%s5360_s3 + $0x140] sm:$0xff] }
 0x50b   : > { %2306 = vrot.lane.b32.xlu0 %v5534_v60, %s3396_s5  ;;  %v2013_v3 = vmax.f32 %v4872_v47, %v2012_v14  ;;  %v3368_v60 = vld [vmem:[%s5360_s3 + $0x138] sm:$0xff]  ;;  %v1941_v9 = vpop.f32.mrf.mxu0  ;;  %v4911_v53 = vadd.f32 %v3373_v11, %v1933_v30  ;;  %v3377_v11 = vld [vmem:[%s5360_s3 + $0xd0] sm:$0xff] }
 0x50c   : > { %v4880_v4 = vadd.f32 %v3368_v60, %v1929_v39  ;;  %v3371_v39 = vld [vmem:[%s5360_s3 + $0x130] sm:$0xff]  ;;  %v3375_v30 = vld [vmem:[%s5360_s3 + $0xd8] sm:$0xff] }
 0x50d   : > { %2010 = vmax.xlane.f32.xlu1 %v2009_v45  ;;  %v2017_v45 = vmax.f32 %v4885_v29, %v2016_v7  ;;  %v4898_v60 = vadd.f32 %v3371_v39, %v1927_v50  ;;  %v2024_v7 = vsel %vm889_vm2, %v4893_v41, -inf }
 0x50e   : > { %5536 = vst [vmem:[#allocation36_spill] sm:$0xff] %v4880_v4  ;;  %v2020_v14 = vsel %vm889_vm2, %v4880_v4, -inf  ;;  %v4906_v4 = vadd.f32 %v3372_v43, %v1941_v9  ;;  %v2025_v50 = vmax.f32 %v4911_v53, %v2024_v7  ;;  %v3376_v7 = vld [vmem:[%s5360_s3 + $0x28] sm:$0xff] }
 0x50f   : > { %v4932_v43 = vadd.f32 %v3376_v7, %v4655_v15  ;;  %v3378_v15 = vld [vmem:[%s5360_s3 + $0x38] sm:$0xff] }
 0x511   : > { %2014 = vmax.xlane.f32.xlu1 %v2013_v3  ;;  %v2021_v3 = vmax.f32 %v4898_v60, %v2020_v14  ;;  %v3374_v14 = vld [vmem:[%s5360_s3 + $0x150] sm:$0xff] }
 0x512   : > { %v4919_v39 = vadd.f32 %v3374_v14, %v1939_v26  ;;  %v4950_v14 = vadd.f32 %v3378_v15, %v4659_v55  ;;  %v3380_v55 = vld [vmem:[%s5360_s3 + $0x48] sm:$0xff] }
 0x513   : > { %v4966_v7 = vadd.f32 %v3380_v55, %v4663_v46  ;;  %v3382_v46 = vld [vmem:[%s5360_s3 + $0x40] sm:$0xff] }
 0x515   : > { %2018 = vmax.xlane.f32.xlu1 %v2017_v45  ;;  %v2028_v45 = vsel %vm889_vm2, %v4906_v4, -inf }
 0x516   : > { %v2029_v9 = vmax.f32 %v4919_v39, %v2028_v45  ;;  %v1952_v45 = vsel %vm889_vm2, %v4932_v43, -inf }
 0x519   : > { %2022 = vmax.xlane.f32.xlu1 %v2021_v3  ;;  %v4926_v3 = vadd.f32 %v3375_v30, %v4725_v42  ;;  %v4941_v42 = vadd.f32 %v3377_v11, %v4717_v12  ;;  %v1956_v30 = vsel %vm889_vm2, %v4950_v14, -inf  ;;  %v1960_v11 = vsel %vm889_vm2, %v4966_v7, -inf }
 0x51b   : > { %v1996_v26 = vsel %vm889_vm2, %v4926_v3, -inf }
 0x51d   : > { %2026 = vmax.xlane.f32.xlu1 %v2025_v50  ;;  %v1997_v50 = vmax.f32 %v4941_v42, %v1996_v26 }
 0x521   : > { %2030 = vmax.xlane.f32.xlu1 %v2029_v9 }
 0x525   : > { %1116 = vadd.xlane.f32.xlu1 %v4202_v20  ;;  %v3379_v20 = vld [vmem:[%s5360_s3 + $0x20] sm:$0xff] }
 0x526   : > { %v4957_v12 = vadd.f32 %v3379_v20, %v4653_v56 }
 0x528   : > { %v1953_v9 = vmax.f32 %v4957_v12, %v1952_v45 }
 0x529   : > { %1124 = vadd.xlane.f32.xlu1 %v4235_v58  ;;  %v3381_v58 = vld [vmem:[%s5360_s3 + $0x30] sm:$0xff] }
 0x52a   : > { %1998 = vmax.xlane.f32.xlu0 %v1997_v50  ;;  %v4973_v56 = vadd.f32 %v3381_v58, %v4657_v35 }
 0x52c   : > { %v1957_v26 = vmax.f32 %v4973_v56, %v1956_v30 }
 0x52d   : > { %1132 = vadd.xlane.f32.xlu1 %v4256_v61  ;;  %v4983_v61 = vadd.f32 %v3382_v46, %v4661_v62 }
 0x52e   : > { %1954 = vmax.xlane.f32.xlu0 %v1953_v9 }
 0x52f   : > { %v1961_v50 = vmax.f32 %v4983_v61, %v1960_v11 }
 0x531   : > { %1140 = vadd.xlane.f32.xlu1 %v4278_v25 }
 0x532   : > { %1958 = vmax.xlane.f32.xlu0 %v1957_v26 }
 0x535   : > { %1148 = vadd.xlane.f32.xlu1 %v4301_v51 }
 0x536   : > { %1962 = vmax.xlane.f32.xlu0 %v1961_v50 }
 0x539   : > { %1156 = vadd.xlane.f32.xlu1 %v4329_v23 }
 0x53a   : > { %1112 = vadd.xlane.f32.xlu0 %v4188_v17 }
 0x53d   : > { %v1967_v35 = vpop.xlane.xlu0 %1966 }
 0x53e   : > { %v2042_v25 = vsub.f32 %v4673_v49, %v1967_v35  ;;  %v2043_v45 = vsub.f32 %v4668_v16, %v1967_v35  ;;  %1120 = vadd.xlane.f32.xlu0 %v4219_v33 }
 0x540   : > { %v2096_v15 = vmul.f32 1.442695, %v2042_v25  ;;  %v2098_v62 = vmul.f32 1.442695, %v2043_v45 }
 0x541   : > { %v1971_v20 = vpop.xlane.xlu1 %1970 }
 0x542   : > { %3163 = vpow2.f32 %v2096_v15  ;;  %v2044_v9 = vsub.f32 %v4686_v27, %v1971_v20  ;;  %v2045_v51 = vsub.f32 %v4681_v40, %v1971_v20  ;;  %1128 = vadd.xlane.f32.xlu0 %v4245_v54 }
 0x543   : > { %3165 = vpow2.f32 %v2098_v62 }
 0x544   : > { %v2100_v23 = vmul.f32 1.442695, %v2044_v9  ;;  %v2102_v17 = vmul.f32 1.442695, %v2045_v51 }
 0x545   : > { %v1975_v30 = vpop.xlane.xlu0 %1974 }
 0x546   : > { %3167 = vpow2.f32 %v2100_v23  ;;  %v2046_v49 = vsub.f32 %v4699_v48, %v1975_v30  ;;  %v2047_v16 = vsub.f32 %v4694_v19, %v1975_v30  ;;  %1136 = vadd.xlane.f32.xlu0 %v4267_v36 }
 0x547   : > { %3169 = vpow2.f32 %v2102_v17 }
 0x548   : > { %v2104_v33 = vmul.f32 1.442695, %v2046_v49  ;;  %v2106_v55 = vmul.f32 1.442695, %v2047_v16 }
 0x549   : > { %v1979_v58 = vpop.xlane.xlu1 %1978  ;;  %v2309_v19 = vpop.permute.xlu0 %2308 }
 0x54a   : > { %3171 = vpow2.f32 %v2104_v33  ;;  %v2048_v40 = vsub.f32 %v4712_v18, %v1979_v58  ;;  %v2049_v54 = vsub.f32 %v4707_v57, %v1979_v58  ;;  %1144 = vadd.xlane.f32.xlu0 %v4289_v28 }
 0x54b   : > { %3173 = vpow2.f32 %v2106_v55 }
 0x54c   : > { %v2108_v27 = vmul.f32 1.442695, %v2048_v40  ;;  %v2110_v26 = vmul.f32 1.442695, %v2049_v54 }
 0x54d   : > { %v2311_v11 = vpop.permute.xlu1 %2310 }
 0x54e   : > { %3175 = vpow2.f32 %v2108_v27  ;;  %1152 = vadd.xlane.f32.xlu0 %v4315_v13  ;;  %2465 = vmatpush2.msra.mxu0 %v2311_v11 }
 0x54f   : > { %v3164_v36 = vpop.eup %3163  ;;  %3177 = vpow2.f32 %v2110_v26  ;;  %3056 = vmatpush2.msra.mxu1 %v2311_v11  ;;  %2466 = vmatprep.subr.mxu0 %v5452_v10 }
 0x550   : > { %v3166_v48 = vpop.eup %3165  ;;  %3035 = vmatprep.subr.mxu1 %v5452_v10  ;;  %2467 = vmatpush2.msra.mxu0 %v2309_v19 }
 0x551   : > { %3057 = vmatpush2.msra.mxu1 %v2309_v19  ;;  %2935 = vmatprep.mubr.msk.f32.mxu1 %vm889_vm2, %v3166_v48  ;;  %v2184_v28 = vsel %vm889_vm2, %v3166_v48, 0.0 }
 0x552   : > { %2468 = vmatprep.subr.mxu0 %v5452_v10  ;;  %3036 = vmatprep.subr.mxu1 %v5452_v10  ;;  %v5008_v13 = vadd.f32 %v3164_v36, %v2184_v28 }
 0x553   : > { %v3168_v57 = vpop.eup %3167 }
 0x554   : > { %v3170_v18 = vpop.eup %3169 }
 0x555   : > { %v2188_v46 = vsel %vm889_vm2, %v3170_v18, 0.0 }
 0x556   : > { %v5011_v50 = vadd.f32 %v3168_v57, %v2188_v46 }
 0x557   : > { %v3172_v35 = vpop.eup %3171 }
 0x558   : > { %v3174_v25 = vpop.eup %3173 }
 0x559   : > { %v2192_v45 = vsel %vm889_vm2, %v3174_v25, 0.0 }
 0x55a   : > { %v5014_v15 = vadd.f32 %v3172_v35, %v2192_v45 }
 0x55b   : > { %v3176_v62 = vpop.eup %3175 }
 0x55c   : > { %v3178_v20 = vpop.eup %3177 }
 0x55d   : > { %v2196_v9 = vsel %vm889_vm2, %v3178_v20, 0.0 }
 0x55e   : > { %v5017_v51 = vadd.f32 %v3176_v62, %v2196_v9 }
 0x57a   : > { %v1983_v10 = vpop.xlane.xlu0 %1982 }
 0x57b   : > { %v2050_v23 = vsub.f32 %v4751_v32, %v1983_v10  ;;  %v2051_v17 = vsub.f32 %v4732_v0, %v1983_v10 }
 0x57d   : > { %v2112_v30 = vmul.f32 1.442695, %v2050_v23  ;;  %v2114_v49 = vmul.f32 1.442695, %v2051_v17 }
 0x57e   : > { %v1991_v16 = vpop.xlane.xlu0 %1990  ;;  %v1987_v33 = vpop.xlane.xlu1 %1986 }
 0x57f   : > { %3179 = vpow2.f32 %v2112_v30  ;;  %v2054_v55 = vsub.f32 %v4771_v6, %v1991_v16  ;;  %v2055_v58 = vsub.f32 %v4746_v63, %v1991_v16  ;;  %v2052_v40 = vsub.f32 %v4766_v21, %v1987_v33 }
 0x580   : > { %3181 = vpow2.f32 %v2114_v49  ;;  %v2053_v54 = vsub.f32 %v4741_v8, %v1987_v33 }
 0x581   : > { %v2120_v27 = vmul.f32 1.442695, %v2054_v55  ;;  %v2122_v26 = vmul.f32 1.442695, %v2055_v58  ;;  %v2116_v11 = vmul.f32 1.442695, %v2052_v40 }
 0x582   : > { %v2118_v32 = vmul.f32 1.442695, %v2053_v54  ;;  %v2307_v19 = vpop.permute.xlu0 %2306  ;;  %v1995_v0 = vpop.xlane.xlu1 %1994 }
 0x583   : > { %3183 = vpow2.f32 %v2120_v27  ;;  %v2056_v48 = vsub.f32 %v4786_v37, %v1995_v0  ;;  %v2057_v28 = vsub.f32 %v4761_v5, %v1995_v0  ;;  %2469 = vmatpush2.msra.mxu0 %v2307_v19  ;;  %3058 = vmatpush2.msra.mxu1 %v2307_v19 }
 0x584   : > { %3185 = vpow2.f32 %v2122_v26  ;;  %2496 = vmatmul.mubr.f32.vlgmr.msra.gmra.mxu1 %v3164_v36 }
 0x585   : > { %3187 = vpow2.f32 %v2116_v11  ;;  %v2124_v63 = vmul.f32 1.442695, %v2056_v48  ;;  %v2126_v21 = vmul.f32 1.442695, %v2057_v28  ;;  %2936 = vmatprep.mubr.msk.f32.mxu1 %vm889_vm2, %v3170_v18 }
 0x586   : > { %3189 = vpow2.f32 %v2118_v32  ;;  %v1947_v8 = vpop.xlane.xlu1 %1946 }
 0x587   : > { %3191 = vpow2.f32 %v2124_v63  ;;  %v2032_v6 = vsub.f32 %v4801_v59, %v1947_v8  ;;  %v2033_v46 = vsub.f32 %v4779_v34, %v1947_v8 }
 0x588   : > { %3193 = vpow2.f32 %v2126_v21  ;;  %2501 = vmatmul.mubr.f32.gmra.mxu1 %v3168_v57 }
 0x589   : > { %v2076_v37 = vmul.f32 1.442695, %v2032_v6  ;;  %v2078_v5 = vmul.f32 1.442695, %v2033_v46  ;;  %2937 = vmatprep.mubr.msk.f32.mxu1 %vm889_vm2, %v3174_v25 }
 0x58a   : > { %v1951_v45 = vpop.xlane.xlu1 %1950 }
 0x58b   : > { %3195 = vpow2.f32 %v2076_v37  ;;  %v2034_v36 = vsub.f32 %v4815_v1, %v1951_v45  ;;  %v2035_v9 = vsub.f32 %v4795_v38, %v1951_v45 }
 0x58c   : > { %v3180_v18 = vpop.eup %3179  ;;  %3197 = vpow2.f32 %v2078_v5  ;;  %2506 = vmatmul.mubr.f32.gmra.mxu1 %v3172_v35 }
 0x58d   : > { %v3182_v10 = vpop.eup %3181  ;;  %v2080_v23 = vmul.f32 1.442695, %v2034_v36  ;;  %v2082_v59 = vmul.f32 1.442695, %v2035_v9  ;;  %2938 = vmatprep.mubr.msk.f32.mxu1 %vm889_vm2, %v3178_v20 }
 0x58e   : > { %v2200_v34 = vsel %vm889_vm2, %v3182_v10, 0.0  ;;  %v2003_v0 = vpop.xlane.xlu1 %2002 }
 0x58f   : > { %3199 = vpow2.f32 %v2080_v23  ;;  %v5035_v57 = vadd.f32 %v3180_v18, %v2200_v34  ;;  %v2060_v63 = vsub.f32 %v4828_v44, %v2003_v0  ;;  %v2061_v21 = vsub.f32 %v4809_v52, %v2003_v0 }
 0x590   : > { %v3184_v25 = vpop.eup %3183  ;;  %3201 = vpow2.f32 %v2082_v59  ;;  %2511 = vmatmul.mubr.f32.gmra.mxu1 %v3176_v62 }
 0x591   : > { %v3186_v17 = vpop.eup %3185  ;;  %2939 = vmatprep.mubr.msk.f32.mxu1 %vm889_vm2, %v3182_v10  ;;  %v2132_v5 = vmul.f32 1.442695, %v2060_v63 }
 0x592   : > { %v3188_v38 = vpop.eup %3187  ;;  %v2208_v1 = vsel %vm889_vm2, %v3186_v17, 0.0  ;;  %v2007_v48 = vpop.xlane.xlu1 %2006 }
 0x593   : > { %v3190_v35 = vpop.eup %3189  ;;  %v5039_v30 = vadd.f32 %v3184_v25, %v2208_v1  ;;  %v2062_v45 = vsub.f32 %v4842_v22, %v2007_v48  ;;  %v2063_v10 = vsub.f32 %v4823_v2, %v2007_v48  ;;  %v5539_v48 = vld [vmem:[#allocation36_spill] sm:$0xff] }
 0x594   : > { %v3192_v49 = vpop.eup %3191  ;;  %2516 = vmatmul.mubr.f32.gmra.mxu1 %v3180_v18  ;;  %v2204_v20 = vsel %vm889_vm2, %v3190_v35, 0.0  ;;  %v2134_v18 = vmul.f32 1.442695, %v2061_v21 }
 0x595   : > { %v3194_v16 = vpop.eup %3193  ;;  %2940 = vmatprep.mubr.msk.f32.mxu1 %vm889_vm2, %v3190_v35  ;;  %v5043_v33 = vadd.f32 %v3188_v38, %v2204_v20  ;;  %v2136_v59 = vmul.f32 1.442695, %v2062_v45 }
 0x596   : > { %v2212_v62 = vsel %vm889_vm2, %v3194_v16, 0.0  ;;  %v2011_v28 = vpop.xlane.xlu1 %2010 }
 0x597   : > { %v5046_v55 = vadd.f32 %v3192_v49, %v2212_v62  ;;  %v2065_v22 = vsub.f32 %v4836_v24, %v2011_v28 }
 0x598   : > { %v3196_v58 = vpop.eup %3195  ;;  %2521 = vmatmul.mubr.f32.gmra.mxu1 %v3188_v38 }
 0x599   : > { %v3198_v40 = vpop.eup %3197  ;;  %2941 = vmatprep.mubr.msk.f32.mxu1 %vm889_vm2, %v3186_v17  ;;  %v2142_v35 = vmul.f32 1.442695, %v2065_v22 }
 0x59a   : > { %2930 = vmatprep.mubr.msk.f32.mxu0 %vm889_vm2, %v3198_v40  ;;  %v2164_v54 = vsel %vm889_vm2, %v3198_v40, 0.0  ;;  %v2015_v6 = vpop.xlane.xlu1 %2014 }
 0x59b   : > { %2471 = vmatmul.mubr.f32.vlgmr.msra.gmra.mxu0 %v3196_v58  ;;  %v2165_v27 = vadd.f32 %v3196_v58, %v2164_v54 }
 0x59c   : > { %v3200_v26 = vpop.eup %3199  ;;  %2526 = vmatmul.mubr.f32.gmra.mxu1 %v3184_v25  ;;  %v2138_v25 = vmul.f32 1.442695, %v2063_v10 }
 0x59d   : > { %v3202_v11 = vpop.eup %3201  ;;  %2166 = vadd.xlane.f32.xlu0 %v2165_v27  ;;  %2942 = vmatprep.mubr.msk.f32.mxu1 %vm889_vm2, %v3194_v16  ;;  %v5538_v27 = vld [vmem:[#allocation35_spill] sm:$0xff] }
 0x59e   : > { %2931 = vmatprep.mubr.msk.f32.mxu0 %vm889_vm2, %v3202_v11  ;;  %v2168_v32 = vsel %vm889_vm2, %v3202_v11, 0.0 }
 0x59f   : > { %2476 = vmatmul.mubr.f32.gmra.mxu0 %v3200_v26  ;;  %v2169_v19 = vadd.f32 %v3200_v26, %v2168_v32 }
 0x5a0   : > { %2531 = vmatmul.mubr.f32.gmra.mxu1 %v3192_v49  ;;  %v5537_v49 = vld [vmem:[#allocation34_spill] sm:$0xff] }
 0x5a1   : > { %2170 = vadd.xlane.f32.xlu1 %v2169_v19  ;;  %v2067_v20 = vsub.f32 %v5537_v49, %v2015_v6 }
 0x5b3   : > { %v1999_v8 = vpop.xlane.xlu0 %1998 }
 0x5b4   : > { %v2058_v46 = vsub.f32 %v4941_v42, %v1999_v8  ;;  %v2059_v37 = vsub.f32 %v4926_v3, %v1999_v8  ;;  %v2019_v42 = vpop.xlane.xlu1 %2018 }
 0x5b5   : > { %v2069_v26 = vsub.f32 %v5538_v27, %v2019_v42 }
 0x5b6   : > { %v2128_v36 = vmul.f32 1.442695, %v2058_v46  ;;  %v2130_v9 = vmul.f32 1.442695, %v2059_v37 }
 0x5b7   : > { %v1955_v23 = vpop.xlane.xlu0 %1954 }
 0x5b8   : > { %3203 = vpow2.f32 %v2128_v36  ;;  %v2036_v44 = vsub.f32 %v4957_v12, %v1955_v23  ;;  %v2037_v52 = vsub.f32 %v4932_v43, %v1955_v23  ;;  %v2064_v43 = vsub.f32 %v4856_v31, %v2011_v28  ;;  %v2023_v62 = vpop.xlane.xlu1 %2022 }
 0x5b9   : > { %3205 = vpow2.f32 %v2130_v9  ;;  %v2146_v31 = vmul.f32 1.442695, %v2067_v20  ;;  %v2071_v28 = vsub.f32 %v5539_v48, %v2023_v62 }
 0x5ba   : > { %3207 = vpow2.f32 %v2132_v5  ;;  %v2084_v34 = vmul.f32 1.442695, %v2036_v44  ;;  %v2086_v3 = vmul.f32 1.442695, %v2037_v52 }
 0x5bb   : > { %3209 = vpow2.f32 %v2134_v18  ;;  %v1959_v17 = vpop.xlane.xlu0 %1958  ;;  %v2154_v37 = vmul.f32 1.442695, %v2071_v28  ;;  %v5545_v28 = vld [vmem:[#allocation14_spill] sm:$0xff] }
 0x5bc   : > { %3211 = vpow2.f32 %v2084_v34  ;;  %v2038_v2 = vsub.f32 %v4973_v56, %v1959_v17  ;;  %v2039_v38 = vsub.f32 %v4950_v14, %v1959_v17  ;;  %v2140_v56 = vmul.f32 1.442695, %v2064_v43  ;;  %v2027_v19 = vpop.xlane.xlu1 %2026 }
 0x5bd   : > { %3213 = vpow2.f32 %v2086_v3  ;;  %v2066_v14 = vsub.f32 %v4872_v47, %v2015_v6  ;;  %v2150_v47 = vmul.f32 1.442695, %v2069_v26  ;;  %v2070_v6 = vsub.f32 %v4898_v60, %v2023_v62 }
 0x5be   : > { %3215 = vpow2.f32 %v2136_v59  ;;  %v2088_v12 = vmul.f32 1.442695, %v2038_v2  ;;  %v2090_v1 = vmul.f32 1.442695, %v2039_v38  ;;  %v2073_v5 = vsub.f32 %v4893_v41, %v2027_v19 }
 0x5bf   : > { %3217 = vpow2.f32 %v2138_v25  ;;  %v1963_v16 = vpop.xlane.xlu0 %1962  ;;  %v2152_v23 = vmul.f32 1.442695, %v2070_v6  ;;  %v2072_v41 = vsub.f32 %v4911_v53, %v2027_v19 }
 0x5c0   : > { %3219 = vpow2.f32 %v2088_v12  ;;  %v2040_v24 = vsub.f32 %v4983_v61, %v1963_v16  ;;  %v2041_v58 = vsub.f32 %v4966_v7, %v1963_v16  ;;  %v2144_v61 = vmul.f32 1.442695, %v2066_v14  ;;  %v2031_v9 = vpop.xlane.xlu1 %2030 }
 0x5c1   : > { %3221 = vpow2.f32 %v2090_v1  ;;  %v2068_v7 = vsub.f32 %v4885_v29, %v2019_v42  ;;  %v2158_v44 = vmul.f32 1.442695, %v2073_v5  ;;  %v2075_v52 = vsub.f32 %v4906_v4, %v2031_v9 }
 0x5c2   : > { %v2092_v40 = vmul.f32 1.442695, %v2040_v24  ;;  %v2094_v54 = vmul.f32 1.442695, %v2041_v58  ;;  %3223 = vpow2.f32 %v2142_v35  ;;  %v2156_v53 = vmul.f32 1.442695, %v2072_v41 }
 0x5c3   : > { %v2148_v29 = vmul.f32 1.442695, %v2068_v7  ;;  %v2074_v22 = vsub.f32 %v4919_v39, %v2031_v9  ;;  %v2162_v4 = vmul.f32 1.442695, %v2075_v52  ;;  %v5542_v7 = vld [vmem:[#allocation13_spill] sm:$0xff]  ;;  %v5144_v6 = vpop.xlane.xlu0 %1112 }
 0x5c4   : > { %3225 = vpow2.f32 %v2092_v40 }
 0x5c5   : > { %v5071_v11 = vpop.eup %3203  ;;  %3227 = vpow2.f32 %v2094_v54  ;;  %v2160_v12 = vmul.f32 1.442695, %v2074_v22 }
 0x5c6   : > { %v5073_v32 = vpop.eup %3205  ;;  %3229 = vpow2.f32 %v2140_v56 }
 0x5c7   : > { %v5076_v0 = vpop.eup %3207  ;;  %3231 = vpow2.f32 %v2146_v31  ;;  %2943 = vmatprep.mubr.msk.f32.mxu1 %vm889_vm2, %v5073_v32  ;;  %v2216_v16 = vsel %vm889_vm2, %v5073_v32, 0.0  ;;  %v5540_v32 = vld [vmem:[#allocation12_spill] sm:$0xff] }
 0x5c8   : > { %v5081_v63 = vpop.eup %3209  ;;  %2536 = vmatmul.mubr.f32.gmra.mxu1 %v5071_v11  ;;  %3233 = vpow2.f32 %v2144_v61  ;;  %v2217_v62 = vadd.f32 %v5071_v11, %v2216_v16  ;;  %v5541_v61 = vld [vmem:[#allocation15_spill] sm:$0xff] }
 0x5c9   : > { %v3212_v21 = vpop.eup %3211  ;;  %2944 = vmatprep.mubr.msk.f32.mxu1 %vm889_vm2, %v5081_v63  ;;  %3235 = vpow2.f32 %v2150_v47  ;;  %v5544_v47 = vld [vmem:[#allocation4_spill] sm:$0xff] }
 0x5ca   : > { %v3214_v8 = vpop.eup %3213  ;;  %3237 = vpow2.f32 %v2148_v29  ;;  %v5549_v29 = vld [vmem:[#allocation17_spill] sm:$0xff] }
 0x5cb   : > { %v5087_v46 = vpop.eup %3215  ;;  %2932 = vmatprep.mubr.msk.f32.mxu0 %vm889_vm2, %v3214_v8  ;;  %v2172_v45 = vsel %vm889_vm2, %v3214_v8, 0.0  ;;  %3239 = vpow2.f32 %v2154_v37  ;;  %v5548_v8 = vld [vmem:[#allocation16_spill] sm:$0xff]  ;;  %v5148_v37 = vpop.xlane.xlu0 %1120 }
 0x5cc   : > { %v5092_v36 = vpop.eup %3217  ;;  %2481 = vmatmul.mubr.f32.gmra.mxu0 %v3212_v21  ;;  %2541 = vmatmul.mubr.f32.gmra.mxu1 %v5076_v0  ;;  %v2173_v18 = vadd.f32 %v3212_v21, %v2172_v45  ;;  %3241 = vpow2.f32 %v2152_v23  ;;  %v5547_v21 = vld [vmem:[#allocation11_spill] sm:$0xff] }
 0x5cd   : > { %v3220_v10 = vpop.eup %3219  ;;  %2945 = vmatprep.mubr.msk.f32.mxu1 %vm889_vm2, %v5092_v36  ;;  %3243 = vpow2.f32 %v2158_v44 }
 0x5ce   : > { %v3222_v60 = vpop.eup %3221  ;;  %2174 = vadd.xlane.f32.xlu0 %v2173_v18  ;;  %3245 = vpow2.f32 %v2156_v53 }
 0x5cf   : > { %2933 = vmatprep.mubr.msk.f32.mxu0 %vm889_vm2, %v3222_v60  ;;  %v2176_v59 = vsel %vm889_vm2, %v3222_v60, 0.0  ;;  %v3224_v42 = vpop.eup %3223  ;;  %3247 = vpow2.f32 %v2162_v4  ;;  %v5152_v45 = vpop.xlane.xlu0 %1128 }
 0x5d0   : > { %2486 = vmatmul.mubr.f32.gmra.mxu0 %v3220_v10  ;;  %2546 = vmatmul.mubr.f32.gmra.mxu1 %v5087_v46  ;;  %v2177_v34 = vadd.f32 %v3220_v10, %v2176_v59  ;;  %3249 = vpow2.f32 %v2160_v12  ;;  %v2228_v58 = vsel %vm889_vm2, %v3224_v42, 0.0 }
 0x5d1   : > { %v3226_v3 = vpop.eup %3225  ;;  %2946 = vmatprep.mubr.msk.f32.mxu1 %vm889_vm2, %v3224_v42 }
 0x5d2   : > { %v3228_v25 = vpop.eup %3227  ;;  %2178 = vadd.xlane.f32.xlu1 %v2177_v34 }
 0x5d3   : > { %v3230_v17 = vpop.eup %3229  ;;  %2934 = vmatprep.mubr.msk.f32.mxu0 %vm889_vm2, %v3228_v25  ;;  %v2180_v2 = vsel %vm889_vm2, %v3228_v25, 0.0  ;;  %v5156_v9 = vpop.xlane.xlu0 %1136 }
 0x5d4   : > { %v3232_v38 = vpop.eup %3231  ;;  %2491 = vmatmul.mubr.f32.gmra.mxu0 %v3226_v3  ;;  %2551 = vmatmul.mubr.f32.gmra.mxu1 %v3230_v17  ;;  %v2181_v43 = vadd.f32 %v3226_v3, %v2180_v2  ;;  %v2229_v14 = vadd.f32 %v3230_v17, %v2228_v58 }
 0x5d5   : > { %2947 = vmatprep.mubr.msk.f32.mxu1 %vm889_vm2, %v3232_v38  ;;  %v3234_v39 = vpop.eup %3233  ;;  %v2232_v56 = vsel %vm889_vm2, %v3232_v38, 0.0 }
 0x5d6   : > { %2182 = vadd.xlane.f32.xlu0 %v2181_v43  ;;  %2186 = vadd.xlane.f32.xlu1 %v5008_v13  ;;  %v3236_v1 = vpop.eup %3235  ;;  %v2233_v40 = vadd.f32 %v3234_v39, %v2232_v56 }
 0x5d7   : > { %v3238_v35 = vpop.eup %3237  ;;  %v2236_v54 = vsel %vm889_vm2, %v3236_v1, 0.0  ;;  %v5160_v10 = vpop.xlane.xlu0 %1144 }
 0x5d8   : > { %2556 = vmatmul.mubr.f32.gmra.mxu1 %v3234_v39  ;;  %v3240_v49 = vpop.eup %3239 }
 0x5d9   : > { %2948 = vmatprep.mubr.msk.f32.mxu1 %vm889_vm2, %v3236_v1  ;;  %v3242_v13 = vpop.eup %3241  ;;  %v2240_v31 = vsel %vm889_vm2, %v3240_v49, 0.0 }
 0x5da   : > { %2190 = vadd.xlane.f32.xlu0 %v5011_v50  ;;  %2194 = vadd.xlane.f32.xlu1 %v5014_v15  ;;  %v3244_v20 = vpop.eup %3243  ;;  %v2241_v27 = vadd.f32 %v3242_v13, %v2240_v31 }
 0x5db   : > { %v3246_v50 = vpop.eup %3245  ;;  %v2244_v26 = vsel %vm889_vm2, %v3244_v20, 0.0  ;;  %v5166_v44 = vpop.xlane.xlu0 %1152 }
 0x5dc   : > { %2561 = vmatmul.mubr.f32.gmra.mxu1 %v3238_v35  ;;  %v3248_v15 = vpop.eup %3247  ;;  %v2245_v11 = vadd.f32 %v3246_v50, %v2244_v26 }
 0x5dd   : > { %2949 = vmatprep.mubr.msk.f32.mxu1 %vm889_vm2, %v3240_v49  ;;  %v3250_v24 = vpop.eup %3249  ;;  %v2248_v19 = vsel %vm889_vm2, %v3248_v15, 0.0 }
 0x5de   : > { %2198 = vadd.xlane.f32.xlu0 %v5017_v51  ;;  %2202 = vadd.xlane.f32.xlu1 %v5035_v57  ;;  %v2220_v51 = vsel %vm889_vm2, %v5081_v63, 0.0  ;;  %v2224_v57 = vsel %vm889_vm2, %v5092_v36, 0.0  ;;  %v2249_v48 = vadd.f32 %v3250_v24, %v2248_v19  ;;  %v5546_v63 = vld [vmem:[#allocation2_spill] sm:$0xff] }
 0x5e0   : > { %2566 = vmatmul.mubr.f32.gmra.mxu1 %v3242_v13 }
 0x5e1   : > { %2950 = vmatprep.mubr.msk.f32.mxu1 %vm889_vm2, %v3244_v20 }
 0x5e2   : > { %2206 = vadd.xlane.f32.xlu0 %v5043_v33  ;;  %2210 = vadd.xlane.f32.xlu1 %v5039_v30  ;;  %v2221_v30 = vadd.f32 %v5076_v0, %v2220_v51  ;;  %v2225_v33 = vadd.f32 %v5087_v46, %v2224_v57  ;;  %v5543_v0 = vld [vmem:[#allocation24_spill] sm:$0xff]  ;;  %v5146_v46 = vpop.xlane.xlu1 %1116 }
 0x5e4   : > { %2571 = vmatmul.mubr.f32.gmra.mxu1 %v3246_v50 }
 0x5e5   : > { %2951 = vmatprep.mubr.msk.f32.mxu1 %vm889_vm2, %v3248_v15 }
 0x5e6   : > { %2214 = vadd.xlane.f32.xlu0 %v5046_v55  ;;  %2218 = vadd.xlane.f32.xlu1 %v2217_v62  ;;  %v2237_v55 = vadd.f32 %v3238_v35, %v2236_v54  ;;  %v5150_v5 = vpop.xlane.xlu1 %1124 }
 0x5e8   : > { %2576 = vmatmul.mubr.f32.gmra.mxu1 %v3250_v24 }
 0x5ea   : > { %2222 = vadd.xlane.f32.xlu0 %v2221_v30  ;;  %2226 = vadd.xlane.f32.xlu1 %v2225_v33  ;;  %v5154_v36 = vpop.xlane.xlu1 %1132 }
 0x5ee   : > { %2230 = vadd.xlane.f32.xlu0 %v2229_v14  ;;  %2234 = vadd.xlane.f32.xlu1 %v2233_v40  ;;  %v5158_v18 = vpop.xlane.xlu1 %1140 }
 0x5f2   : > { %2238 = vadd.xlane.f32.xlu0 %v2237_v55  ;;  %2242 = vadd.xlane.f32.xlu1 %v2241_v27  ;;  %v5164_v23 = vpop.xlane.xlu1 %1148 }
 0x5f6   : > { %1164 = vadd.xlane.f32.xlu1 %v5540_v32  ;;  %2246 = vadd.xlane.f32.xlu0 %v2245_v11  ;;  %v5170_v42 = vpop.xlane.xlu1 %1156 }
 0x5fa   : > { %1172 = vadd.xlane.f32.xlu1 %v5541_v61  ;;  %1160 = vadd.xlane.f32.xlu0 %v5542_v7 }
 0x5fe   : > { %1180 = vadd.xlane.f32.xlu1 %v5543_v0  ;;  %1168 = vadd.xlane.f32.xlu0 %v5544_v47 }
 0x602   : > { %1176 = vadd.xlane.f32.xlu0 %v5545_v28  ;;  %2250 = vadd.xlane.f32.xlu1 %v2249_v48 }
 0x606   : > { %1184 = vadd.xlane.f32.xlu0 %v5546_v63  ;;  %1188 = vadd.xlane.f32.xlu1 %v5547_v21 }
 0x60a   : > { %1192 = vadd.xlane.f32.xlu0 %v5548_v8  ;;  %1196 = vadd.xlane.f32.xlu1 %v5549_v29 }
 0x626   : > { %v2167_v34 = vpop.xlane.xlu0 %2166 }
 0x627   : > { %3251 = vrcp.f32 %v2167_v34 }
 0x62a   : > { %v2171_v53 = vpop.xlane.xlu1 %2170 }
 0x62b   : > { %3253 = vrcp.f32 %v2171_v53 }
 0x634   : > { %v3252_v12 = vpop.eup %3251 }
 0x638   : > { %v3254_v16 = vpop.eup %3253 }
 0x644   : > { %v5162_v60 = vpop.f32.mrf.mxu1 }
 0x646   : > { %v2499_v41 = vpop.f32.mrf.mxu1 }
 0x648   : > { %v5168_v52 = vpop.f32.mrf.mxu1 }
 0x64a   : > { %v2504_v59 = vpop.f32.mrf.mxu1 }
 0x64c   : > { %v5172_v3 = vpop.f32.mrf.mxu1 }
 0x64e   : > { %v2509_v25 = vpop.f32.mrf.mxu1 }
 0x650   : > { %v5174_v22 = vpop.f32.mrf.mxu1 }
 0x652   : > { %v2514_v17 = vpop.f32.mrf.mxu1 }
 0x654   : > { %v5176_v4 = vpop.f32.mrf.mxu1 }
 0x656   : > { %v2519_v2 = vpop.f32.mrf.mxu1 }
 0x657   : > { %v2175_v58 = vpop.xlane.xlu0 %2174 }
 0x658   : > { %v5178_v38 = vpop.f32.mrf.mxu1  ;;  %3255 = vrcp.f32 %v2175_v58 }
 0x65a   : > { %v2524_v43 = vpop.f32.mrf.mxu1 }
 0x65b   : > { %v2472_v39 = vpop.f32.mrf.mxu0  ;;  %v2179_v35 = vpop.xlane.xlu1 %2178 }
 0x65c   : > { %v2581_v1 = vmul.f32 %v3252_v12, %v2472_v39  ;;  %v5180_v49 = vpop.f32.mrf.mxu1  ;;  %3257 = vrcp.f32 %v2179_v35 }
 0x65d   : > { %v2474_v13 = vpop.f32.mrf.mxu0 }
 0x65e   : > { %2625 = vrot.lane.b32.xlu0 %v2581_v1, %s3397_s28  ;;  %v2529_v20 = vpop.f32.mrf.mxu1 }
 0x65f   : > { %v2477_v50 = vpop.f32.mrf.mxu0  ;;  %v2187_v57 = vpop.xlane.xlu1 %2186 }
 0x660   : > { %v2582_v15 = vmul.f32 %v3254_v16, %v2477_v50  ;;  %v5183_v62 = vpop.f32.mrf.mxu1  ;;  %v2183_v56 = vpop.xlane.xlu0 %2182  ;;  %3259 = vrcp.f32 %v2187_v57 }
 0x661   : > { %v2479_v51 = vpop.f32.mrf.mxu0  ;;  %3261 = vrcp.f32 %v2183_v56 }
 0x662   : > { %2627 = vrot.lane.b32.xlu1 %v2582_v15, %s3397_s28  ;;  %v2534_v24 = vpop.f32.mrf.mxu1 }
 0x663   : > { %v2195_v30 = vpop.xlane.xlu1 %2194 }
 0x664   : > { %v2191_v40 = vpop.xlane.xlu0 %2190 }
 0x665   : > { %3263 = vrcp.f32 %v2191_v40  ;;  %v3256_v7 = vpop.eup %3255 }
 0x666   : > { %3265 = vrcp.f32 %v2195_v30 }
 0x667   : > { %v2203_v33 = vpop.xlane.xlu1 %2202 }
 0x668   : > { %v2199_v31 = vpop.xlane.xlu0 %2198 }
 0x669   : > { %3267 = vrcp.f32 %v2199_v31  ;;  %v3258_v21 = vpop.eup %3257 }
 0x66a   : > { %3269 = vrcp.f32 %v2203_v33 }
 0x66b   : > { %v2211_v14 = vpop.xlane.xlu1 %2210 }
 0x66c   : > { %v2207_v27 = vpop.xlane.xlu0 %2206 }
 0x66d   : > { %3271 = vrcp.f32 %v2207_v27  ;;  %v3260_v34 = vpop.eup %3259 }
 0x66e   : > { %3273 = vrcp.f32 %v2211_v14  ;;  %v3262_v2 = vpop.eup %3261  ;;  %v2586_v35 = vmul.f32 %v3260_v34, %v5162_v60 }
 0x66f   : > { %v2219_v54 = vpop.xlane.xlu1 %2218 }
 0x670   : > { %v2215_v61 = vpop.xlane.xlu0 %2214 }
 0x671   : > { %3275 = vrcp.f32 %v2215_v61 }
 0x672   : > { %v3264_v12 = vpop.eup %3263  ;;  %3277 = vrcp.f32 %v2219_v54 }
 0x673   : > { %v2227_v55 = vpop.xlane.xlu1 %2226  ;;  %v3266_v13 = vpop.eup %3265  ;;  %v2587_v24 = vmul.f32 %v3264_v12, %v5168_v52 }
 0x674   : > { %v2223_v29 = vpop.xlane.xlu0 %2222  ;;  %v2588_v30 = vmul.f32 %v3266_v13, %v5172_v3 }
 0x675   : > { %3279 = vrcp.f32 %v2223_v29 }
 0x676   : > { %v3268_v51 = vpop.eup %3267  ;;  %3281 = vrcp.f32 %v2227_v55 }
 0x677   : > { %v2235_v26 = vpop.xlane.xlu1 %2234  ;;  %v3270_v33 = vpop.eup %3269  ;;  %v2589_v40 = vmul.f32 %v3268_v51, %v5174_v22 }
 0x678   : > { %v2231_v16 = vpop.xlane.xlu0 %2230  ;;  %v2590_v54 = vmul.f32 %v3270_v33, %v5176_v4 }
 0x679   : > { %3283 = vrcp.f32 %v2231_v16 }
 0x67a   : > { %v3272_v58 = vpop.eup %3271  ;;  %3285 = vrcp.f32 %v2235_v26 }
 0x67b   : > { %v2243_v19 = vpop.xlane.xlu1 %2242  ;;  %v3274_v31 = vpop.eup %3273  ;;  %v2591_v27 = vmul.f32 %v3272_v58, %v5178_v38 }
 0x67c   : > { %v2239_v56 = vpop.xlane.xlu0 %2238 }
 0x67d   : > { %3287 = vrcp.f32 %v2239_v56 }
 0x67e   : > { %v3276_v61 = vpop.eup %3275  ;;  %3289 = vrcp.f32 %v2243_v19 }
 0x67f   : > { %v5193_v25 = vpop.xlane.xlu1 %1164  ;;  %v3278_v26 = vpop.eup %3277 }
 0x680   : > { %v2247_v22 = vpop.xlane.xlu0 %2246 }
 0x681   : > { %3291 = vrcp.f32 %v2247_v22 }
 0x682   : > { %v3280_v38 = vpop.eup %3279 }
 0x683   : > { %v5199_v15 = vpop.xlane.xlu1 %1172  ;;  %v3282_v19 = vpop.eup %3281 }
 0x684   : > { %v1161_v12 = vpop.xlane.xlu0 %1160 }
 0x686   : > { %v3284_v29 = vpop.eup %3283 }
 0x687   : > { %v5207_v52 = vpop.xlane.xlu1 %1180 }
 0x688   : > { %v5186_v11 = vpop.f32.mrf.mxu1 }
 0x68a   : > { %v2539_v32 = vpop.f32.mrf.mxu1 }
 0x68b   : > { %v2592_v32 = vmul.f32 %v3274_v31, %v5180_v49 }
 0x68c   : > { %v2482_v0 = vpop.f32.mrf.mxu0  ;;  %v5188_v48 = vpop.f32.mrf.mxu1 }
 0x68d   : > { %v2583_v47 = vmul.f32 %v3256_v7, %v2482_v0  ;;  %v2251_v7 = vpop.xlane.xlu1 %2250  ;;  %v2594_v0 = vmul.f32 %v3278_v26, %v5186_v11 }
 0x68e   : > { %v2484_v28 = vpop.f32.mrf.mxu0  ;;  %v2544_v63 = vpop.f32.mrf.mxu1  ;;  %3293 = vrcp.f32 %v2251_v7 }
 0x68f   : > { %2629 = vrot.lane.b32.xlu1 %v2583_v47, %s3397_s28  ;;  %v2593_v28 = vmul.f32 %v3276_v61, %v5183_v62  ;;  %v2595_v63 = vmul.f32 %v3280_v38, %v5188_v48  ;;  %v3286_v62 = vpop.eup %3285  ;;  %3295 = vrcp.f32 %v5144_v6 }
 0x690   : > { %v2487_v8 = vpop.f32.mrf.mxu0  ;;  %v5191_v59 = vpop.f32.mrf.mxu1  ;;  %3297 = vrcp.f32 %v5146_v46 }
 0x691   : > { %v2584_v41 = vmul.f32 %v3258_v21, %v2487_v8  ;;  %v2596_v21 = vmul.f32 %v3282_v19, %v5191_v59  ;;  %v5235_v16 = vpop.xlane.xlu1 %1188  ;;  %3299 = vrcp.f32 %v5148_v37 }
 0x692   : > { %v2489_v53 = vpop.f32.mrf.mxu0  ;;  %v2549_v17 = vpop.f32.mrf.mxu1  ;;  %3301 = vrcp.f32 %v5150_v5 }
 0x693   : > { %2631 = vrot.lane.b32.xlu1 %v2584_v41, %s3397_s28  ;;  %v3288_v53 = vpop.eup %3287  ;;  %3303 = vrcp.f32 %v5154_v36  ;;  %v5553_v36 = vld [vmem:[#allocation9_spill] sm:$0xff] }
 0x694   : > { %v2492_v43 = vpop.f32.mrf.mxu0  ;;  %v2552_v1 = vpop.f32.mrf.mxu1  ;;  %3305 = vrcp.f32 %v5152_v45 }
 0x695   : > { %v2585_v39 = vmul.f32 %v3262_v2, %v2492_v43  ;;  %v2597_v11 = vmul.f32 %v3284_v29, %v2552_v1  ;;  %v3290_v17 = vpop.eup %3289  ;;  %v1169_v1 = vpop.xlane.xlu0 %1168  ;;  %3307 = vrcp.f32 %v5158_v18  ;;  %v5558_v29 = vld [vmem:[#allocation6_spill] sm:$0xff] }
 0x696   : > { %v2494_v20 = vpop.f32.mrf.mxu0  ;;  %v2554_v50 = vpop.f32.mrf.mxu1  ;;  %3309 = vrcp.f32 %v5156_v9 }
 0x697   : > { %2633 = vrot.lane.b32.xlu0 %v2585_v39, %s3397_s28  ;;  %2635 = vrot.lane.b32.xlu1 %v2586_v35, %s3397_s28  ;;  %v3292_v43 = vpop.eup %3291  ;;  %3311 = vrcp.f32 %v5164_v23 }
 0x698   : > { %v2557_v57 = vpop.f32.mrf.mxu1  ;;  %3313 = vrcp.f32 %v5160_v10 }
 0x699   : > { %v2598_v34 = vmul.f32 %v3286_v62, %v2557_v57  ;;  %v5230_v13 = vpop.xlane.xlu0 %1176  ;;  %v5550_v57 = vld [vmem:[#allocation3_spill] sm:$0xff]  ;;  %3315 = vrcp.f32 %v5170_v42  ;;  %v5554_v42 = vld [vmem:[#allocation21_spill] sm:$0xff] }
 0x69a   : > { %v2559_v60 = vpop.f32.mrf.mxu1  ;;  %3317 = vrcp.f32 %v5166_v44  ;;  %v5559_v62 = vld [vmem:[#allocation7_spill] sm:$0xff] }
 0x69b   : > { %2637 = vrot.lane.b32.xlu0 %v2587_v24, %s3397_s28  ;;  %2639 = vrot.lane.b32.xlu1 %v2588_v30, %s3397_s28  ;;  %v3294_v59 = vpop.eup %3293  ;;  %v5247_v30 = vpop.xlane.xlu1 %1196  ;;  %v5551_v60 = vld [vmem:[#allocation19_spill] sm:$0xff]  ;;  %3319 = vrcp.f32 %v5193_v25 }
 0x69c   : > { %v2562_v14 = vpop.f32.mrf.mxu1  ;;  %v3296_v50 = vpop.eup %3295  ;;  %3321 = vrcp.f32 %v1161_v12  ;;  %v5561_v12 = vld [vmem:[#allocation26_spill] sm:$0xff] }
 0x69d   : > { %v2599_v2 = vmul.f32 %v3288_v53, %v2562_v14  ;;  %v5233_v20 = vpop.xlane.xlu0 %1184  ;;  %v1549_v6 = vmul.f32 %v3296_v50, %v5550_v57  ;;  %v3298_v24 = vpop.eup %3297  ;;  %3323 = vrcp.f32 %v5199_v15  ;;  %v5562_v57 = vld [vmem:[#allocation22_spill] sm:$0xff] }
 0x69e   : > { %v2564_v3 = vpop.f32.mrf.mxu1  ;;  %v1550_v58 = vmul.f32 %v3298_v24, %v5551_v60  ;;  %3325 = vrcp.f32 %v1169_v1  ;;  %v5563_v24 = vld [vmem:[#allocation27_spill] sm:$0xff] }
 0x69f   : > { %2641 = vrot.lane.b32.xlu0 %v2589_v40, %s3397_s28  ;;  %2643 = vrot.lane.b32.xlu1 %v2590_v54, %s3397_s28  ;;  %v3300_v40 = vpop.eup %3299  ;;  %v5552_v54 = vld [vmem:[#allocation18_spill] sm:$0xff]  ;;  %3327 = vrcp.f32 %v5207_v52 }
 0x6a0   : > { %v2567_v55 = vpop.f32.mrf.mxu1  ;;  %v1551_v31 = vmul.f32 %v3300_v40, %v5552_v54  ;;  %v3302_v3 = vpop.eup %3301  ;;  %3329 = vrcp.f32 %v5230_v13  ;;  %v5564_v40 = vld [vmem:[#allocation23_spill] sm:$0xff]  ;;  %v5565_v54 = vld [vmem:[#allocation28_spill] sm:$0xff] }
 0x6a1   : > { %v2600_v48 = vmul.f32 %v3290_v17, %v2567_v55  ;;  %v5237_v51 = vpop.xlane.xlu0 %1192  ;;  %v3304_v45 = vpop.eup %3303  ;;  %v1552_v9 = vmul.f32 %v3302_v3, %v5553_v36  ;;  %3331 = vrcp.f32 %v5233_v20 }
 0x6a2   : > { %v2569_v4 = vpop.f32.mrf.mxu1  ;;  %v3306_v18 = vpop.eup %3305  ;;  %3333 = vrcp.f32 %v5235_v16 }
 0x6a3   : > { %2645 = vrot.lane.b32.xlu0 %v2591_v27, %s3397_s28  ;;  %2647 = vrot.lane.b32.xlu1 %v2592_v32, %s3397_s28  ;;  %v3308_v55 = vpop.eup %3307  ;;  %v1553_v27 = vmul.f32 %v3306_v18, %v5554_v42  ;;  %v5555_v32 = vld [vmem:[#allocation20_spill] sm:$0xff]  ;;  %3335 = vrcp.f32 %v5237_v51  ;;  %v5566_v18 = vld [vmem:[#allocation25_spill] sm:$0xff] }
 0x6a4   : > { %v2572_v47 = vpop.f32.mrf.mxu1  ;;  %v1554_v61 = vmul.f32 %v3304_v45, %v5555_v32  ;;  %v3310_v22 = vpop.eup %3309  ;;  %3337 = vrcp.f32 %v5247_v30 }
 0x6a5   : > { %v2601_v39 = vmul.f32 %v3292_v43, %v2572_v47  ;;  %v3312_v25 = vpop.eup %3311  ;;  %v5560_v43 = vld [vmem:[#allocation10_spill] sm:$0xff] }
 0x6a6   : > { %v2574_v49 = vpop.f32.mrf.mxu1 }
 0x6a7   : > { %2649 = vrot.lane.b32.xlu0 %v2593_v28, %s3397_s28  ;;  %2651 = vrot.lane.b32.xlu1 %v2594_v0, %s3397_s28  ;;  %v5556_v0 = vld [vmem:[#allocation5_spill] sm:$0xff]  ;;  %v5557_v28 = vld [vmem:[#allocation8_spill] sm:$0xff]  ;;  %v3314_v49 = vpop.eup %3313 }
 0x6a8   : > { %v2577_v8 = vpop.f32.mrf.mxu1  ;;  %v1555_v47 = vmul.f32 %v3310_v22, %v5556_v0  ;;  %v1556_v38 = vmul.f32 %v3308_v55, %v5557_v28  ;;  %v3316_v15 = vpop.eup %3315 }
 0x6a9   : > { %v2602_v35 = vmul.f32 %v3294_v59, %v2577_v8 }
 0x6aa   : > { %v2579_v41 = vpop.f32.mrf.mxu1 }
 0x6ab   : > { %2653 = vrot.lane.b32.xlu0 %v2595_v63, %s3397_s28  ;;  %2655 = vrot.lane.b32.xlu1 %v2596_v21, %s3397_s28  ;;  %v1557_v41 = vmul.f32 %v3314_v49, %v5558_v29 }
 0x6af   : > { %2657 = vrot.lane.b32.xlu0 %v2597_v11, %s3397_s28  ;;  %2659 = vrot.lane.b32.xlu1 %v2598_v34, %s3397_s28  ;;  %v1558_v11 = vmul.f32 %v3312_v25, %v5559_v62  ;;  %v3318_v34 = vpop.eup %3317 }
 0x6b0   : > { %v1559_v59 = vmul.f32 %v3318_v34, %v5560_v43 }
 0x6b3   : > { %2661 = vrot.lane.b32.xlu0 %v2599_v2, %s3397_s28  ;;  %2663 = vrot.lane.b32.xlu1 %v2600_v48, %s3397_s28  ;;  %v3320_v48 = vpop.eup %3319 }
 0x6b7   : > { %2665 = vrot.lane.b32.xlu0 %v2601_v39, %s3397_s28  ;;  %2667 = vrot.lane.b32.xlu1 %v2602_v35, %s3397_s28  ;;  %v1560_v39 = vmul.f32 %v3316_v15, %v5561_v12  ;;  %v3322_v35 = vpop.eup %3321 }
 0x6b8   : > { %v3324_v16 = vpop.eup %3323 }
 0x6d0   : > { %v2626_v46 = vpop.permute.xlu0 %2625 }
 0x6d1   : > { %v2691_v33 = vsel %vm603_vm1, %v1549_v6, %v2626_v46  ;;  %v1561_v6 = vmul.f32 %v3322_v35, %v5562_v57  ;;  %v1562_v46 = vmul.f32 %v3320_v48, %v5563_v24 }
 0x6d2   : > { %2713 = vst.msk [vmem:[%s5244_s6] sm:$0xff] %vm229_vm0, %v2691_v33  ;;  %v3326_v33 = vpop.eup %3325 }
 0x6d3   : > { %v1563_v30 = vmul.f32 %v3326_v33, %v5564_v40 }
 0x6d4   : > { %v2628_v56 = vpop.permute.xlu1 %2627 }
 0x6d5   : > { %v2692_v14 = vsel %vm603_vm1, %v1550_v58, %v2628_v56 }
 0x6d6   : > { %2714 = vst.msk [vmem:[%s5244_s6 + $0x8] sm:$0xff] %vm229_vm0, %v2692_v14  ;;  %v3328_v14 = vpop.eup %3327 }
 0x6d7   : > { %v3330_v3 = vpop.eup %3329 }
 0x701   : > { %v2630_v37 = vpop.permute.xlu1 %2629 }
 0x702   : > { %v2693_v5 = vsel %vm603_vm1, %v1551_v31, %v2630_v37  ;;  %v1564_v31 = vmul.f32 %v3324_v16, %v5565_v54 }
 0x703   : > { %2715 = vst.msk [vmem:[%s5244_s6 + $0x10] sm:$0xff] %vm229_vm0, %v2693_v5 }
 0x705   : > { %v2632_v23 = vpop.permute.xlu1 %2631 }
 0x706   : > { %v2694_v10 = vsel %vm603_vm1, %v1552_v9, %v2632_v23  ;;  %v3332_v9 = vpop.eup %3331  ;;  %v1565_v23 = vmul.f32 %v3330_v3, %v5566_v18 }
 0x707   : > { %2716 = vst.msk [vmem:[%s5244_s6 + $0x18] sm:$0xff] %vm229_vm0, %v2694_v10  ;;  %v5567_v10 = vld [vmem:[#allocation29_spill] sm:$0xff]  ;;  %v3334_v42 = vpop.eup %3333 }
 0x708   : > { %v1566_v55 = vmul.f32 %v3328_v14, %v5567_v10 }
 0x709   : > { %v2634_v44 = vpop.permute.xlu0 %2633  ;;  %v2636_v4 = vpop.permute.xlu1 %2635 }
 0x70a   : > { %v2695_v26 = vsel %vm603_vm1, %v1553_v27, %v2634_v44  ;;  %v2696_v7 = vsel %vm603_vm1, %v1554_v61, %v2636_v4  ;;  %v3336_v44 = vpop.eup %3335  ;;  %v5568_v4 = vld [vmem:[#allocation30_spill] sm:$0xff] }
 0x70b   : > { %2717 = vst.msk [vmem:[%s5244_s6 + $0x20] sm:$0xff] %vm229_vm0, %v2695_v26  ;;  %2718 = vst.msk [vmem:[%s5244_s6 + $0x28] sm:$0xff] %vm229_vm0, %v2696_v7  ;;  %v1567_v26 = vmul.f32 %v3332_v9, %v5568_v4  ;;  %v5569_v7 = vld [vmem:[#allocation31_spill] sm:$0xff]  ;;  %v3338_v0 = vpop.eup %3337 }
 0x70c   : > { %v1568_v25 = vmul.f32 %v3334_v42, %v5569_v7 }
 0x70d   : > { %v2638_v19 = vpop.permute.xlu0 %2637  ;;  %v2640_v63 = vpop.permute.xlu1 %2639 }
 0x70e   : > { %v2697_v21 = vsel %vm603_vm1, %v1555_v47, %v2638_v19  ;;  %v2698_v8 = vsel %vm603_vm1, %v1556_v38, %v2640_v63  ;;  %v5570_v19 = vld [vmem:[#allocation32_spill] sm:$0xff] }
 0x70f   : > { %2719 = vst.msk [vmem:[%s5244_s6 + $0x30] sm:$0xff] %vm229_vm0, %v2697_v21  ;;  %2720 = vst.msk [vmem:[%s5244_s6 + $0x38] sm:$0xff] %vm229_vm0, %v2698_v8  ;;  %v1569_v63 = vmul.f32 %v3336_v44, %v5570_v19  ;;  %v5571_v21 = vld [vmem:[#allocation33_spill] sm:$0xff] }
 0x710   : > { %v1570_v8 = vmul.f32 %v3338_v0, %v5571_v21 }
 0x711   : > { %v2642_v53 = vpop.permute.xlu0 %2641  ;;  %v2644_v17 = vpop.permute.xlu1 %2643 }
 0x712   : > { %v2699_v2 = vsel %vm603_vm1, %v1557_v41, %v2642_v53  ;;  %v2700_v52 = vsel %vm603_vm1, %v1558_v11, %v2644_v17 }
 0x713   : > { %2721 = vst.msk [vmem:[%s5244_s6 + $0x40] sm:$0xff] %vm229_vm0, %v2699_v2  ;;  %2722 = vst.msk [vmem:[%s5244_s6 + $0x48] sm:$0xff] %vm229_vm0, %v2700_v52 }
 0x715   : > { %v2646_v1 = vpop.permute.xlu0 %2645  ;;  %v2648_v13 = vpop.permute.xlu1 %2647 }
 0x716   : > { %v2701_v50 = vsel %vm603_vm1, %v1559_v59, %v2646_v1  ;;  %v2702_v20 = vsel %vm603_vm1, %v1560_v39, %v2648_v13 }
 0x717   : > { %2723 = vst.msk [vmem:[%s5244_s6 + $0x50] sm:$0xff] %vm229_vm0, %v2701_v50  ;;  %2724 = vst.msk [vmem:[%s5244_s6 + $0x58] sm:$0xff] %vm229_vm0, %v2702_v20 }
 0x719   : > { %v2650_v60 = vpop.permute.xlu0 %2649  ;;  %v2652_v58 = vpop.permute.xlu1 %2651 }
 0x71a   : > { %v2703_v56 = vsel %vm603_vm1, %v1561_v6, %v2650_v60  ;;  %v2704_v51 = vsel %vm603_vm1, %v1562_v46, %v2652_v58 }
 0x71b   : > { %2725 = vst.msk [vmem:[%s5244_s6 + $0x60] sm:$0xff] %vm229_vm0, %v2703_v56  ;;  %2726 = vst.msk [vmem:[%s5244_s6 + $0x68] sm:$0xff] %vm229_vm0, %v2704_v51 }
 0x71d   : > { %v2654_v37 = vpop.permute.xlu0 %2653  ;;  %v2656_v5 = vpop.permute.xlu1 %2655 }
 0x71e   : > { %v2705_v45 = vsel %vm603_vm1, %v1563_v30, %v2654_v37  ;;  %v2706_v36 = vsel %vm603_vm1, %v1564_v31, %v2656_v5 }
 0x71f   : > { %2727 = vst.msk [vmem:[%s5244_s6 + $0x70] sm:$0xff] %vm229_vm0, %v2705_v45  ;;  %2728 = vst.msk [vmem:[%s5244_s6 + $0x78] sm:$0xff] %vm229_vm0, %v2706_v36 }
 0x721   : > { %v2658_v27 = vpop.permute.xlu0 %2657  ;;  %v2660_v32 = vpop.permute.xlu1 %2659 }
 0x722   : > { %v2707_v61 = vsel %vm603_vm1, %v1565_v23, %v2658_v27  ;;  %v2708_v22 = vsel %vm603_vm1, %v1566_v55, %v2660_v32 }
 0x723   : > { %2729 = vst.msk [vmem:[%s5244_s6 + $0x80] sm:$0xff] %vm229_vm0, %v2707_v61  ;;  %2730 = vst.msk [vmem:[%s5244_s6 + $0x88] sm:$0xff] %vm229_vm0, %v2708_v22 }
 0x725   : > { %v2662_v47 = vpop.permute.xlu0 %2661  ;;  %v2664_v28 = vpop.permute.xlu1 %2663 }
 0x726   : > { %v2709_v38 = vsel %vm603_vm1, %v1567_v26, %v2662_v47  ;;  %v2710_v49 = vsel %vm603_vm1, %v1568_v25, %v2664_v28 }
 0x727   : > { %2731 = vst.msk [vmem:[%s5244_s6 + $0x90] sm:$0xff] %vm229_vm0, %v2709_v38  ;;  %2732 = vst.msk [vmem:[%s5244_s6 + $0x98] sm:$0xff] %vm229_vm0, %v2710_v49 }
 0x729   : > { %v2666_v15 = vpop.permute.xlu0 %2665  ;;  %v2668_v29 = vpop.permute.xlu1 %2667 }
 0x72a   : > { %v2711_v41 = vsel %vm603_vm1, %v1569_v63, %v2666_v15  ;;  %v2712_v62 = vsel %vm603_vm1, %v1570_v8, %v2668_v29 }
 0x72b   : > { %2733 = vst.msk [vmem:[%s5244_s6 + $0xa0] sm:$0xff] %vm229_vm0, %v2711_v41  ;;  %2734 = vst.msk [vmem:[%s5244_s6 + $0xa8] sm:$0xff] %vm229_vm0, %v2712_v62 }
 0x72c PF: > { %s14_s15 = sadd.s32 1, %s3389_s15  }
 0x72d   : > { %p11_p4 = scmp.ge.s32.totalorder %s14_s15, 4  }
 0x72f   :  { %13 = sbr.rel (!%p11_p4) target bundleno = 1 (0x1), region = 66 }

</bundles_post_ra>
